<compile_context>
chip_gen: v6e
topology: v6e:2x2x1
jax: 0.10.0
libtpu: 0.0.40
codegen_flags: <defaults>
</compile_context>

<pallas_src>
import functools

import jax
import jax.numpy as jnp
from jax.experimental import pallas as pl
from jax.experimental.pallas import tpu as pltpu

BN_EPS = 1e-5


def _round_up(x, m):
    return (x + m - 1) // m * m


def _pick_tile(hw, w, cap=2048):
    """Tiling over the flattened H*W spatial positions.

    Returns (TS, TB, HWpad, n_sp):
      TS    output tile width (lanes), a multiple of TB (hence of 128),
      TB    halo block width taken from the next tile (>= 2*W rows),
      HWpad = n_sp * TS >= H*W (padded tail is masked / sliced off).
    """
    tb = _round_up(2 * w, 128)
    cap = max(cap, tb)
    if hw <= cap:
        n_sp = 1
        ts = _round_up(max(hw, tb), tb)
    else:
        n_sp = -(-hw // cap)
        ts = _round_up(-(-hw // n_sp), tb)
    return ts, tb, ts * n_sp, n_sp


def _vmem_limit_bytes():
    # ~75% of physical VMEM, capped at 96 MiB: 96 MiB on v5e/v6e (128 MiB
    # chips), 48 MiB on v7x (64 MiB per TensorCore).
    try:
        cap = pltpu.get_tpu_info().vmem_capacity_bytes
    except Exception:
        cap = 64 * 1024 * 1024
    return int(min(96 * 1024 * 1024, cap * 3 // 4))


# ---------- pass 1: 3x3 conv as 3 accumulated MXU matmuls + BN moment partials ----------
def conv_moments_kernel(xa_ref, xb_ref, w_ref, conv_ref, mom_ref, *, ts, width, hw, cp):
    i = pl.program_id(1)
    xa = xa_ref[0]                       # [3*Cin, TS]  bf16, rows [i*TS, (i+1)*TS)
    xb = xb_ref[0]                       # [3*Cin, TB]  bf16, halo rows from the next tile

    def tap(off):                        # rows shifted by off = kh * W (static)
        if off == 0:
            return xa
        if off == ts:
            return xb[:, :ts]
        return jnp.concatenate([xa[:, off:], xb[:, :off]], axis=1)

    acc = jnp.dot(w_ref[0], tap(0), preferred_element_type=jnp.float32)
    acc = acc + jnp.dot(w_ref[1], tap(width), preferred_element_type=jnp.float32)
    acc = acc + jnp.dot(w_ref[2], tap(2 * width), preferred_element_type=jnp.float32)
    # acc: [CP, TS] f32, channel-major (spatial on lanes).

    # BN moment partials over valid (non-padded) spatial positions only.
    cols = jax.lax.broadcasted_iota(jnp.int32, (1, ts), 1) + i * ts
    valid = (cols < hw).astype(jnp.float32)
    accv = acc * valid
    s1 = jnp.sum(accv, axis=1, keepdims=True)            # [CP, 1] per-channel sum
    s2 = jnp.sum(accv * acc, axis=1, keepdims=True)      # [CP, 1] per-channel sum of squares
    mom_ref[0, 0] = jnp.concatenate(
        [s1, s2, jnp.zeros((cp, 6), jnp.float32)], axis=1)

    # bf16 conv intermediate: written once, read twice downstream (HBM-bound).
    conv_ref[0] = acc.astype(jnp.bfloat16)


# ---------- pass 2: BN + ReLU, accumulate per-batch GAP partials ----------
def bn_pool_kernel(conv_ref, ss_ref, pooled_ref, *, ts, hw):
    i = pl.program_id(1)
    x = conv_ref[0].astype(jnp.float32)                   # [CP, TS]
    scale = ss_ref[:, 0:1]
    shift = ss_ref[:, 1:2]
    x1 = jnp.maximum(x * scale + shift, 0.0)
    cols = jax.lax.broadcasted_iota(jnp.int32, (1, ts), 1) + i * ts
    valid = (cols < hw).astype(jnp.float32)
    pooled_ref[0, 0] = jnp.sum(x1 * valid, axis=1, keepdims=True)   # [CP, 1]


# ---------- pass 3: BN + ReLU + broadcast multiply by the channel attention ----------
def bn_scale_kernel(conv_ref, ssa_ref, out_ref):
    x = conv_ref[0].astype(jnp.float32)                   # [CP, TS]
    scale = ssa_ref[0, :, 0:1]
    shift = ssa_ref[0, :, 1:2]
    att = ssa_ref[0, :, 2:3]
    out_ref[0] = jnp.maximum(x * scale + shift, 0.0) * att


def svd_cat_all(img):
    # svd_cat(img, [], isSaved=False): one rank-1 component per singular value,
    # channels ordered component-major / original-channel-minor (NCHW out).
    u, s, vh = jnp.linalg.svd(img, full_matrices=False)   # [B,C,H,K],[B,C,K],[B,C,K,W]
    comps = jnp.einsum('bcn,bchn,bcnw->bnchw', s, u, vh)  # [B,K,C,H,W]
    b, k, c, h, w = comps.shape
    return comps.reshape(b, k * c, h, w)


def sdfem_forward(img, params):
    # --- channel expansion (plain JAX; SVD has no Pallas equivalent) ---
    x = svd_cat_all(img).astype(jnp.float32)              # [B, Cin, H, W] NCHW
    B, Cin, H, W = x.shape
    Cout = params['w1'].shape[-1]
    CP = _round_up(max(Cout, 8), 8)                       # channel dim padded to sublanes
    K3 = 3 * Cin
    HW = H * W
    TS, TB, HWpad, n_sp = _pick_tile(HW, W)
    ratio = TS // TB
    grid = (B, n_sp)
    rpad = HWpad + TB                                      # extra halo block at the end

    # --- W-only im2col (3x Cin, channel-major, flattened rows), bf16 ---
    # x_wcol[b, kw*Cin + ci, hp*W + c] = x_padded[b, ci, hp, c + kw]
    xp = jnp.pad(x, ((0, 0), (0, 0), (1, 1), (1, 1)))
    taps = jnp.stack([xp[:, :, :, kw:kw + W] for kw in range(3)], axis=1)   # [B,3,Cin,H+2,W]
    x_wcol = taps.reshape(B, K3, (H + 2) * W)
    x_wcol = jnp.pad(x_wcol, ((0, 0), (0, 0), (0, rpad - (H + 2) * W)))
    x_wcol = x_wcol.astype(jnp.bfloat16)

    # conv weight [3(kh), 3(kw), Cin, Cout] -> [3, CP, 3*Cin] ((kw, ci)-minor).
    w_col = jnp.transpose(params['w1'], (0, 3, 1, 2)).reshape(3, Cout, K3)
    w_col = jnp.pad(w_col, ((0, 0), (0, CP - Cout), (0, 0))).astype(jnp.bfloat16)

    cparams = pltpu.CompilerParams(
        dimension_semantics=("parallel", "parallel"),
        vmem_limit_bytes=_vmem_limit_bytes())

    # ---- pass 1: conv + BN moment partials ----
    conv, mom = pl.pallas_call(
        functools.partial(conv_moments_kernel, ts=TS, width=W, hw=HW, cp=CP),
        grid=grid,
        in_specs=[
            pl.BlockSpec((1, K3, TS), lambda b, i: (b, 0, i)),              # tile i
            pl.BlockSpec((1, K3, TB), lambda b, i: (b, 0, (i + 1) * ratio)),  # halo (next tile)
            pl.BlockSpec((3, CP, K3), lambda b, i: (0, 0, 0)),              # weights (resident)
        ],
        out_specs=[
            pl.BlockSpec((1, CP, TS), lambda b, i: (b, 0, i)),
            pl.BlockSpec((1, 1, CP, 8), lambda b, i: (b, i, 0, 0)),
        ],
        out_shape=[
            jax.ShapeDtypeStruct((B, CP, HWpad), jnp.bfloat16),             # bf16, channel-major
            jax.ShapeDtypeStruct((B, n_sp, CP, 8), jnp.float32),
        ],
        compiler_params=cparams,
    )(x_wcol, x_wcol, w_col)

    # BN affine from global train-mode batch statistics (biased variance).
    # TODO(synk): E[x^2]-E[x]^2 in f32 can lose precision for huge activations.
    sums = jnp.sum(mom, axis=(0, 1))                       # [CP, 8]
    n = float(B * HW)
    mean = sums[:, 0] / n
    var = jnp.maximum(sums[:, 1] / n - mean * mean, 0.0)
    gamma = jnp.pad(params['gamma'], (0, CP - Cout))
    beta = jnp.pad(params['beta'], (0, CP - Cout))
    scale_v = gamma * jax.lax.rsqrt(var + BN_EPS)
    shift_v = beta - mean * scale_v
    ss = jnp.stack([scale_v, shift_v] + [jnp.zeros((CP,), jnp.float32)] * 6, axis=-1)

    # ---- pass 2: BN + ReLU, per-batch GAP partials ----
    pooled_part = pl.pallas_call(
        functools.partial(bn_pool_kernel, ts=TS, hw=HW),
        grid=grid,
        in_specs=[
            pl.BlockSpec((1, CP, TS), lambda b, i: (b, 0, i)),
            pl.BlockSpec((CP, 8), lambda b, i: (0, 0)),
        ],
        out_specs=pl.BlockSpec((1, 1, CP, 1), lambda b, i: (b, i, 0, 0)),
        out_shape=jax.ShapeDtypeStruct((B, n_sp, CP, 1), jnp.float32),
        compiler_params=cparams,
    )(conv, ss)

    pooled = jnp.sum(pooled_part, axis=1)[:, :Cout, 0] / float(HW)   # [B, Cout]

    # channel attention (GAP -> 1x1 -> ReLU -> 1x1 -> Mish): tiny matmuls, plain XLA.
    h = jnp.maximum(pooled @ params['wa1'] + params['ba1'], 0.0)
    a = h @ params['wa2'] + params['ba2']
    a = a * jnp.tanh(jax.nn.softplus(a))                             # Mish
    a_pad = jnp.pad(a, ((0, 0), (0, CP - Cout)))                     # [B, CP]
    ssa = jnp.stack(
        [jnp.broadcast_to(scale_v, (B, CP)),
         jnp.broadcast_to(shift_v, (B, CP)),
         a_pad] + [jnp.zeros((B, CP), jnp.float32)] * 5, axis=-1)    # [B, CP, 8]

    # ---- pass 3: BN + ReLU + attention scale; channel-major == NCHW for free ----
    out_pad = pl.pallas_call(
        bn_scale_kernel,
        grid=grid,
        in_specs=[
            pl.BlockSpec((1, CP, TS), lambda b, i: (b, 0, i)),
            pl.BlockSpec((1, CP, 8), lambda b, i: (b, 0, 0)),
        ],
        out_specs=pl.BlockSpec((1, CP, TS), lambda b, i: (b, 0, i)),
        out_shape=jax.ShapeDtypeStruct((B, CP, HWpad), jnp.float32),
        compiler_params=cparams,
    )(conv, ssa)

    return out_pad[:, :Cout, :HW].reshape(B, Cout, H, W)             # NCHW


def init_params(key, in_channels, out_channels):
    k1, k2, k3, k4, k5 = jax.random.split(key, 5)
    cmid = max(out_channels // 2, 1)
    return dict(
        w1=jax.random.normal(k1, (3, 3, in_channels, out_channels), jnp.float32) * 0.1,
        gamma=jnp.ones((out_channels,), jnp.float32),
        beta=jnp.zeros((out_channels,), jnp.float32),
        wa1=jax.random.normal(k2, (out_channels, cmid), jnp.float32) * 0.1,
        ba1=jax.random.normal(k3, (cmid,), jnp.float32) * 0.01,
        wa2=jax.random.normal(k4, (cmid, out_channels), jnp.float32) * 0.1,
        ba2=jax.random.normal(k5, (out_channels,), jnp.float32) * 0.01,
    )


if __name__ == "__main__":
    key = jax.random.PRNGKey(0)
    kimg, kparam = jax.random.split(key)

    # svd_cat expands channels C -> C*W (W <= H assumed by the PyTorch module),
    # so the module's in_channels must be C*W.
    B, C, H, W = 2, 2, 8, 8
    in_channels = C * W          # 16
    out_channels = 8             # chan_att bottleneck = 4

    img = jax.random.normal(kimg, (B, C, H, W), jnp.float32)
    params = init_params(kparam, in_channels, out_channels)

    out = jax.jit(sdfem_forward)(img, params)
    jax.block_until_ready(out)
    assert out.shape == (B, out_channels, H, W), out.shape
    print("KERNEL_OK")
</pallas_src>

<mosaic_0001>
module attributes {stable_mosaic.version = 11 : i64} {
  func.func @conv_moments_kernel(%arg0: i32, %arg1: i32, %arg2: memref<1x48x128xbf16, #tpu.memory_space<vmem>>, %arg3: memref<1x48x128xbf16, #tpu.memory_space<vmem>>, %arg4: memref<3x8x48xbf16, #tpu.memory_space<vmem>>, %arg5: memref<1x8x128xbf16, #tpu.memory_space<vmem>>, %arg6: memref<1x1x8x8xf32, #tpu.memory_space<vmem>>) attributes {dimension_semantics = [#tpu.dimension_semantics<parallel>, #tpu.dimension_semantics<parallel>], iteration_bounds = array<i64: 2, 1>, scalar_prefetch = 0 : i64, scratch_operands = 0 : i64, tpu.core_type = #tpu.core_type<tc>, window_params = [{transform_indices = @transform_0, window_bounds = array<i64: 1, 48, 128>}, {transform_indices = @transform_1, window_bounds = array<i64: 1, 48, 128>}, {pipeline_mode = #tpu.pipeline_mode<synchronous>, transform_indices = @transform_2, window_bounds = array<i64: 3, 8, 48>}, {transform_indices = @transform_3, window_bounds = array<i64: 1, 8, 128>}, {transform_indices = @transform_4, window_bounds = array<i64: 1, 1, 8, 8>}]} {
    %c0 = arith.constant 0 : index
    %c0_0 = arith.constant 0 : index
    %c0_1 = arith.constant 0 : index
    %0 = vector.load %arg2[%c0, %c0_0, %c0_1] : memref<1x48x128xbf16, #tpu.memory_space<vmem>>, vector<1x48x128xbf16>
    %1 = vector.shape_cast %0 : vector<1x48x128xbf16> to vector<48x128xbf16>
    %c0_2 = arith.constant 0 : index
    %c0_3 = arith.constant 0 : index
    %c0_4 = arith.constant 0 : index
    %2 = vector.load %arg3[%c0_2, %c0_3, %c0_4] : memref<1x48x128xbf16, #tpu.memory_space<vmem>>, vector<1x48x128xbf16>
    %3 = vector.shape_cast %2 : vector<1x48x128xbf16> to vector<48x128xbf16>
    %c0_5 = arith.constant 0 : index
    %c0_6 = arith.constant 0 : index
    %c0_7 = arith.constant 0 : index
    %4 = vector.load %arg4[%c0_5, %c0_6, %c0_7] : memref<3x8x48xbf16, #tpu.memory_space<vmem>>, vector<1x8x48xbf16>
    %5 = vector.shape_cast %4 : vector<1x8x48xbf16> to vector<8x48xbf16>
    %cst = arith.constant dense<0.000000e+00> : vector<8x128xf32>
    %6 = tpu.matmul %5, %1, %cst {dimension_numbers = #tpu.dot_dimension_numbers<[1], [0], [0], [1], [0, 0, 1, 1], [], []>} : vector<8x48xbf16>, vector<48x128xbf16>, vector<8x128xf32> -> vector<8x128xf32>
    %c1 = arith.constant 1 : index
    %c0_8 = arith.constant 0 : index
    %c0_9 = arith.constant 0 : index
    %7 = vector.load %arg4[%c1, %c0_8, %c0_9] : memref<3x8x48xbf16, #tpu.memory_space<vmem>>, vector<1x8x48xbf16>
    %8 = vector.shape_cast %7 : vector<1x8x48xbf16> to vector<8x48xbf16>
    %9 = vector.extract_strided_slice %1 {offsets = [0, 8], sizes = [48, 120], strides = [1, 1]} : vector<48x128xbf16> to vector<48x120xbf16>
    %10 = vector.extract_strided_slice %3 {offsets = [0, 0], sizes = [48, 8], strides = [1, 1]} : vector<48x128xbf16> to vector<48x8xbf16>
    %11 = tpu.concatenate %9, %10 in 1 : vector<48x120xbf16>, vector<48x8xbf16> -> vector<48x128xbf16>
    %cst_10 = arith.constant dense<0.000000e+00> : vector<8x128xf32>
    %12 = tpu.matmul %8, %11, %cst_10 {dimension_numbers = #tpu.dot_dimension_numbers<[1], [0], [0], [1], [0, 0, 1, 1], [], []>} : vector<8x48xbf16>, vector<48x128xbf16>, vector<8x128xf32> -> vector<8x128xf32>
    %13 = arith.addf %6, %12 : vector<8x128xf32>
    %c2 = arith.constant 2 : index
    %c0_11 = arith.constant 0 : index
    %c0_12 = arith.constant 0 : index
    %14 = vector.load %arg4[%c2, %c0_11, %c0_12] : memref<3x8x48xbf16, #tpu.memory_space<vmem>>, vector<1x8x48xbf16>
    %15 = vector.shape_cast %14 : vector<1x8x48xbf16> to vector<8x48xbf16>
    %16 = vector.extract_strided_slice %1 {offsets = [0, 16], sizes = [48, 112], strides = [1, 1]} : vector<48x128xbf16> to vector<48x112xbf16>
    %17 = vector.extract_strided_slice %3 {offsets = [0, 0], sizes = [48, 16], strides = [1, 1]} : vector<48x128xbf16> to vector<48x16xbf16>
    %18 = tpu.concatenate %16, %17 in 1 : vector<48x112xbf16>, vector<48x16xbf16> -> vector<48x128xbf16>
    %cst_13 = arith.constant dense<0.000000e+00> : vector<8x128xf32>
    %19 = tpu.matmul %15, %18, %cst_13 {dimension_numbers = #tpu.dot_dimension_numbers<[1], [0], [0], [1], [0, 0, 1, 1], [], []>} : vector<8x48xbf16>, vector<48x128xbf16>, vector<8x128xf32> -> vector<8x128xf32>
    %20 = arith.addf %13, %19 : vector<8x128xf32>
    %21 = tpu.iota {dimensions = array<i32: 1>} : vector<1x128xi32>
    %c128_i32 = arith.constant 128 : i32
    %22 = arith.muli %arg1, %c128_i32 : i32
    %23 = vector.broadcast %22 : i32 to vector<1x128xi32>
    %24 = arith.addi %21, %23 : vector<1x128xi32>
    %c64_i32 = arith.constant 64 : i32
    %25 = vector.broadcast %c64_i32 : i32 to vector<1x128xi32>
    %26 = arith.cmpi slt, %24, %25 : vector<1x128xi32>
    %27 = arith.extui %26 : vector<1x128xi1> to vector<1x128xi32>
    %28 = arith.sitofp %27 : vector<1x128xi32> to vector<1x128xf32>
    %29 = vector.broadcast %28 : vector<1x128xf32> to vector<8x128xf32>
    %30 = arith.mulf %20, %29 : vector<8x128xf32>
    %cst_14 = arith.constant dense<0.000000e+00> : vector<8xf32>
    %31 = vector.multi_reduction <add>, %30, %cst_14 [1] : vector<8x128xf32> to vector<8xf32>
    %32 = vector.shape_cast %31 : vector<8xf32> to vector<8x1xf32>
    %33 = arith.mulf %30, %20 : vector<8x128xf32>
    %cst_15 = arith.constant dense<0.000000e+00> : vector<8xf32>
    %34 = vector.multi_reduction <add>, %33, %cst_15 [1] : vector<8x128xf32> to vector<8xf32>
    %35 = vector.shape_cast %34 : vector<8xf32> to vector<8x1xf32>
    %cst_16 = arith.constant 0.000000e+00 : f32
    %36 = vector.broadcast %cst_16 : f32 to vector<8x6xf32>
    %37 = tpu.concatenate %32, %35, %36 in 1 : vector<8x1xf32>, vector<8x1xf32>, vector<8x6xf32> -> vector<8x8xf32>
    %c0_17 = arith.constant 0 : index
    %c0_18 = arith.constant 0 : index
    %c0_19 = arith.constant 0 : index
    %c0_20 = arith.constant 0 : index
    %38 = vector.load %arg6[%c0_17, %c0_18, %c0_19, %c0_20] : memref<1x1x8x8xf32, #tpu.memory_space<vmem>>, vector<1x1x8x8xf32>
    %39 = vector.shape_cast %38 : vector<1x1x8x8xf32> to vector<8x8xf32>
    %40 = vector.shape_cast %37 : vector<8x8xf32> to vector<1x1x8x8xf32>
    tpu.vector_store %arg6[%c0_17, %c0_18, %c0_19, %c0_20], %40 {strides = array<i32>} : memref<1x1x8x8xf32, #tpu.memory_space<vmem>>, vector<1x1x8x8xf32>,
    %41 = arith.truncf %20 : vector<8x128xf32> to vector<8x128xbf16>
    %c0_21 = arith.constant 0 : index
    %c0_22 = arith.constant 0 : index
    %c0_23 = arith.constant 0 : index
    %42 = vector.load %arg5[%c0_21, %c0_22, %c0_23] : memref<1x8x128xbf16, #tpu.memory_space<vmem>>, vector<1x8x128xbf16>
    %43 = vector.shape_cast %42 : vector<1x8x128xbf16> to vector<8x128xbf16>
    %44 = vector.shape_cast %41 : vector<8x128xbf16> to vector<1x8x128xbf16>
    tpu.vector_store %arg5[%c0_21, %c0_22, %c0_23], %44 {strides = array<i32>} : memref<1x8x128xbf16, #tpu.memory_space<vmem>>, vector<1x8x128xbf16>,
    return
  }
  func.func @transform_0(%arg0: i32, %arg1: i32) -> (i32, i32, i32) {
    %c0_i32 = arith.constant 0 : i32
    %c0_i32_0 = arith.constant 0 : i32
    return %arg0, %c0_i32, %arg1 : i32, i32, i32
  }
  func.func @transform_1(%arg0: i32, %arg1: i32) -> (i32, i32, i32) {
    %c1_i32 = arith.constant 1 : i32
    %0 = arith.addi %arg1, %c1_i32 : i32
    %c1_i32_0 = arith.constant 1 : i32
    %1 = arith.muli %0, %c1_i32_0 : i32
    %c0_i32 = arith.constant 0 : i32
    %c0_i32_1 = arith.constant 0 : i32
    return %arg0, %c0_i32, %1 : i32, i32, i32
  }
  func.func @transform_2(%arg0: i32, %arg1: i32) -> (i32, i32, i32) {
    %c0_i32 = arith.constant 0 : i32
    %c0_i32_0 = arith.constant 0 : i32
    %c0_i32_1 = arith.constant 0 : i32
    %c0_i32_2 = arith.constant 0 : i32
    return %c0_i32, %c0_i32_0, %c0_i32_1 : i32, i32, i32
  }
  func.func @transform_3(%arg0: i32, %arg1: i32) -> (i32, i32, i32) {
    %c0_i32 = arith.constant 0 : i32
    %c0_i32_0 = arith.constant 0 : i32
    return %arg0, %c0_i32, %arg1 : i32, i32, i32
  }
  func.func @transform_4(%arg0: i32, %arg1: i32) -> (i32, i32, i32, i32) {
    %c0_i32 = arith.constant 0 : i32
    %c0_i32_0 = arith.constant 0 : i32
    %c0_i32_1 = arith.constant 0 : i32
    return %arg0, %arg1, %c0_i32, %c0_i32_0 : i32, i32, i32, i32
  }
}

module attributes {stable_mosaic.version = 11 : i64} {
  func.func @bn_pool_kernel(%arg0: i32, %arg1: i32, %arg2: memref<1x8x128xbf16, #tpu.memory_space<vmem>>, %arg3: memref<8x8xf32, #tpu.memory_space<vmem>>, %arg4: memref<1x1x8x1xf32, #tpu.memory_space<vmem>>) attributes {dimension_semantics = [#tpu.dimension_semantics<parallel>, #tpu.dimension_semantics<parallel>], iteration_bounds = array<i64: 2, 1>, scalar_prefetch = 0 : i64, scratch_operands = 0 : i64, tpu.core_type = #tpu.core_type<tc>, window_params = [{transform_indices = @transform_0, window_bounds = array<i64: 1, 8, 128>}, {pipeline_mode = #tpu.pipeline_mode<synchronous>, transform_indices = @transform_1, window_bounds = array<i64: 8, 8>}, {transform_indices = @transform_2, window_bounds = array<i64: 1, 1, 8, 1>}]} {
    %c0 = arith.constant 0 : index
    %c0_0 = arith.constant 0 : index
    %c0_1 = arith.constant 0 : index
    %0 = vector.load %arg2[%c0, %c0_0, %c0_1] : memref<1x8x128xbf16, #tpu.memory_space<vmem>>, vector<1x8x128xbf16>
    %1 = vector.shape_cast %0 : vector<1x8x128xbf16> to vector<8x128xbf16>
    %2 = arith.extf %1 : vector<8x128xbf16> to vector<8x128xf32>
    %c0_2 = arith.constant 0 : index
    %c0_3 = arith.constant 0 : index
    %3 = vector.load %arg3[%c0_2, %c0_3] : memref<8x8xf32, #tpu.memory_space<vmem>>, vector<8x1xf32>
    %c0_4 = arith.constant 0 : index
    %c1 = arith.constant 1 : index
    %4 = vector.load %arg3[%c0_4, %c1] : memref<8x8xf32, #tpu.memory_space<vmem>>, vector<8x1xf32>
    %5 = vector.broadcast %3 : vector<8x1xf32> to vector<8x128xf32>
    %6 = arith.mulf %2, %5 : vector<8x128xf32>
    %7 = vector.broadcast %4 : vector<8x1xf32> to vector<8x128xf32>
    %8 = arith.addf %6, %7 : vector<8x128xf32>
    %cst = arith.constant 0.000000e+00 : f32
    %9 = vector.broadcast %cst : f32 to vector<8x128xf32>
    %10 = arith.maximumf %8, %9 : vector<8x128xf32>
    %11 = tpu.iota {dimensions = array<i32: 1>} : vector<1x128xi32>
    %c128_i32 = arith.constant 128 : i32
    %12 = arith.muli %arg1, %c128_i32 : i32
    %13 = vector.broadcast %12 : i32 to vector<1x128xi32>
    %14 = arith.addi %11, %13 : vector<1x128xi32>
    %c64_i32 = arith.constant 64 : i32
    %15 = vector.broadcast %c64_i32 : i32 to vector<1x128xi32>
    %16 = arith.cmpi slt, %14, %15 : vector<1x128xi32>
    %17 = arith.extui %16 : vector<1x128xi1> to vector<1x128xi32>
    %18 = arith.sitofp %17 : vector<1x128xi32> to vector<1x128xf32>
    %19 = vector.broadcast %18 : vector<1x128xf32> to vector<8x128xf32>
    %20 = arith.mulf %10, %19 : vector<8x128xf32>
    %cst_5 = arith.constant dense<0.000000e+00> : vector<8xf32>
    %21 = vector.multi_reduction <add>, %20, %cst_5 [1] : vector<8x128xf32> to vector<8xf32>
    %22 = vector.shape_cast %21 : vector<8xf32> to vector<8x1xf32>
    %c0_6 = arith.constant 0 : index
    %c0_7 = arith.constant 0 : index
    %c0_8 = arith.constant 0 : index
    %c0_9 = arith.constant 0 : index
    %23 = vector.load %arg4[%c0_6, %c0_7, %c0_8, %c0_9] : memref<1x1x8x1xf32, #tpu.memory_space<vmem>>, vector<1x1x8x1xf32>
    %24 = vector.shape_cast %23 : vector<1x1x8x1xf32> to vector<8x1xf32>
    %25 = vector.shape_cast %22 : vector<8x1xf32> to vector<1x1x8x1xf32>
    tpu.vector_store %arg4[%c0_6, %c0_7, %c0_8, %c0_9], %25 {strides = array<i32>} : memref<1x1x8x1xf32, #tpu.memory_space<vmem>>, vector<1x1x8x1xf32>,
    return
  }
  func.func @transform_0(%arg0: i32, %arg1: i32) -> (i32, i32, i32) {
    %c0_i32 = arith.constant 0 : i32
    %c0_i32_0 = arith.constant 0 : i32
    return %arg0, %c0_i32, %arg1 : i32, i32, i32
  }
  func.func @transform_1(%arg0: i32, %arg1: i32) -> (i32, i32) {
    %c0_i32 = arith.constant 0 : i32
    %c0_i32_0 = arith.constant 0 : i32
    %c0_i32_1 = arith.constant 0 : i32
    return %c0_i32, %c0_i32_0 : i32, i32
  }
  func.func @transform_2(%arg0: i32, %arg1: i32) -> (i32, i32, i32, i32) {
    %c0_i32 = arith.constant 0 : i32
    %c0_i32_0 = arith.constant 0 : i32
    %c0_i32_1 = arith.constant 0 : i32
    return %arg0, %arg1, %c0_i32, %c0_i32_0 : i32, i32, i32, i32
  }
}

module attributes {stable_mosaic.version = 11 : i64} {
  func.func @bn_scale_kernel(%arg0: i32, %arg1: i32, %arg2: memref<1x8x128xbf16, #tpu.memory_space<vmem>>, %arg3: memref<1x8x8xf32, #tpu.memory_space<vmem>>, %arg4: memref<1x8x128xf32, #tpu.memory_space<vmem>>) attributes {dimension_semantics = [#tpu.dimension_semantics<parallel>, #tpu.dimension_semantics<parallel>], iteration_bounds = array<i64: 2, 1>, scalar_prefetch = 0 : i64, scratch_operands = 0 : i64, tpu.core_type = #tpu.core_type<tc>, window_params = [{transform_indices = @transform_0, window_bounds = array<i64: 1, 8, 128>}, {transform_indices = @transform_1, window_bounds = array<i64: 1, 8, 8>}, {transform_indices = @transform_2, window_bounds = array<i64: 1, 8, 128>}]} {
    %c0 = arith.constant 0 : index
    %c0_0 = arith.constant 0 : index
    %c0_1 = arith.constant 0 : index
    %0 = vector.load %arg2[%c0, %c0_0, %c0_1] : memref<1x8x128xbf16, #tpu.memory_space<vmem>>, vector<1x8x128xbf16>
    %1 = vector.shape_cast %0 : vector<1x8x128xbf16> to vector<8x128xbf16>
    %2 = arith.extf %1 : vector<8x128xbf16> to vector<8x128xf32>
    %c0_2 = arith.constant 0 : index
    %c0_3 = arith.constant 0 : index
    %c0_4 = arith.constant 0 : index
    %3 = vector.load %arg3[%c0_2, %c0_3, %c0_4] : memref<1x8x8xf32, #tpu.memory_space<vmem>>, vector<1x8x1xf32>
    %4 = vector.shape_cast %3 : vector<1x8x1xf32> to vector<8x1xf32>
    %c0_5 = arith.constant 0 : index
    %c0_6 = arith.constant 0 : index
    %c1 = arith.constant 1 : index
    %5 = vector.load %arg3[%c0_5, %c0_6, %c1] : memref<1x8x8xf32, #tpu.memory_space<vmem>>, vector<1x8x1xf32>
    %6 = vector.shape_cast %5 : vector<1x8x1xf32> to vector<8x1xf32>
    %c0_7 = arith.constant 0 : index
    %c0_8 = arith.constant 0 : index
    %c2 = arith.constant 2 : index
    %7 = vector.load %arg3[%c0_7, %c0_8, %c2] : memref<1x8x8xf32, #tpu.memory_space<vmem>>, vector<1x8x1xf32>
    %8 = vector.shape_cast %7 : vector<1x8x1xf32> to vector<8x1xf32>
    %9 = vector.broadcast %4 : vector<8x1xf32> to vector<8x128xf32>
    %10 = arith.mulf %2, %9 : vector<8x128xf32>
    %11 = vector.broadcast %6 : vector<8x1xf32> to vector<8x128xf32>
    %12 = arith.addf %10, %11 : vector<8x128xf32>
    %cst = arith.constant 0.000000e+00 : f32
    %13 = vector.broadcast %cst : f32 to vector<8x128xf32>
    %14 = arith.maximumf %12, %13 : vector<8x128xf32>
    %15 = vector.broadcast %8 : vector<8x1xf32> to vector<8x128xf32>
    %16 = arith.mulf %14, %15 : vector<8x128xf32>
    %c0_9 = arith.constant 0 : index
    %c0_10 = arith.constant 0 : index
    %c0_11 = arith.constant 0 : index
    %17 = vector.load %arg4[%c0_9, %c0_10, %c0_11] : memref<1x8x128xf32, #tpu.memory_space<vmem>>, vector<1x8x128xf32>
    %18 = vector.shape_cast %17 : vector<1x8x128xf32> to vector<8x128xf32>
    %19 = vector.shape_cast %16 : vector<8x128xf32> to vector<1x8x128xf32>
    tpu.vector_store %arg4[%c0_9, %c0_10, %c0_11], %19 {strides = array<i32>} : memref<1x8x128xf32, #tpu.memory_space<vmem>>, vector<1x8x128xf32>,
    return
  }
  func.func @transform_0(%arg0: i32, %arg1: i32) -> (i32, i32, i32) {
    %c0_i32 = arith.constant 0 : i32
    %c0_i32_0 = arith.constant 0 : i32
    return %arg0, %c0_i32, %arg1 : i32, i32, i32
  }
  func.func @transform_1(%arg0: i32, %arg1: i32) -> (i32, i32, i32) {
    %c0_i32 = arith.constant 0 : i32
    %c0_i32_0 = arith.constant 0 : i32
    %c0_i32_1 = arith.constant 0 : i32
    return %arg0, %c0_i32, %c0_i32_0 : i32, i32, i32
  }
  func.func @transform_2(%arg0: i32, %arg1: i32) -> (i32, i32, i32) {
    %c0_i32 = arith.constant 0 : i32
    %c0_i32_0 = arith.constant 0 : i32
    return %arg0, %c0_i32, %arg1 : i32, i32, i32
  }
}

</mosaic_0001>

<bundles_post_ra>
// kernel: custom-call.57
= control target key start
LH: loop header
LB: loop body
LE: loop exit
PB: predicated region body
PF: predicated region fallthrough
CT: control target
= control target key end

     0   :  { %s799_s9 = smov 0   ;;  %s801_s10 = smov 0   ;;  %s1006_s0 = inlined_call_operand.vmem [shape: f32[2,2,16,8], index: 0, kind: input, shape index: {}]   ;;  %s1007_s1 = inlined_call_operand.vmem [shape: f32[2,2,16,8], index: 1, kind: output, shape index: {0}]   ;;  %s1008_s2 = inlined_call_operand.vmem [shape: f32[2,2,8], index: 2, kind: output, shape index: {1}]  }
   0x1   :  { %s803_s11 = smov 0   ;;  %s805_s12 = smov 0  }
   0x2   :  { %s807_s13 = smov 0   ;;  %s809_s14 = smov 0  }
   0x3   :  { %s811_s15 = smov 0  }
   0x4 LB: > { %s31_s16 = sadd.s32 1, %s768_s13  ;;  %s35_s17 = sadd.s32 1, %s772_s14  ;;  %s776_s15 = sphi %s811_s15, %s9_s15   ;;  %s772_s14 = sphi %s809_s14, %s1017_s14   ;;  %s768_s13 = sphi %s807_s13, %s1016_s13   ;;  %s764_s12 = sphi %s805_s12, %s1015_s12   ;;  %s760_s11 = sphi %s803_s11, %s1014_s11   ;;  %s756_s10 = sphi %s801_s10, %s1013_s10   ;;  %s752_s9 = sphi %s799_s9, %s1012_s9  }
   0x5   : > { %p33_p0 = scmp.ge.s32.totalorder %s31_s16, 2  ;;  %s40_s18 = ssub.s32 0, %s768_s13 }
   0x6   : > { %s611_s19 = smin.u32 %s768_s13, %s40_s18  ;;  %s609_s22 = sadd.s32 4294967295, %s776_s15  }
   0x7   : > { %s1019_s16 = smov (%p33_p0, %s31_s16), 0  ;;  %s1021_s17 = smov (!%p33_p0, %s35_s17), %s772_s14 }
   0x8   : > { %p37_p1 = scmp.ge.s32.totalorder %s1021_s17, 2  ;;  %s42_s20 = sshrl.u32 %s611_s19, 3 }
   0x9   : > { %s46_s21 = ssub.s32 0, %s1019_s16  ;;  %p66_p2 = scmp.ne.s32.totalorder %s756_s10, %s752_s9 }
   0xa   : > { %s1023_s17 = smov (%p37_p1, %s1021_s17), 0  ;;  %s612_s23 = smin.u32 %s46_s21, %s1019_s16 }
   0xb   : > { %s48_s24 = sshrl.u32 %s612_s23, 3  ;;  %s51_s25 = ssub.s32 %s772_s14, %s1023_s17 }
   0xc   : > { %p67_p3 = scmp.eq.s32.totalorder %s609_s22, 3  ;;  %s52_s26 = ssub.s32 %s42_s20, %s48_s24 }
   0xd   : > { %s56_s27 = sadd.s32 1, %s756_s10  ;;  %s53_s28 = sor.u32 %s52_s26, %s51_s25 }
   0xe   : > { %p853_p4 = por %p67_p3, %p66_p2  ;;  %p54_p5 = scmp.eq.s32.totalorder %s53_s28, 0 }
   0xf   : > { %p614_p6 = scmp.ge.s32.totalorder %s776_s15, 4 }
  0x10   : > { %s858_s30 = scalar_select %p54_p5, %s756_s10, %s56_s27  }
  0x11   : > { %89 = sbr.rel (%p614_p6) target bundleno = 25 (0x19), region = 16  ;;  %s91_s3 = sand.u32 (!%p614_p6), 1, %s776_s15  }
  0x12   : > { %s616_s4 = sshll.u32 (!%p614_p6), %s768_s13, 1  ;;  %s615_s5 = sshll.u32 (!%p614_p6), %s91_s3, 4 }
  0x13   : > { %s617_s6 = sshll.u32 (!%p614_p6), %s772_s14, 2  ;;  %s93_s21 = scalar_lea.vmem (!%p614_p6), [#allocation0], %s615_s5 }
  0x14   : > { %s99_s7 = sadd.s32 (!%p614_p6), %s617_s6, %s616_s4 }
  0x15   : > { %s618_s8 = sshll.u32 (!%p614_p6), %s99_s7, 3 }
  0x16   : > { %s101_s20 = scalar_lea.vmem %s1006_s0, %s618_s8 }
  0x17   : > { %v132_v0 = vld [vmem:[%s101_s20] sm:$0xff]  ;;  %v134_v1 = vld [vmem:[%s101_s20 + $0x8] sm:$0xff] }
  0x18   : > { %133 = vst [vmem:[%s93_s21] sm:$0xff] %v132_v0  ;;  %135 = vst [vmem:[%s93_s21 + $0x8] sm:$0xff] %v134_v1 }
  0x19 PF: > { %p619_p7 = scmp.ge.s32.totalorder %s776_s15, 1  ;;  %p140_p8 = scmp.lt.s32.totalorder %s776_s15, 5 }
  0x1b   : > { %p141_p9 = pnand %p619_p7, %p140_p8 }
  0x1d   : > { %144 = sbr.rel (%p141_p9) target bundleno = 352 (0x160), region = 54 }
  0x22   : > { %s147_s23 = sand.u32 1, %s609_s22   ;;  %s161_s24 = sand.u32 1, %s752_s9   ;;  %v782_v4 = vmov 0.0  }
  0x23   : > { %s620_s25 = sshll.u32 %s147_s23, 4  ;;  %s872_s26 = sshll.u32 %s161_s24, 1 }
  0x24   : > { %s172_s27 = sand.u32 7, %s760_s11   ;;  %s149_s28 = scalar_lea.vmem [#allocation0], %s620_s25 }
  0x25   : > { %v174_v2 = vld [vmem:[%s149_s28] sm:$0xff]  ;;  %v623_v3 = vld [vmem:[%s149_s28 + $0x8] sm:$0xff]  ;;  %s875_s3 = scalar_lea.vmem [#allocation1], %s620_s25  ;;  %s879_s4 = scalar_lea.vmem [#allocation2], %s172_s27 }
  0x26   : > { %175 = vst [vmem:[%s875_s3] sm:$0xff] %v174_v2  ;;  %624 = vst [vmem:[%s875_s3 + $0x8] sm:$0xff] %v623_v3  ;;  %s163_s9 = scalar_lea.vmem [#allocation3], %s872_s26  ;;  %s883_s22 = smov 0  }
  0x27   : > { %180 = vst [vmem:[%s879_s4] sm:$0x1] %v782_v4 }
  0x28 LB: >> { %v188_v5 = vlaneseq  ;;  %v893_v8 = vstv %s780_s22  ;;  %s225_s5 = scalar_lea.vmem %s875_s3, %s780_s22 [#allocation1]  ;;  %s301_s6 = scalar_lea.vmem [#allocation4], %s780_s22  ;;  %s780_s22 = sphi %s883_s22, %s186_s22  }
  0x29   : >> { %s318_s7 = smov [#allocation4] }
  0x2a   : >> { %v890_v7 = vshrl.u32 %v188_v5, 7  ;;  %v922_v56 = vand.u32 127, %v188_v5 }
  0x2c   : >> { %vm192_vm0 = vcmp.gt.s32.totalorder %v890_v7, %v893_v8  ;;  %v199_v10 = vadd.s32 8, %v890_v7  ;;  %v264_v7 = vmov %v890_v7  ;;  %vm926_vm12 = vcmp.eq.s32.totalorder %v922_v56, %v893_v8 }
  0x2d   : >> { %v187_v6 = vld [vmem:[%s875_s3] sm:$0xff]  ;;  %v625_v9 = vld [vmem:[%s875_s3 + $0x8] sm:$0xff]  ;;  %v283_v52 = vadd.s32 8, %v264_v7  ;;  %s261_s3 = smov %s875_s3  ;;  %vm268_vm10 = vcmp.gt.s32.totalorder %v264_v7, %v893_v8  ;;  %v321_v7 = vmov %v890_v7 }
  0x2e   : >> { %v193_v11 = vsel %vm192_vm0, %v187_v6, 0.0  ;;  %vm201_vm1 = vcmp.gt.s32.totalorder %v199_v10, %v893_v8  ;;  %v226_v22 = vld [vmem:[%s225_s5] ss:$0 sm:$0xff]  ;;  %v627_v55 = vld [vmem:[%s261_s3 + $0x8] sm:$0xff]  ;;  %vm354_vm0 = vcmp.gt.s32.totalorder %v922_v56, %v893_v8 }
  0x2f   : >> { %v194_v12 = vmul.f32 %v193_v11, %v193_v11  ;;  %v204_v13 = vsel %vm201_vm1, %v625_v9, 0.0  ;;  %v227_v23 = vand.u32 2147483647, %v226_v22  ;;  %vm252_vm7 = vcmp.lt.f32.partialorder %v226_v22, 0.0  ;;  %v265_v54 = vld [vmem:[%s261_s3] sm:$0xff]  ;;  %s317_s3 = smov %s875_s3 }
  0x30   : >> { %v205_v14 = vmul.f32 %v204_v13, %v204_v13  ;;  %vm285_vm8 = vcmp.gt.s32.totalorder %v283_v52, %v893_v8  ;;  %vm286_vm9 = vcmp.lt.s32.totalorder %v283_v52, 16  ;;  %v269_v58 = vsel %vm268_vm10, %v265_v54, 0.0  ;;  %v314_v9 = vld [vmem:[%s879_s4] ss:$0 sm:$0xff] }
  0x31   : >> { %v228_v28 = vmax.f32 %v227_v23, 0.0  ;;  %vm287_vm11 = vmand %vm285_vm8, %vm286_vm9 }
  0x32   : >> { %v206_v15 = vadd.f32 %v205_v14, %v194_v12  ;;  %v288_v59 = vsel %vm287_vm11, %v627_v55, 0.0  ;;  %v783_v14 = vmov 1.0  }
  0x34   : >> { %v207_v16 = vrot.slane %v206_v15, 4 }
  0x36   : >> { %v208_v17 = vadd.f32 %v207_v16, %v206_v15  ;;  %v326_v15 = vadd.s32 8, %v321_v7  ;;  %v324_v16 = vld [vmem:[%s317_s3] sm:$0xff]  ;;  %v345_v7 = vmov %v890_v7 }
  0x37   : >> { %vm362_vm14 = vcmp.ge.s32.totalorder %v345_v7, %v893_v8 }
  0x38   : >> { %v209_v18 = vrot.slane %v208_v17, 2  ;;  %vm332_vm13 = vcmp.lt.s32.totalorder %v326_v15, 16  ;;  %vm363_vm1 = vmand %vm926_vm12, %vm362_vm14 }
  0x3a   : >> { %v210_v19 = vadd.f32 %v209_v18, %v208_v17  ;;  %v629_v17 = vld [vmem:[%s317_s3 + $0x8] sm:$0xff]  ;;  %s341_s3 = smov %s317_s3 }
  0x3b   : >> { %s387_s8 = scalar_lea.vmem %s341_s3, %s780_s22  ;;  %s186_s22 = sadd.s32 1, %s780_s22  }
  0x3c   : >> { %v211_v20 = vrot.slane %v210_v19, 1  ;;  %p183_p10 = scmp.ge.s32.totalorder %s186_s22, 8  }
  0x3d   : > { %s635_s18 = sshll.u32 (%p183_p10), %s760_s11, 1  ;;  %s636_s19 = sshll.u32 (%p183_p10), %s764_s12, 2 }
  0x3e   : >> { %v900_v21 = vadd.f32 %v211_v20, %v210_v19  ;;  %s416_s20 = sadd.s32 (%p183_p10), %s636_s19, %s635_s18 }
  0x3f   : > { %s637_s21 = sshll.u32 (%p183_p10), %s416_s20, 3 }
  0x40   : >> { %708 = vrsqrt.f32 %v900_v21  ;;  %vm215_vm2 = vcmp.eq.f32.partialorder %v900_v21, inf  ;;  %v218_v25 = vand.u32 2147483648, %v900_v21  ;;  %vm217_vm3 = vcmp.eq.f32.partialorder %v900_v21, 0.0  ;;  %s418_s25 = scalar_lea.vmem (%p183_p10), %s1007_s1, %s637_s21 }
  0x4d   : >> { %v709_v24 = vpop.eup %708 }
  0x4e   : >> { %v214_v26 = vmul.f32 %v709_v24, %v900_v21 }
  0x50   : >> { %v216_v27 = vsel %vm215_vm2, %v900_v21, %v214_v26 }
  0x51   : >> { %v219_v29 = vsel %vm217_vm3, %v218_v25, %v216_v27 }
  0x52   : >> { %v229_v30 = vand.u32 2147483647, %v219_v29  ;;  %v366_v29 = vadd.s32 8, %v345_v7 }
  0x54   : >> { %v230_v31 = vmax.f32 %v228_v28, %v229_v30  ;;  %vm383_vm15 = vcmp.ge.s32.totalorder %v366_v29, %v893_v8 }
  0x55   : >> { %vm384_vm2 = vmand %vm926_vm12, %vm383_vm15 }
  0x56   : >> { %710 = vrcp.f32 %v230_v31  ;;  %vm242_vm6 = vcmp.eq.f32.partialorder %v230_v31, 0.0 }
  0x63   : >> { %v711_v32 = vpop.eup %710 }
  0x64   : >> { %v232_v33 = vmul.f32 %v711_v32, %v227_v23  ;;  %v235_v34 = vmul.f32 0.0, %v711_v32  ;;  %v239_v35 = vmul.f32 %v711_v32, %v229_v30 }
  0x66   : >> { %v233_v36 = vmul.f32 %v232_v33, %v232_v33  ;;  %v236_v37 = vmul.f32 %v235_v34, %v235_v34  ;;  %v240_v38 = vmul.f32 %v239_v35, %v239_v35  ;;  %v631_v35 = vld [vmem:[%s341_s3 + $0x8] sm:$0xff] }
  0x68   : >> { %v237_v39 = vadd.f32 %v236_v37, %v233_v36 }
  0x6a   : >> { %v241_v40 = vadd.f32 %v240_v38, %v237_v39 }
  0x6c   : >> { %712 = vrsqrt.f32 %v241_v40  ;;  %vm245_vm4 = vcmp.eq.f32.partialorder %v241_v40, inf  ;;  %v248_v42 = vand.u32 2147483648, %v241_v40  ;;  %vm247_vm5 = vcmp.eq.f32.partialorder %v241_v40, 0.0 }
  0x79   : >> { %v713_v41 = vpop.eup %712 }
  0x7a   : >> { %v244_v43 = vmul.f32 %v713_v41, %v241_v40 }
  0x7c   : >> { %v246_v44 = vsel %vm245_vm4, %v241_v40, %v244_v43 }
  0x7d   : >> { %v249_v45 = vsel %vm247_vm5, %v248_v42, %v246_v44 }
  0x7e   : >> { %v250_v46 = vmul.f32 %v249_v45, %v230_v31  ;;  %v352_v31 = vld [vmem:[%s341_s3] sm:$0xff] }
  0x80   : >> { %v251_v47 = vsel %vm242_vm6, 0.0, %v250_v46 }
  0x81   : >> { %v253_v48 = vxor.u32 2147483648, %v251_v47 }
  0x83   : >> { %v254_v49 = vsel %vm252_vm7, %v251_v47, %v253_v48 }
  0x84   : >> { %v914_v50 = vsel %vm217_vm3, %v226_v22, %v254_v49  ;;  %714 = vrcp.f32 %v254_v49  ;;  %v255_v53 = vsub.f32 %v254_v49, %v226_v22 }
  0x85   : >> { %v260_v51 = vsub.f32 %v226_v22, %v914_v50 }
  0x87   : >> { %716 = vrcp.f32 %v260_v51 }
  0x91   : >> { %v715_v57 = vpop.eup %714 }
  0x92   : >> { %v257_v60 = vmul.f32 %v715_v57, %v255_v53 }
  0x94   : >> { %v717_v61 = vpop.eup %716  ;;  %v259_v63 = vsel %vm217_vm3, 0.0, %v257_v60 }
  0x95   : >> { %v271_v0 = vmul.f32 %v717_v61, %v269_v58  ;;  %v290_v1 = vmul.f32 %v717_v61, %v288_v59  ;;  %v307_v2 = vsel %vm926_vm12, %v259_v63, 0.0 }
  0x96   : >> { %308 = vadd.xlane.f32.xlu1 %v307_v2 }
  0x97   : >> { %v272_v3 = vsel %vm217_vm3, 0.0, %v271_v0  ;;  %v291_v4 = vsel %vm217_vm3, 0.0, %v290_v1 }
  0x98   : >> { %v277_v5 = vsel %vm926_vm12, %v272_v3, 0.0  ;;  %v296_v6 = vsel %vm926_vm12, %v291_v4, 0.0 }
  0x99   : >> { %278 = vadd.xlane.f32.xlu0 %v277_v5 }
  0x9d   : >> { %297 = vadd.xlane.f32.xlu0 %v296_v6 }
 0x11f   : >> { %v309_v10 = vpop.xlane.xlu1 %308 }
 0x120   : >> { %v315_v11 = vsel %vm926_vm12, %v309_v10, %v314_v9 }
 0x121   : >> { %316 = vst [vmem:[%s879_s4] sm:$0x1] %v315_v11 }
 0x122   : >> { %v279_v12 = vpop.xlane.xlu0 %278 }
 0x123   : >> { %280 = vst [vmem:[#allocation4] sm:$0xff] %v279_v12 }
 0x126   : >> { %v298_v13 = vpop.xlane.xlu0 %297 }
 0x127   : >> { %300 = vst [vmem:[#allocation4 + $0x8] sm:$0xff] %v298_v13 }
 0x128   : >> { %302 = vst [vmem:[%s301_s6] sm:$0x1] %v783_v14  ;;  %v399_v44 = vld [vmem:[#allocation2] sm:$0x3] (%p183_p10) }
 0x129   : > { %402 = vst [vmem:[%s163_s9] sm:$0x3] (%p183_p10), %v399_v44 }
 0x12f   : >> { %v323_v18 = vld [vmem:[%s318_s7] sm:$0xff]  ;;  %v628_v19 = vld [vmem:[%s318_s7 + $0x8] sm:$0xff]  ;;  %s342_s7 = smov %s318_s7 }
 0x130   : >> { %v325_v20 = vmul.f32 %v324_v16, %v323_v18  ;;  %v331_v21 = vmul.f32 %v629_v17, %v628_v19  ;;  %v350_v33 = vld [vmem:[%s342_s7] sm:$0xff]  ;;  %v630_v34 = vld [vmem:[%s342_s7 + $0x8] sm:$0xff] }
 0x132   : >> { %v333_v22 = vsel %vm332_vm13, %v331_v21, 0.0 }
 0x133   : >> { %v334_v23 = vadd.f32 %v333_v22, %v325_v20 }
 0x135   : >> { %v335_v24 = vrot.slane %v334_v23, 4 }
 0x137   : >> { %v336_v25 = vadd.f32 %v335_v24, %v334_v23 }
 0x139   : >> { %v337_v26 = vrot.slane %v336_v25, 2 }
 0x13b   : >> { %v338_v27 = vadd.f32 %v337_v26, %v336_v25 }
 0x13d   : >> { %v339_v28 = vrot.slane %v338_v27, 1 }
 0x13f   : >> { %v340_v30 = vadd.f32 %v339_v28, %v338_v27 }
 0x141   : >> { %v346_v32 = vmul.f32 %v340_v30, %v309_v10 }
 0x143   : >> { %v351_v36 = vmul.f32 %v350_v33, %v346_v32  ;;  %v371_v37 = vmul.f32 %v630_v34, %v346_v32 }
 0x145   : >> { %v355_v38 = vsub.f32 %v352_v31, %v351_v36  ;;  %v376_v7 = vsub.f32 %v631_v35, %v371_v37 }
 0x147   : >> { %v356_v39 = vsel %vm354_vm0, %v355_v38, %v352_v31  ;;  %v377_v40 = vsel %vm354_vm0, %v376_v7, %v631_v35 }
 0x148   : >> { %v364_v41 = vsel %vm363_vm1, %v350_v33, %v356_v39  ;;  %v385_v42 = vsel %vm384_vm2, %v630_v34, %v377_v40 }
 0x149   : >> { %365 = vst [vmem:[%s341_s3] sm:$0xff] %v364_v41  ;;  %632 = vst [vmem:[%s341_s3 + $0x8] sm:$0xff] %v385_v42 }
 0x14e   : > { %185 = sbr.rel (!%p183_p10) target bundleno = 40 (0x28), region = 184 }
 0x150   : >> { %v388_v43 = vld [vmem:[%s387_s8] ss:$0 sm:$0xff] }
 0x151   : >> { %v393_v8 = vsel %vm926_vm12, %v914_v50, %v388_v43 }
 0x152   : >> { %394 = vst [vmem:[%s387_s8] sm:$0x1] %v393_v8 }
 0x153   : > { %p459_p11 = scmp.lt.s32.totalorder (%p853_p4), %s760_s11, 0  ;;  %s460_s27 = ssub.s32 (%p853_p4), 0, %s760_s11  ;;  %v484_v47 = vld [vmem:[%s163_s9] sm:$0x3] (%p853_p4) }
 0x154   : > { %s638_s28 = smin.u32 (%p853_p4), %s760_s11, %s460_s27 }
 0x155   : > { %s462_s4 = sshrl.u32 (%p853_p4), %s638_s28, 3 }
 0x156   : > { %458 = sbr.rel (!%p853_p4) target bundleno = 352 (0x160), region = 99 }
 0x159   : > { %v449_v45 = vld [vmem:[%s875_s3] sm:$0xff]  ;;  %v451_v46 = vld [vmem:[%s875_s3 + $0x8] sm:$0xff]  ;;  %s463_s3 = ssub.s32 (%p853_p4), 0, %s462_s4 }
 0x15a   : > { %450 = vst [vmem:[%s418_s25] sm:$0xff] %v449_v45  ;;  %452 = vst [vmem:[%s418_s25 + $0x8] sm:$0xff] %v451_v46 }
 0x15b   : > { %s1025_s3 = smov (!%p459_p11, %s463_s3), %s462_s4 }
 0x15c   : > { %s465_s22 = sadd.s32 %s764_s12, %s1025_s3 }
 0x15d   : > { %s639_s5 = sshll.u32 %s465_s22, 1 }
 0x15e   : > { %s467_s29 = scalar_lea.vmem %s1008_s2, %s639_s5 }
 0x15f   : > { %485 = vst [vmem:[%s467_s29] sm:$0x3] %v484_v47 }
 0x160 PF: > { %s9_s15 = sadd.s32 1, %s776_s15   ;;  %s1012_s9 = smov %s756_s10 }
 0x161   : > { %p6_p12 = scmp.ge.s32.totalorder %s9_s15, 6   ;;  %s1013_s10 = smov %s858_s30 }
 0x162   : > { %s1014_s11 = smov %s768_s13  ;;  %s1015_s12 = smov %s772_s14 }
 0x163   : > { %s1016_s13 = smov %s1019_s16  ;;  %s1017_s14 = smov %s1023_s17 }
 0x164   :  { %8 = sbr.rel (!%p6_p12) target bundleno = 4 (0x4), region = 195 }

// kernel: custom-call.58
= control target key start
LH: loop header
LB: loop body
LE: loop exit
PB: predicated region body
PF: predicated region fallthrough
CT: control target
= control target key end

     0   :  { %s390_s6 = smov 0   ;;  %s392_s7 = smov 0   ;;  %s469_s0 = inlined_call_operand.vmem [shape: f32[2,2,8,8], index: 0, kind: input, shape index: {}]   ;;  %s470_s1 = inlined_call_operand.vmem [shape: f32[2,2,8,8], index: 1, kind: output, shape index: {}]  }
   0x1   :  { %s394_s8 = smov 0   ;;  %s396_s9 = smov 0  }
   0x2   :  { %s398_s10 = smov 0  }
   0x3 LB: > { %s279_s11 = sadd.s32 4294967295, %s378_s10   ;;  %s16_s12 = sadd.s32 1, %s370_s8  ;;  %s378_s10 = sphi %s398_s10, %s7_s10   ;;  %s374_s9 = sphi %s396_s9, %s474_s9   ;;  %s370_s8 = sphi %s394_s8, %s473_s8   ;;  %s366_s7 = sphi %s392_s7, %s472_s7   ;;  %s362_s6 = sphi %s390_s6, %s471_s6  }
   0x4   : > { %p17_p0 = scmp.ge.s32.totalorder %s16_s12, 2  ;;  %s19_s13 = sadd.s32 1, %s374_s9 }
   0x5   : > { %p281_p2 = scmp.ge.s32.totalorder %s378_s10, 4 }
   0x6   : > { %s476_s12 = smov (%p17_p0, %s16_s12), 0  ;;  %s478_s13 = smov (!%p17_p0, %s19_s13), %s374_s9 }
   0x7   : > { %p21_p1 = scmp.ge.s32.totalorder %s478_s13, 2  ;;  %33 = sbr.rel (%p281_p2) target bundleno = 15 (0xf), region = 16 }
   0x8   : > { %s35_s14 = sand.u32 (!%p281_p2), 1, %s378_s10   ;;  %s283_s15 = sshll.u32 (!%p281_p2), %s374_s9, 1 }
   0x9   : > { %s480_s13 = smov (%p21_p1, %s478_s13), 0  ;;  %s282_s16 = sshll.u32 (!%p281_p2), %s35_s14, 3 }
   0xa   : > { %s39_s17 = sadd.s32 (!%p281_p2), %s370_s8, %s283_s15  ;;  %s37_s22 = scalar_lea.vmem (!%p281_p2), [#allocation0], %s282_s16 }
   0xb   : > { %s284_s18 = sshll.u32 (!%p281_p2), %s39_s17, 3 }
   0xc   : > { %s41_s21 = scalar_lea.vmem %s469_s0, %s284_s18 }
   0xd   : > { %v70_v0 = vld [vmem:[%s41_s21] sm:$0xff] }
   0xe   : > { %71 = vst [vmem:[%s37_s22] sm:$0xff] %v70_v0 }
   0xf PF: > { %p285_p3 = scmp.ge.s32.totalorder %s378_s10, 1  ;;  %p76_p4 = scmp.lt.s32.totalorder %s378_s10, 5 }
  0x11   : > { %p77_p5 = pnand %p285_p3, %p76_p4 }
  0x12   : > { %s83_s23 = sand.u32 (!%p77_p5), 1, %s279_s11   ;;  %s296_s26 = sshll.u32 (!%p77_p5), %s366_s7, 1 }
  0x13   : > { %80 = sbr.rel (%p77_p5) target bundleno = 1019 (0x3fb), region = 54  ;;  %s286_s24 = sshll.u32 (!%p77_p5), %s83_s23, 3 }
  0x14   : > { %s432_s25 = scalar_lea.vmem (!%p77_p5), [#allocation0], %s286_s24  ;;  %s189_s27 = sadd.s32 (!%p77_p5), %s362_s6, %s296_s26 }
  0x15   : > { %s297_s28 = sshll.u32 (!%p77_p5), %s189_s27, 3 }
  0x16   : > { %s191_s2 = scalar_lea.vmem (!%p77_p5), %s470_s1, %s297_s28 }
  0x18   : > { %v94_v1 = vlaneseq  ;;  %vm108_vm0 = vcmask 64512   ;;  %v100_v4 = vld [vmem:[%s432_s25] sm:$0xff] }
  0x19   : > { %v288_v5 = vld [vmem:[%s432_s25 + $0x1] ss:$0 sm:$0xff]  ;;  %v289_v10 = vld [vmem:[%s432_s25 + $0x2] ss:$0 sm:$0xff]  ;;  %v290_v15 = vld [vmem:[%s432_s25 + $0x3] ss:$0 sm:$0xff] }
  0x1a   : > { %v95_v2 = vand.u32 127, %v94_v1  ;;  %v97_v3 = vshrl.u32 %v94_v1, 7  ;;  %v109_v6 = vsel %vm108_vm0, %v288_v5, 0.0  ;;  %v120_v11 = vsel %vm108_vm0, %v289_v10, 0.0  ;;  %v291_v20 = vld [vmem:[%s432_s25 + $0x4] ss:$0 sm:$0xff] }
  0x1b   : > { %v131_v16 = vsel %vm108_vm0, %v290_v15, 0.0  ;;  %v142_v21 = vsel %vm108_vm0, %v291_v20, 0.0  ;;  %v292_v25 = vld [vmem:[%s432_s25 + $0x5] ss:$0 sm:$0xff]  ;;  %v293_v30 = vld [vmem:[%s432_s25 + $0x6] ss:$0 sm:$0xff] }
  0x1c   : > { %vm99_vm1 = vcmp.eq.s32.totalorder %v95_v2, %v97_v3  ;;  %vm103_vm2 = vcmp.eq.s32.totalorder %v95_v2, 0  ;;  %vm112_vm3 = vcmp.eq.s32.totalorder %v95_v2, 1  ;;  %vm123_vm4 = vcmp.eq.s32.totalorder %v95_v2, 2  ;;  %v294_v35 = vld [vmem:[%s432_s25 + $0x7] ss:$0 sm:$0xff] }
  0x1d   : > { %v104_v7 = vsel %vm103_vm2, %v100_v4, 1.0  ;;  %vm134_vm5 = vcmp.eq.s32.totalorder %v95_v2, 3  ;;  %vm145_vm6 = vcmp.eq.s32.totalorder %v95_v2, 4  ;;  %v153_v26 = vsel %vm108_vm0, %v292_v25, 0.0 }
  0x1e   : > { %v105_v8 = vsel %vm99_vm1, %v104_v7, 0.0  ;;  %vm156_vm7 = vcmp.eq.s32.totalorder %v95_v2, 5  ;;  %v164_v31 = vsel %vm108_vm0, %v293_v30, 0.0  ;;  %vm167_vm8 = vcmp.eq.s32.totalorder %v95_v2, 6 }
  0x1f   : > { %v113_v9 = vmul.f32 %v109_v6, %v105_v8  ;;  %v175_v36 = vsel %vm108_vm0, %v294_v35, 0.0  ;;  %vm178_vm9 = vcmp.eq.s32.totalorder %v95_v2, 7 }
  0x21   : > { %114 = vadd.xlane.f32.xlu0 %v113_v9 }
  0xaa   : > { %v115_v12 = vpop.xlane.xlu0 %114 }
  0xab   : > { %v116_v13 = vsel %vm112_vm3, %v115_v12, %v105_v8 }
  0xac   : > { %v124_v14 = vmul.f32 %v120_v11, %v116_v13 }
  0xae   : > { %125 = vadd.xlane.f32.xlu0 %v124_v14 }
 0x137   : > { %v126_v17 = vpop.xlane.xlu0 %125 }
 0x138   : > { %v127_v18 = vsel %vm123_vm4, %v126_v17, %v116_v13 }
 0x139   : > { %v135_v19 = vmul.f32 %v131_v16, %v127_v18 }
 0x13b   : > { %136 = vadd.xlane.f32.xlu1 %v135_v19 }
 0x1c4   : > { %v137_v22 = vpop.xlane.xlu1 %136 }
 0x1c5   : > { %v138_v23 = vsel %vm134_vm5, %v137_v22, %v127_v18 }
 0x1c6   : > { %v146_v24 = vmul.f32 %v142_v21, %v138_v23 }
 0x1c8   : > { %147 = vadd.xlane.f32.xlu1 %v146_v24 }
 0x251   : > { %v148_v27 = vpop.xlane.xlu1 %147 }
 0x252   : > { %v149_v28 = vsel %vm145_vm6, %v148_v27, %v138_v23 }
 0x253   : > { %v157_v29 = vmul.f32 %v153_v26, %v149_v28 }
 0x255   : > { %158 = vadd.xlane.f32.xlu0 %v157_v29 }
 0x2de   : > { %v159_v32 = vpop.xlane.xlu0 %158 }
 0x2df   : > { %v160_v33 = vsel %vm156_vm7, %v159_v32, %v149_v28 }
 0x2e0   : > { %v168_v34 = vmul.f32 %v164_v31, %v160_v33 }
 0x2e2   : > { %169 = vadd.xlane.f32.xlu1 %v168_v34 }
 0x36b   : > { %v170_v37 = vpop.xlane.xlu1 %169 }
 0x36c   : > { %v171_v38 = vsel %vm167_vm8, %v170_v37, %v160_v33 }
 0x36d   : > { %v179_v39 = vmul.f32 %v175_v36, %v171_v38 }
 0x36f   : > { %180 = vadd.xlane.f32.xlu0 %v179_v39 }
 0x3f8   : > { %v181_v40 = vpop.xlane.xlu0 %180 }
 0x3f9   : > { %v182_v41 = vsel %vm178_vm9, %v181_v40, %v171_v38 }
 0x3fa   : > { %221 = vst [vmem:[%s191_s2] sm:$0xff] %v182_v41 }
 0x3fb PF: > { %s7_s10 = sadd.s32 1, %s378_s10   ;;  %s471_s6 = smov %s370_s8 }
 0x3fc   : > { %p4_p6 = scmp.ge.s32.totalorder %s7_s10, 6   ;;  %s472_s7 = smov %s374_s9 }
 0x3fd   : > { %s473_s8 = smov %s476_s12  ;;  %s474_s9 = smov %s480_s13 }
 0x3fe   :  { %6 = sbr.rel (!%p4_p6) target bundleno = 3 (0x3), region = 125 }

// kernel: custom-call.50
= control target key start
LH: loop header
LB: loop body
LE: loop exit
PB: predicated region body
PF: predicated region fallthrough
CT: control target
= control target key end

     0   :  { %s6_s0 = inlined_call_operand.hbm [shape: pred[2,2], index: 0, kind: output, shape index: {}]  }

// kernel: custom-call.55
= control target key start
LH: loop header
LB: loop body
LE: loop exit
PB: predicated region body
PF: predicated region fallthrough
CT: control target
= control target key end

     0   :  { %s526_s6 = smov 0   ;;  %s528_s7 = smov 0   ;;  %s628_s0 = inlined_call_operand.vmem [shape: f32[2,2,8,8], index: 0, kind: input, shape index: {}]   ;;  %s629_s1 = inlined_call_operand.vmem [shape: f32[2,2,8,8], index: 1, kind: output, shape index: {}]  }
   0x1   :  { %s530_s8 = smov 0   ;;  %s532_s9 = smov 0  }
   0x2   :  { %s534_s10 = smov 0  }
   0x3 LB: > { %s390_s11 = sadd.s32 4294967295, %s513_s10   ;;  %s29_s12 = sadd.s32 1, %s505_s8  ;;  %s513_s10 = sphi %s534_s10, %s7_s10   ;;  %s509_s9 = sphi %s532_s9, %s633_s9   ;;  %s505_s8 = sphi %s530_s8, %s632_s8   ;;  %s501_s7 = sphi %s528_s7, %s631_s7   ;;  %s497_s6 = sphi %s526_s6, %s630_s6  }
   0x4   : > { %p31_p0 = scmp.ge.s32.totalorder %s29_s12, 2  ;;  %s33_s13 = sadd.s32 1, %s509_s9 }
   0x5   : > { %p392_p2 = scmp.ge.s32.totalorder %s513_s10, 4 }
   0x6   : > { %s635_s12 = smov (%p31_p0, %s29_s12), 0  ;;  %s637_s13 = smov (!%p31_p0, %s33_s13), %s509_s9 }
   0x7   : > { %p35_p1 = scmp.ge.s32.totalorder %s637_s13, 2  ;;  %47 = sbr.rel (%p392_p2) target bundleno = 15 (0xf), region = 16 }
   0x8   : > { %s49_s14 = sand.u32 (!%p392_p2), 1, %s513_s10   ;;  %s394_s15 = sshll.u32 (!%p392_p2), %s509_s9, 1 }
   0x9   : > { %s639_s13 = smov (%p35_p1, %s637_s13), 0  ;;  %s393_s16 = sshll.u32 (!%p392_p2), %s49_s14, 3 }
   0xa   : > { %s55_s17 = sadd.s32 (!%p392_p2), %s505_s8, %s394_s15  ;;  %s51_s22 = scalar_lea.vmem (!%p392_p2), [#allocation0], %s393_s16 }
   0xb   : > { %s395_s18 = sshll.u32 (!%p392_p2), %s55_s17, 3 }
   0xc   : > { %s57_s21 = scalar_lea.vmem %s628_s0, %s395_s18 }
   0xd   : > { %v86_v0 = vld [vmem:[%s57_s21] sm:$0xff] }
   0xe   : > { %87 = vst [vmem:[%s51_s22] sm:$0xff] %v86_v0 }
   0xf PF: > { %p396_p3 = scmp.ge.s32.totalorder %s513_s10, 1  ;;  %p92_p4 = scmp.lt.s32.totalorder %s513_s10, 5 }
  0x11   : > { %p93_p5 = pnand %p396_p3, %p92_p4 }
  0x12   : > { %s99_s23 = sand.u32 (!%p93_p5), 1, %s390_s11   ;;  %s414_s27 = sshll.u32 (!%p93_p5), %s501_s7, 1 }
  0x13   : > { %96 = sbr.rel (%p93_p5) target bundleno = 1376 (0x560), region = 54  ;;  %s397_s24 = sshll.u32 (!%p93_p5), %s99_s23, 3 }
  0x14   : > { %s568_s25 = scalar_lea.vmem (!%p93_p5), [#allocation1], %s397_s24  ;;  %s572_s26 = scalar_lea.vmem (!%p93_p5), [#allocation0], %s397_s24 }
  0x15   : > { %s290_s28 = sadd.s32 (!%p93_p5), %s497_s6, %s414_s27 }
  0x16   : > { %s415_s29 = sshll.u32 (!%p93_p5), %s290_s28, 3 }
  0x17   : > { %s292_s3 = scalar_lea.vmem (!%p93_p5), %s629_s1, %s415_s29 }
  0x18   : > { %v515_v1 = vmov 0.0   ;;  %v113_v5 = vld [vmem:[%s572_s26] ss:$0 sm:$0xff]  ;;  %vm111_vm0 = vcmask 7168   ;;  %v400_v17 = vld [vmem:[%s572_s26 + $0x1] ss:$0 sm:$0xff] }
  0x19   : > { %110 = vst [vmem:[%s568_s25] sm:$0xff] %v515_v1  ;;  %v576_v9 = vld [vmem:[%s572_s26] sm:$0xff]  ;;  %vm129_vm1 = vcmask 15368   ;;  %vm146_vm2 = vcmask 1047553   ;;  %vm151_vm4 = vcmask 23568   ;;  %vm168_vm5 = vcmask 1047554  }
  0x1a   : > { %vm147_vm3 = vmand %vm129_vm1, %vm146_vm2  ;;  %v402_v29 = vld [vmem:[%s572_s26 + $0x2] ss:$0 sm:$0xff]  ;;  %v404_v41 = vld [vmem:[%s572_s26 + $0x3] ss:$0 sm:$0xff]  ;;  %vm173_vm7 = vcmask 31768   ;;  %vm190_vm8 = vcmask 1047555  }
  0x1b   : > { %vm169_vm6 = vmand %vm151_vm4, %vm168_vm5  ;;  %v406_v53 = vld [vmem:[%s572_s26 + $0x4] ss:$0 sm:$0xff]  ;;  %vm195_vm10 = vcmask 39968   ;;  %vm212_vm11 = vcmask 1047556   ;;  %v408_v1 = vld [vmem:[%s572_s26 + $0x5] ss:$0 sm:$0xff] }
  0x1c   : > { %vm191_vm9 = vmand %vm173_vm7, %vm190_vm8  ;;  %vm217_vm13 = vcmask 48168   ;;  %vm234_vm14 = vcmask 1047557   ;;  %vm256_vm1 = vcmask 1047558   ;;  %vm278_vm4 = vcmask 1047559  }
  0x1d   : > { %vm213_vm12 = vmand %vm195_vm10, %vm212_vm11 }
  0x1e   : > { %vm235_vm15 = vmand %vm217_vm13, %vm234_vm14 }
  0x20   : > { %v112_v2 = vld [vmem:[%s568_s25] ss:$0 sm:$0xff] }
  0x21   : > { %v114_v3 = vmul.f32 %v112_v2, %v112_v2  ;;  %v121_v4 = vmul.f32 0.0, %v112_v2 }
  0x23   : > { %115 = vadd.xlane.f32.xlu0 %v114_v3 }
  0x27   : > { %122 = vadd.xlane.f32.xlu0 %v121_v4 }
  0xac   : > { %v116_v6 = vpop.xlane.xlu0 %115 }
  0xad   : > { %v117_v7 = vsub.f32 %v113_v5, %v116_v6 }
  0xaf   : > { %459 = vrsqrt.f32 %v117_v7 }
  0xb0   : > { %v123_v8 = vpop.xlane.xlu0 %122 }
  0xb1   : > { %v124_v10 = vsub.f32 %v576_v9, %v123_v8 }
  0xbc   : > { %v460_v11 = vpop.eup %459 }
  0xbd   : > { %v125_v12 = vmul.f32 %v460_v11, %v124_v10 }
  0xbf   : > { %v126_v13 = vsel %vm111_vm0, %v125_v12, 0.0  ;;  %vm239_vm0 = vcmask 56368  }
  0xc0   : > { %128 = vst [vmem:[%s568_s25] sm:$0xff] %v126_v13  ;;  %vm257_vm2 = vmand %vm239_vm0, %vm256_vm1 }
  0xc7   : > { %v399_v14 = vld [vmem:[%s568_s25 + $0x1] ss:$0 sm:$0xff] }
  0xc8   : > { %v134_v15 = vmul.f32 %v399_v14, %v399_v14  ;;  %v141_v16 = vmul.f32 %v399_v14, %v126_v13  ;;  %v410_v14 = vld [vmem:[%s572_s26 + $0x6] ss:$0 sm:$0xff] }
  0xca   : > { %135 = vadd.xlane.f32.xlu1 %v134_v15 }
  0xce   : > { %142 = vadd.xlane.f32.xlu1 %v141_v16 }
 0x153   : > { %v136_v18 = vpop.xlane.xlu1 %135 }
 0x154   : > { %v137_v19 = vsub.f32 %v400_v17, %v136_v18 }
 0x156   : > { %461 = vrsqrt.f32 %v137_v19 }
 0x157   : > { %v143_v20 = vpop.xlane.xlu1 %142 }
 0x158   : > { %v144_v21 = vsub.f32 %v576_v9, %v143_v20 }
 0x163   : > { %v462_v22 = vpop.eup %461 }
 0x164   : > { %v145_v23 = vmul.f32 %v462_v22, %v144_v21 }
 0x166   : > { %v148_v24 = vsel %vm147_vm3, %v145_v23, 0.0  ;;  %vm261_vm3 = vcmask 64568  }
 0x167   : > { %v149_v25 = vadd.f32 %v148_v24, %v126_v13  ;;  %vm279_vm5 = vmand %vm261_vm3, %vm278_vm4 }
 0x169   : > { %150 = vst [vmem:[%s568_s25] sm:$0xff] %v149_v25 }
 0x170   : > { %v401_v26 = vld [vmem:[%s568_s25 + $0x2] ss:$0 sm:$0xff] }
 0x171   : > { %v163_v27 = vmul.f32 %v401_v26, %v149_v25  ;;  %v156_v28 = vmul.f32 %v401_v26, %v401_v26  ;;  %v412_v26 = vld [vmem:[%s572_s26 + $0x7] ss:$0 sm:$0xff] }
 0x173   : > { %164 = vadd.xlane.f32.xlu1 %v163_v27  ;;  %157 = vadd.xlane.f32.xlu0 %v156_v28 }
 0x1fc   : > { %v158_v30 = vpop.xlane.xlu0 %157  ;;  %v165_v32 = vpop.xlane.xlu1 %164 }
 0x1fd   : > { %v159_v31 = vsub.f32 %v402_v29, %v158_v30  ;;  %v166_v33 = vsub.f32 %v576_v9, %v165_v32 }
 0x1ff   : > { %463 = vrsqrt.f32 %v159_v31 }
 0x20c   : > { %v464_v34 = vpop.eup %463 }
 0x20d   : > { %v167_v35 = vmul.f32 %v464_v34, %v166_v33 }
 0x20f   : > { %v170_v36 = vsel %vm169_vm6, %v167_v35, 0.0 }
 0x210   : > { %v171_v37 = vadd.f32 %v170_v36, %v149_v25 }
 0x212   : > { %172 = vst [vmem:[%s568_s25] sm:$0xff] %v171_v37 }
 0x219   : > { %v403_v38 = vld [vmem:[%s568_s25 + $0x3] ss:$0 sm:$0xff] }
 0x21a   : > { %v185_v39 = vmul.f32 %v403_v38, %v171_v37  ;;  %v178_v40 = vmul.f32 %v403_v38, %v403_v38 }
 0x21c   : > { %186 = vadd.xlane.f32.xlu1 %v185_v39  ;;  %179 = vadd.xlane.f32.xlu0 %v178_v40 }
 0x2a5   : > { %v180_v42 = vpop.xlane.xlu0 %179  ;;  %v187_v44 = vpop.xlane.xlu1 %186 }
 0x2a6   : > { %v181_v43 = vsub.f32 %v404_v41, %v180_v42  ;;  %v188_v45 = vsub.f32 %v576_v9, %v187_v44 }
 0x2a8   : > { %465 = vrsqrt.f32 %v181_v43 }
 0x2b5   : > { %v466_v46 = vpop.eup %465 }
 0x2b6   : > { %v189_v47 = vmul.f32 %v466_v46, %v188_v45 }
 0x2b8   : > { %v192_v48 = vsel %vm191_vm9, %v189_v47, 0.0 }
 0x2b9   : > { %v193_v49 = vadd.f32 %v192_v48, %v171_v37 }
 0x2bb   : > { %194 = vst [vmem:[%s568_s25] sm:$0xff] %v193_v49 }
 0x2c2   : > { %v405_v50 = vld [vmem:[%s568_s25 + $0x4] ss:$0 sm:$0xff] }
 0x2c3   : > { %v207_v51 = vmul.f32 %v405_v50, %v193_v49  ;;  %v200_v52 = vmul.f32 %v405_v50, %v405_v50 }
 0x2c5   : > { %208 = vadd.xlane.f32.xlu1 %v207_v51  ;;  %201 = vadd.xlane.f32.xlu0 %v200_v52 }
 0x34e   : > { %v202_v54 = vpop.xlane.xlu0 %201  ;;  %v209_v56 = vpop.xlane.xlu1 %208 }
 0x34f   : > { %v203_v55 = vsub.f32 %v406_v53, %v202_v54  ;;  %v210_v57 = vsub.f32 %v576_v9, %v209_v56 }
 0x351   : > { %467 = vrsqrt.f32 %v203_v55 }
 0x35e   : > { %v468_v58 = vpop.eup %467 }
 0x35f   : > { %v211_v59 = vmul.f32 %v468_v58, %v210_v57 }
 0x361   : > { %v214_v60 = vsel %vm213_vm12, %v211_v59, 0.0 }
 0x362   : > { %v215_v61 = vadd.f32 %v214_v60, %v193_v49 }
 0x364   : > { %216 = vst [vmem:[%s568_s25] sm:$0xff] %v215_v61 }
 0x36b   : > { %v407_v62 = vld [vmem:[%s568_s25 + $0x5] ss:$0 sm:$0xff] }
 0x36c   : > { %v229_v63 = vmul.f32 %v407_v62, %v215_v61  ;;  %v222_v0 = vmul.f32 %v407_v62, %v407_v62 }
 0x36e   : > { %230 = vadd.xlane.f32.xlu1 %v229_v63  ;;  %223 = vadd.xlane.f32.xlu0 %v222_v0 }
 0x3f7   : > { %v224_v2 = vpop.xlane.xlu0 %223  ;;  %v231_v4 = vpop.xlane.xlu1 %230 }
 0x3f8   : > { %v225_v3 = vsub.f32 %v408_v1, %v224_v2  ;;  %v232_v5 = vsub.f32 %v576_v9, %v231_v4 }
 0x3fa   : > { %469 = vrsqrt.f32 %v225_v3 }
 0x407   : > { %v470_v6 = vpop.eup %469 }
 0x408   : > { %v233_v7 = vmul.f32 %v470_v6, %v232_v5 }
 0x40a   : > { %v236_v8 = vsel %vm235_vm15, %v233_v7, 0.0 }
 0x40b   : > { %v237_v10 = vadd.f32 %v236_v8, %v215_v61 }
 0x40d   : > { %238 = vst [vmem:[%s568_s25] sm:$0xff] %v237_v10 }
 0x414   : > { %v409_v11 = vld [vmem:[%s568_s25 + $0x6] ss:$0 sm:$0xff] }
 0x415   : > { %v251_v12 = vmul.f32 %v409_v11, %v237_v10  ;;  %v244_v13 = vmul.f32 %v409_v11, %v409_v11 }
 0x417   : > { %252 = vadd.xlane.f32.xlu1 %v251_v12  ;;  %245 = vadd.xlane.f32.xlu0 %v244_v13 }
 0x4a0   : > { %v246_v15 = vpop.xlane.xlu0 %245  ;;  %v253_v17 = vpop.xlane.xlu1 %252 }
 0x4a1   : > { %v247_v16 = vsub.f32 %v410_v14, %v246_v15  ;;  %v254_v18 = vsub.f32 %v576_v9, %v253_v17 }
 0x4a3   : > { %471 = vrsqrt.f32 %v247_v16 }
 0x4b0   : > { %v472_v19 = vpop.eup %471 }
 0x4b1   : > { %v255_v20 = vmul.f32 %v472_v19, %v254_v18 }
 0x4b3   : > { %v258_v21 = vsel %vm257_vm2, %v255_v20, 0.0 }
 0x4b4   : > { %v259_v22 = vadd.f32 %v258_v21, %v237_v10 }
 0x4b6   : > { %260 = vst [vmem:[%s568_s25] sm:$0xff] %v259_v22 }
 0x4bd   : > { %v411_v23 = vld [vmem:[%s568_s25 + $0x7] ss:$0 sm:$0xff] }
 0x4be   : > { %v273_v24 = vmul.f32 %v411_v23, %v259_v22  ;;  %v266_v25 = vmul.f32 %v411_v23, %v411_v23 }
 0x4c0   : > { %274 = vadd.xlane.f32.xlu1 %v273_v24  ;;  %267 = vadd.xlane.f32.xlu0 %v266_v25 }
 0x549   : > { %v268_v27 = vpop.xlane.xlu0 %267  ;;  %v275_v29 = vpop.xlane.xlu1 %274 }
 0x54a   : > { %v269_v28 = vsub.f32 %v412_v26, %v268_v27  ;;  %v276_v30 = vsub.f32 %v576_v9, %v275_v29 }
 0x54c   : > { %473 = vrsqrt.f32 %v269_v28 }
 0x559   : > { %v474_v31 = vpop.eup %473 }
 0x55a   : > { %v277_v32 = vmul.f32 %v474_v31, %v276_v30 }
 0x55c   : > { %v280_v33 = vsel %vm279_vm5, %v277_v32, 0.0 }
 0x55d   : > { %v281_v34 = vadd.f32 %v280_v33, %v259_v22 }
 0x55f   : > { %282 = vst [vmem:[%s568_s25] sm:$0xff] %v281_v34  ;;  %322 = vst [vmem:[%s292_s3] sm:$0xff] %v281_v34 }
 0x560 PF: > { %s7_s10 = sadd.s32 1, %s513_s10   ;;  %s630_s6 = smov %s505_s8 }
 0x561   : > { %p4_p6 = scmp.ge.s32.totalorder %s7_s10, 6   ;;  %s631_s7 = smov %s509_s9 }
 0x562   : > { %s632_s8 = smov %s635_s12  ;;  %s633_s9 = smov %s639_s13 }
 0x563   :  { %6 = sbr.rel (!%p4_p6) target bundleno = 3 (0x3), region = 132 }

// kernel: custom-call.56
= control target key start
LH: loop header
LB: loop body
LE: loop exit
PB: predicated region body
PF: predicated region fallthrough
CT: control target
= control target key end

     0   :  { %s442_s6 = smov 0   ;;  %s444_s7 = smov 0   ;;  %s522_s0 = inlined_call_operand.vmem [shape: f32[2,2,1,8,8], index: 0, kind: input, shape index: {}]   ;;  %s523_s1 = inlined_call_operand.vmem [shape: f32[2,2,1,8,8], index: 1, kind: output, shape index: {}]  }
   0x1   :  { %s446_s8 = smov 0   ;;  %s448_s9 = smov 0  }
   0x2   :  { %s450_s10 = smov 0  }
   0x3 LB: > { %s334_s11 = sadd.s32 4294967295, %s429_s10   ;;  %s36_s12 = sadd.s32 1, %s421_s8  ;;  %s429_s10 = sphi %s450_s10, %s7_s10   ;;  %s425_s9 = sphi %s448_s9, %s527_s9   ;;  %s421_s8 = sphi %s446_s8, %s526_s8   ;;  %s417_s7 = sphi %s444_s7, %s525_s7   ;;  %s413_s6 = sphi %s442_s6, %s524_s6  }
   0x4   : > { %p38_p0 = scmp.ge.s32.totalorder %s36_s12, 2  ;;  %s40_s13 = sadd.s32 1, %s425_s9 }
   0x5   : > { %p336_p2 = scmp.ge.s32.totalorder %s429_s10, 4 }
   0x6   : > { %s529_s12 = smov (%p38_p0, %s36_s12), 0  ;;  %s531_s13 = smov (!%p38_p0, %s40_s13), %s425_s9 }
   0x7   : > { %p42_p1 = scmp.ge.s32.totalorder %s531_s13, 2  ;;  %54 = sbr.rel (%p336_p2) target bundleno = 15 (0xf), region = 16 }
   0x8   : > { %s56_s14 = sand.u32 (!%p336_p2), 1, %s429_s10   ;;  %s338_s15 = sshll.u32 (!%p336_p2), %s425_s9, 1 }
   0x9   : > { %s533_s13 = smov (%p42_p1, %s531_s13), 0  ;;  %s337_s16 = sshll.u32 (!%p336_p2), %s56_s14, 3 }
   0xa   : > { %s63_s17 = sadd.s32 (!%p336_p2), %s421_s8, %s338_s15  ;;  %s58_s22 = scalar_lea.vmem (!%p336_p2), [#allocation0], %s337_s16 }
   0xb   : > { %s339_s18 = sshll.u32 (!%p336_p2), %s63_s17, 3 }
   0xc   : > { %s65_s21 = scalar_lea.vmem %s522_s0, %s339_s18 }
   0xd   : > { %v94_v0 = vld [vmem:[%s65_s21] sm:$0xff] }
   0xe   : > { %95 = vst [vmem:[%s58_s22] sm:$0xff] %v94_v0 }
   0xf PF: > { %p340_p3 = scmp.ge.s32.totalorder %s429_s10, 1  ;;  %p100_p4 = scmp.lt.s32.totalorder %s429_s10, 5 }
  0x11   : > { %p101_p5 = pnand %p340_p3, %p100_p4 }
  0x13   : > { %104 = sbr.rel (%p101_p5) target bundleno = 1185 (0x4a1), region = 54 }
  0x18   : > { %s107_s23 = sand.u32 1, %s334_s11   ;;  %v118_v1 = vlaneseq  ;;  %v431_v10 = vmov -1.0   ;;  %s344_s26 = sshll.u32 %s417_s7, 1 }
  0x19   : > { %s341_s24 = sshll.u32 %s107_s23, 3  ;;  %s229_s27 = sadd.s32 %s413_s6, %s344_s26 }
  0x1a   : > { %v484_v2 = vand.u32 127, %v118_v1  ;;  %v122_v3 = vshrl.u32 %v118_v1, 7  ;;  %s109_s25 = scalar_lea.vmem [#allocation0], %s341_s24  ;;  %s345_s28 = sshll.u32 %s229_s27, 3 }
  0x1b   : > { %v125_v4 = vld [vmem:[%s109_s25] sm:$0xff]  ;;  %s231_s2 = scalar_lea.vmem %s523_s1, %s345_s28 }
  0x1c   : > { %vm120_vm0 = vcmp.lt.s32.totalorder %v484_v2, 8  ;;  %vm124_vm1 = vcmp.eq.s32.totalorder %v122_v3, %v484_v2  ;;  %vm129_vm2 = vcmp.ge.s32.totalorder %v122_v3, %v484_v2  ;;  %vm143_vm4 = vcmp.eq.s32.totalorder %v484_v2, 0 }
  0x1d   : > { %v126_v5 = vsel %vm124_vm1, %v125_v4, 0.0  ;;  %vm130_vm3 = vmand %vm129_vm2, %vm120_vm0  ;;  %vm140_vm5 = vcmp.eq.s32.totalorder %v484_v2, %v122_v3  ;;  %v144_v11 = vsel %vm143_vm4, 1.0, %v431_v10  ;;  %vm151_vm6 = vcmp.eq.s32.totalorder %v484_v2, 1 }
  0x1e   : > { %v131_v6 = vsel %vm130_vm3, %v125_v4, 0.0  ;;  %127 = vadd.xlane.f32.xlu0 %v126_v5  ;;  %v145_v12 = vsel %vm140_vm5, %v144_v11, 0.0  ;;  %vm161_vm7 = vcmp.eq.s32.totalorder %v484_v2, 2  ;;  %vm171_vm8 = vcmp.eq.s32.totalorder %v484_v2, 3 }
  0x1f   : > { %vm181_vm9 = vcmp.eq.s32.totalorder %v484_v2, 4  ;;  %vm191_vm10 = vcmp.eq.s32.totalorder %v484_v2, 5  ;;  %vm201_vm11 = vcmp.eq.s32.totalorder %v484_v2, 6  ;;  %vm211_vm12 = vcmp.eq.s32.totalorder %v484_v2, 7 }
  0xa7   : > { %v489_v7 = vpop.xlane.xlu0 %127 }
  0xa8   : > { %389 = vrcp.f32 %v489_v7  ;;  %vm218_vm13 = vweird.f32 %v489_v7 }
  0xb5   : > { %v390_v8 = vpop.eup %389 }
  0xb6   : > { %v133_v9 = vmul.f32 %v390_v8, %v131_v6 }
  0xb8   : > { %134 = vst [vmem:[#allocation2] sm:$0xff] %v133_v9 }
  0xbf   : > { %v147_v13 = vld [vmem:[#allocation2 + $0x1] ss:$0 sm:$0xff]  ;;  %v157_v16 = vld [vmem:[#allocation2 + $0x2] ss:$0 sm:$0xff]  ;;  %v167_v21 = vld [vmem:[#allocation2 + $0x3] ss:$0 sm:$0xff] }
  0xc0   : > { %v148_v14 = vxor.u32 2147483648, %v147_v13  ;;  %v158_v18 = vxor.u32 2147483648, %v157_v16  ;;  %v168_v23 = vxor.u32 2147483648, %v167_v21  ;;  %v177_v26 = vld [vmem:[#allocation2 + $0x4] ss:$0 sm:$0xff] }
  0xc1   : > { %v178_v28 = vxor.u32 2147483648, %v177_v26  ;;  %v187_v31 = vld [vmem:[#allocation2 + $0x5] ss:$0 sm:$0xff]  ;;  %v197_v36 = vld [vmem:[#allocation2 + $0x6] ss:$0 sm:$0xff] }
  0xc2   : > { %v152_v15 = vmul.f32 %v148_v14, %v145_v12  ;;  %v188_v33 = vxor.u32 2147483648, %v187_v31  ;;  %v198_v38 = vxor.u32 2147483648, %v197_v36  ;;  %v207_v41 = vld [vmem:[#allocation2 + $0x7] ss:$0 sm:$0xff] }
  0xc3   : > { %v208_v43 = vxor.u32 2147483648, %v207_v41 }
  0xc4   : > { %153 = vadd.xlane.f32.xlu0 %v152_v15 }
 0x14d   : > { %v154_v17 = vpop.xlane.xlu0 %153 }
 0x14e   : > { %v155_v19 = vsel %vm151_vm6, %v154_v17, %v145_v12 }
 0x14f   : > { %v162_v20 = vmul.f32 %v158_v18, %v155_v19 }
 0x151   : > { %163 = vadd.xlane.f32.xlu1 %v162_v20 }
 0x1da   : > { %v164_v22 = vpop.xlane.xlu1 %163 }
 0x1db   : > { %v165_v24 = vsel %vm161_vm7, %v164_v22, %v155_v19 }
 0x1dc   : > { %v172_v25 = vmul.f32 %v168_v23, %v165_v24 }
 0x1de   : > { %173 = vadd.xlane.f32.xlu1 %v172_v25 }
 0x267   : > { %v174_v27 = vpop.xlane.xlu1 %173 }
 0x268   : > { %v175_v29 = vsel %vm171_vm8, %v174_v27, %v165_v24 }
 0x269   : > { %v182_v30 = vmul.f32 %v178_v28, %v175_v29 }
 0x26b   : > { %183 = vadd.xlane.f32.xlu0 %v182_v30 }
 0x2f4   : > { %v184_v32 = vpop.xlane.xlu0 %183 }
 0x2f5   : > { %v185_v34 = vsel %vm181_vm9, %v184_v32, %v175_v29 }
 0x2f6   : > { %v192_v35 = vmul.f32 %v188_v33, %v185_v34 }
 0x2f8   : > { %193 = vadd.xlane.f32.xlu1 %v192_v35 }
 0x381   : > { %v194_v37 = vpop.xlane.xlu1 %193 }
 0x382   : > { %v195_v39 = vsel %vm191_vm10, %v194_v37, %v185_v34 }
 0x383   : > { %v202_v40 = vmul.f32 %v198_v38, %v195_v39 }
 0x385   : > { %203 = vadd.xlane.f32.xlu0 %v202_v40 }
 0x40e   : > { %v204_v42 = vpop.xlane.xlu0 %203 }
 0x40f   : > { %v205_v44 = vsel %vm201_vm11, %v204_v42, %v195_v39 }
 0x410   : > { %v212_v45 = vmul.f32 %v208_v43, %v205_v44 }
 0x412   : > { %213 = vadd.xlane.f32.xlu1 %v212_v45 }
 0x49b   : > { %v214_v46 = vpop.xlane.xlu1 %213 }
 0x49c   : > { %v215_v47 = vsel %vm211_vm12, %v214_v46, %v205_v44 }
 0x49d   : > { %v217_v48 = vmul.f32 %v390_v8, %v215_v47 }
 0x49f   : > { %v219_v49 = vsel %vm218_vm13, %v215_v47, %v217_v48 }
 0x4a0   : > { %261 = vst [vmem:[%s231_s2] sm:$0xff] %v219_v49 }
 0x4a1 PF: > { %s7_s10 = sadd.s32 1, %s429_s10   ;;  %s524_s6 = smov %s421_s8 }
 0x4a2   : > { %p4_p6 = scmp.ge.s32.totalorder %s7_s10, 6   ;;  %s525_s7 = smov %s425_s9 }
 0x4a3   : > { %s526_s8 = smov %s529_s12  ;;  %s527_s9 = smov %s533_s13 }
 0x4a4   :  { %6 = sbr.rel (!%p4_p6) target bundleno = 3 (0x3), region = 125 }

// kernel: custom-call.22
= control target key start
LH: loop header
LB: loop body
LE: loop exit
PB: predicated region body
PF: predicated region fallthrough
CT: control target
= control target key end

     0   :  { %s2244_s0 = inlined_call_operand.vmem [shape: f32[2,2,4,4], index: 0, kind: input, shape index: {}]   ;;  %s2245_s1 = inlined_call_operand.vmem [shape: f32[2,2,4,4], index: 1, kind: input, shape index: {}]   ;;  %s2246_s2 = inlined_call_operand.vmem [shape: f32[2,2,4,4], index: 2, kind: input, shape index: {}]   ;;  %s2247_s3 = inlined_call_operand.vmem [shape: f32[2,2,4,4], index: 3, kind: input, shape index: {}]   ;;  %s2248_s4 = inlined_call_operand.vmem [shape: f32[2,2,4], index: 4, kind: output, shape index: {0}]   ;;  %s2249_s5 = inlined_call_operand.vmem [shape: f32[2,2,4], index: 5, kind: output, shape index: {1}]   ;;  %s2250_s6 = inlined_call_operand.vmem [shape: f32[2,2,4,4], index: 6, kind: output, shape index: {2}]   ;;  %s2251_s7 = inlined_call_operand.vmem [shape: f32[2,2,4,4], index: 7, kind: output, shape index: {3}]   ;;  %s2252_s8 = inlined_call_operand.vmem [shape: f32[2,2,4,4], index: 8, kind: output, shape index: {4}]   ;;  %s2253_s9 = inlined_call_operand.vmem [shape: f32[2,2,4,4], index: 9, kind: output, shape index: {5}]  }
   0x1   :  { %2259 = sst [smem:[#allocation38_spill]] %s2253_s9 }
   0x2   :  { %s1876_s30 = smov 0   ;;  %s1878_s10 = smov 0  }
   0x3   :  { %s1880_s11 = smov 0   ;;  %s1882_s12 = smov 0  }
   0x4   :  { %s1884_s13 = smov 0   ;;  %s1886_s14 = smov 0  }
   0x5   :  { %s1888_s15 = smov 0  }
   0x6 LB: > { %2260 = sst [smem:[#allocation33_spill]] %s1793_s10  ;;  %s25_s16 = sadd.s32 1, %s1805_s13  ;;  %s1813_s15 = sphi %s1888_s15, %s16_s15   ;;  %s1809_s14 = sphi %s1886_s14, %s2285_s14   ;;  %s1805_s13 = sphi %s1884_s13, %s2287_s13   ;;  %s1801_s12 = sphi %s1882_s12, %s2283_s12   ;;  %s1797_s11 = sphi %s1880_s11, %s2286_s11   ;;  %s1793_s10 = sphi %s1878_s10, %s2282_s10   ;;  %s1789_s30 = sphi %s1876_s30, %s2281_s30  }
   0x7   : > { %2261 = sst [smem:[#allocation34_spill]] %s1809_s14  ;;  %p26_p0 = scmp.ge.s32.totalorder %s25_s16, 2 }
   0x8   : > { %s28_s17 = sadd.s32 1, %s1809_s14  ;;  %s2254_s18 = sadd.s32 4294967295, %s1813_s15  }
   0x9   : > { %s32_s19 = sshrl.u32 %s1805_s13, 3  ;;  %s2289_s16 = smov (%p26_p0, %s25_s16), 0 }
   0xa   : > { %2262 = sst [smem:[#allocation35_spill]] %s2289_s16  ;;  %s2291_s17 = smov (!%p26_p0, %s28_s17), %s1809_s14 }
   0xb   : > { %s33_s20 = sshrl.u32 %s2289_s16, 3  ;;  %p49_p1 = scmp.ne.s32.totalorder %s1793_s10, %s1789_s30 }
   0xc   : > { %p30_p2 = scmp.ge.s32.totalorder %s2291_s17, 2  ;;  %s35_s21 = ssub.s32 %s32_s19, %s33_s20 }
   0xd   : > { %p50_p3 = scmp.eq.s32.totalorder %s2254_s18, 3  ;;  %s39_s25 = sadd.s32 1, %s1793_s10 }
   0xe   : > { %s2293_s17 = smov (%p30_p2, %s2291_s17), 0  ;;  %p1602_p6 = scmp.ge.s32.totalorder %s1813_s15, 4 }
   0xf   : > { %2263 = sst [smem:[#allocation36_spill]] %s2293_s17  ;;  %p1925_p4 = por %p50_p3, %p49_p1 }
  0x10   : > { %s34_s23 = ssub.s32 %s1809_s14, %s2293_s17  ;;  %s104_s27 = sand.u32 (!%p1602_p6), 1, %s1813_s15  }
  0x11   : > { %s36_s24 = sor.u32 %s35_s21, %s34_s23  ;;  %s1604_s28 = sshll.u32 (!%p1602_p6), %s1809_s14, 1 }
  0x12   : > { %p37_p5 = scmp.eq.s32.totalorder %s36_s24, 0  ;;  %102 = sbr.rel (%p1602_p6) target bundleno = 28 (0x1c), region = 16 }
  0x13   : > { %s1603_s29 = sshll.u32 (!%p1602_p6), %s104_s27, 2  ;;  %s108_s19 = sadd.s32 (!%p1602_p6), %s1805_s13, %s1604_s28 }
  0x14   : > { %s1933_s26 = scalar_select %p37_p5, %s1793_s10, %s39_s25  }
  0x15   : > { %s1605_s20 = sshll.u32 (!%p1602_p6), %s108_s19, 2  ;;  %s106_s25 = scalar_lea.vmem (!%p1602_p6), [#allocation1], %s1603_s29 }
  0x16   : > { %2265 = sst [smem:[#allocation37_spill]] %s1933_s26  ;;  %s110_s17 = scalar_lea.vmem (!%p1602_p6), %s2244_s0, %s1605_s20 }
  0x17   : > { %v127_v0 = vld [vmem:[%s110_s17] sm:$0xf]  ;;  %s151_s24 = scalar_lea.vmem %s2245_s1, %s1605_s20  ;;  %s192_s9 = scalar_lea.vmem %s2246_s2, %s1605_s20 }
  0x18   : > { %128 = vst [vmem:[%s106_s25] sm:$0xf] %v127_v0  ;;  %v168_v1 = vld [vmem:[%s151_s24] sm:$0xf]  ;;  %s147_s14 = scalar_lea.vmem [#allocation3], %s1603_s29  ;;  %s233_s16 = scalar_lea.vmem %s2247_s3, %s1605_s20 }
  0x19   : > { %169 = vst [vmem:[%s147_s14] sm:$0xf] %v168_v1  ;;  %v209_v2 = vld [vmem:[%s192_s9] sm:$0xf]  ;;  %s188_s18 = scalar_lea.vmem [#allocation5], %s1603_s29  ;;  %s229_s17 = scalar_lea.vmem [#allocation7], %s1603_s29 }
  0x1a   : > { %210 = vst [vmem:[%s188_s18] sm:$0xf] %v209_v2  ;;  %v250_v3 = vld [vmem:[%s233_s16] sm:$0xf] }
  0x1b   : > { %251 = vst [vmem:[%s229_s17] sm:$0xf] %v250_v3 }
  0x1c PF: > { %p1615_p7 = scmp.ge.s32.totalorder %s1813_s15, 1  ;;  %p268_p8 = scmp.lt.s32.totalorder %s1813_s15, 5 }
  0x1e   : > { %p269_p9 = pnand %p1615_p7, %p268_p8 }
  0x20   : > { %272 = sbr.rel (%p269_p9) target bundleno = 1012 (0x3f4), region = 140 }
  0x25   : > { %s2266_s10 = sadd.s32 4294967295, %s1813_s15   ;;  %s309_s14 = sand.u32 1, %s1789_s30   ;;  %v373_v4 = vlaneseq  ;;  %v1823_v5 = vmov 0.0  }
  0x26   : > { %s291_s9 = sand.u32 1, %s2266_s10   ;;  %s1958_s29 = sshll.u32 %s309_s14, 1  ;;  %368 = vst [vmem:[#allocation12] sm:$0xff] %v1823_v5  ;;  %369 = vst [vmem:[#allocation14] sm:$0xff] %v1823_v5 }
  0x27   : > { %s1956_s26 = sshll.u32 %s291_s9, 2  ;;  %370 = vst [vmem:[#allocation16] sm:$0xff] %v1823_v5  ;;  %371 = vst [vmem:[#allocation18] sm:$0xff] %v1823_v5  ;;  %v1960_v6 = vand.u32 127, %v373_v4  ;;  %v1962_v7 = vshrl.u32 %v373_v4, 7  ;;  %s356_s23 = smov [#allocation20] }
  0x28   : > { %s293_s19 = scalar_lea.vmem [#allocation1], %s1956_s26  ;;  %s297_s30 = scalar_lea.vmem [#allocation3], %s1956_s26 }
  0x29   : > { %v337_v8 = vld [vmem:[%s293_s19] sm:$0xf]  ;;  %v342_v9 = vld [vmem:[%s297_s30] sm:$0xf]  ;;  %s301_s20 = scalar_lea.vmem [#allocation5], %s1956_s26  ;;  %s305_s21 = scalar_lea.vmem [#allocation7], %s1956_s26  ;;  %v375_v6 = vmov %v1960_v6  ;;  %v378_v7 = vmov %v1962_v7 }
  0x2a   : > { %338 = vst [vmem:[#allocation0] sm:$0xf] %v337_v8  ;;  %343 = vst [vmem:[#allocation2] sm:$0xf] %v342_v9  ;;  %v347_v10 = vld [vmem:[%s301_s20] sm:$0xf]  ;;  %v388_v6 = vmov %v1960_v6  ;;  %v391_v7 = vmov %v1962_v7  ;;  %vm382_vm0 = vcmp.eq.s32.totalorder %v378_v7, %v375_v6 }
  0x2b   : > { %v352_v11 = vld [vmem:[%s305_s21] sm:$0xf]  ;;  %348 = vst [vmem:[#allocation4] sm:$0xf] %v347_v10  ;;  %s359_s24 = smov [#allocation21]  ;;  %vm395_vm1 = vcmp.eq.s32.totalorder %v391_v7, %v388_v6  ;;  %s372_s25 = smov [#allocation12]  ;;  %v1474_v7 = vmov %v1962_v7 }
  0x2c   : > { %353 = vst [vmem:[#allocation6] sm:$0xf] %v352_v11  ;;  %s385_s27 = smov [#allocation18]  ;;  %s362_s28 = smov [#allocation22]  ;;  %vm1479_vm2 = vcmp.lt.s32.totalorder %v1960_v6, 4  ;;  %v1471_v6 = vmov %v1960_v6 }
  0x2d   : > { %s365_s16 = smov [#allocation23]  ;;  %v379_v12 = vld [vmem:[%s372_s25] sm:$0xf]  ;;  %s1475_s30 = smov [#allocation20]  ;;  %vm1484_vm3 = vcmp.eq.s32.totalorder %v1474_v7, %v1471_v6  ;;  %v1522_v6 = vmov %v1960_v6  ;;  %v1491_v7 = vmov %v1962_v7 }
  0x2e   : > { %v392_v13 = vld [vmem:[%s385_s27] sm:$0xf]  ;;  %v383_v16 = vsel %vm382_vm0, 1.0, %v379_v12  ;;  %s1492_s20 = smov [#allocation21]  ;;  %s1509_s21 = smov [#allocation22]  ;;  %v1488_v6 = vmov %v1960_v6  ;;  %v1525_v7 = vmov %v1962_v7 }
  0x2f   : > { %v396_v17 = vsel %vm395_vm1, 1.0, %v392_v13  ;;  %384 = vst [vmem:[%s372_s25] sm:$0xf] %v383_v16  ;;  %v1505_v6 = vmov %v1960_v6  ;;  %v1508_v7 = vmov %v1962_v7  ;;  %vm1535_vm4 = vcmp.eq.s32.totalorder %v1525_v7, %v1522_v6 }
  0x30   : > { %397 = vst [vmem:[%s385_s27] sm:$0xf] %v396_v17 }
  0x31   : > { %v357_v14 = vld [vmem:[#allocation0] sm:$0xff]  ;;  %v360_v15 = vld [vmem:[#allocation2] sm:$0xff] }
  0x32   : > { %358 = vst [vmem:[%s356_s23] sm:$0xff] %v357_v14  ;;  %361 = vst [vmem:[%s359_s24] sm:$0xff] %v360_v15  ;;  %v363_v18 = vld [vmem:[#allocation4] sm:$0xff]  ;;  %s1526_s23 = smov [#allocation23] }
  0x33   : > { %v366_v19 = vld [vmem:[#allocation6] sm:$0xff]  ;;  %364 = vst [vmem:[%s362_s28] sm:$0xff] %v363_v18 }
  0x34   : > { %367 = vst [vmem:[%s365_s16] sm:$0xff] %v366_v19 }
  0x39   : > { %v1481_v20 = vld [vmem:[%s1475_s30] sm:$0xf] }
  0x3a   : > { %v1498_v21 = vld [vmem:[%s1492_s20] sm:$0xf]  ;;  %v1482_v22 = vsel %vm1479_vm2, %v1481_v20, 0.0 }
  0x3b   : > { %v1499_v23 = vsel %vm1479_vm2, %v1498_v21, 0.0  ;;  %v1515_v24 = vld [vmem:[%s1509_s21] sm:$0xf]  ;;  %v1483_v26 = vmul.f32 %v1482_v22, %v1482_v22 }
  0x3c   : > { %v1532_v25 = vld [vmem:[%s1526_s23] sm:$0xf]  ;;  %v1500_v27 = vmul.f32 %v1499_v23, %v1499_v23  ;;  %v1516_v28 = vsel %vm1479_vm2, %v1515_v24, 0.0 }
  0x3d   : > { %v1533_v29 = vsel %vm1479_vm2, %v1532_v25, 0.0  ;;  %v1517_v30 = vmul.f32 %v1516_v28, %v1516_v28  ;;  %v1485_v33 = vsel %vm1484_vm3, 0.0, %v1483_v26 }
  0x3e   : > { %v1502_v31 = vadd.f32 %v1500_v27, %v1483_v26  ;;  %v1534_v32 = vmul.f32 %v1533_v29, %v1533_v29  ;;  %v1501_v34 = vadd.f32 %v1500_v27, %v1485_v33 }
  0x40   : > { %v1519_v35 = vadd.f32 %v1517_v30, %v1502_v31  ;;  %v1518_v36 = vadd.f32 %v1517_v30, %v1501_v34  ;;  %v1536_v37 = vsel %vm1535_vm4, 0.0, %v1534_v32 }
  0x42   : > { %v1538_v38 = vadd.f32 %v1534_v32, %v1519_v35  ;;  %v1537_v39 = vadd.f32 %v1536_v37, %v1518_v36 }
  0x44   : > { %1539 = vadd.xlane.f32.xlu0 %v1538_v38 }
  0x48   : > { %1547 = vadd.xlane.f32.xlu0 %v1537_v39 }
  0xcd   : > { %v1540_v40 = vpop.xlane.xlu0 %1539 }
  0xce   : > { %v1541_v41 = vrot.slane %v1540_v40, 4 }
  0xd0   : > { %v1542_v42 = vadd.f32 %v1541_v41, %v1540_v40 }
  0xd1   : > { %v1548_v43 = vpop.xlane.xlu0 %1547 }
  0xd2   : > { %v1543_v44 = vrot.slane %v1542_v42, 2  ;;  %v1549_v45 = vrot.slane %v1548_v43, 4 }
  0xd4   : > { %v1550_v46 = vadd.f32 %v1549_v45, %v1548_v43  ;;  %v1544_v47 = vadd.f32 %v1543_v44, %v1542_v42 }
  0xd6   : > { %v1551_v48 = vrot.slane %v1550_v46, 2  ;;  %v1545_v50 = vrot.slane %v1544_v47, 1 }
  0xd8   : > { %v1552_v49 = vadd.f32 %v1551_v48, %v1550_v46  ;;  %v1546_v53 = vadd.f32 %v1545_v50, %v1544_v47 }
  0xda   : > { %v1553_v51 = vrot.slane %v1552_v49, 1 }
  0xdc   : > { %v1554_v52 = vadd.f32 %v1553_v51, %v1552_v49 }
  0xde   : > { %1660 = vpush %v1554_v52 }
  0xdf   : > { %1662 = vpush %v1546_v53 }
 0x10f   : > { %s1661_s24 = spop %1660 }
 0x110   : > { %s1663_s25 = spop %1662 }
 0x111   : > { %s1557_s27 = smul.f32 1e-10, %s1663_s25 }
 0x113   : > { %p1558_p10 = scmp.le.f32.partialorder %s1661_s24, %s1557_s27 }
 0x114   : > { %s1996_s28 = smov (!%p1558_p10), 0  }
 0x115   : > { %1561 = sbr.rel (%p1558_p10) target bundleno = 959 (0x3bf), region = 467 }
 0x11a LB: >> { %s2001_s16 = smov 0   ;;  %s1817_s28 = sphi %s1996_s28, %s2267_s28  }
 0x11b LB: >>> { %s502_s30 = smov [#allocation20]  ;;  %v506_v6 = vmov %v1960_v6  ;;  %v509_v7 = vmov %v1962_v7  ;;  %s522_s20 = smov [#allocation21]  ;;  %vm825_vm14 = vcmp.eq.s32.totalorder %v1962_v7, 0  ;;  %vm837_vm15 = vcmp.eq.s32.totalorder %v1962_v7, 3  ;;  %s1821_s16 = sphi %s2001_s16, %s501_s16  }
 0x11c   : >>> { %v526_v6 = vmov %v1960_v6  ;;  %v529_v7 = vmov %v1962_v7  ;;  %v510_v54 = vld [vmem:[%s502_s30] sm:$0xf]  ;;  %vm513_vm5 = vcmp.eq.s32.totalorder %v509_v7, %v506_v6  ;;  %s542_s21 = smov [#allocation23]  ;;  %s503_s23 = smov [#allocation24] }
 0x11d   : >>> { %vm533_vm6 = vcmp.eq.s32.totalorder %v529_v7, %v526_v6  ;;  %v546_v6 = vmov %v1960_v6  ;;  %v549_v7 = vmov %v1962_v7  ;;  %v514_v55 = vsel %vm513_vm5, %v510_v54, 0.0  ;;  %v530_v56 = vld [vmem:[%s522_s20] sm:$0xf]  ;;  %s523_s24 = smov [#allocation25]  ;;  %s543_s25 = smov [#allocation26] }
 0x11e   : >>> { %vm553_vm7 = vcmp.eq.s32.totalorder %v549_v7, %v546_v6  ;;  %v515_v57 = vrot.slane %v514_v55, 4  ;;  %v534_v58 = vsel %vm533_vm6, %v530_v56, 0.0  ;;  %v550_v59 = vld [vmem:[%s542_s21] sm:$0xf]  ;;  %s566_s27 = smov [#allocation25]  ;;  %s564_s30 = smov [#allocation24]  ;;  %v615_v6 = vmov %v1960_v6 }
 0x11f   : >>> { %v535_v60 = vrot.slane %v534_v58, 4  ;;  %v554_v61 = vsel %vm553_vm7, %v550_v59, 0.0  ;;  %s568_s20 = smov [#allocation26]  ;;  %s603_s21 = smov [#allocation27]  ;;  %v618_v7 = vmov %v1962_v7  ;;  %v630_v6 = vmov %v1960_v6 }
 0x120   : >>> { %v516_v62 = vadd.f32 %v515_v57, %v514_v55  ;;  %v555_v63 = vrot.slane %v554_v61, 4  ;;  %v633_v7 = vmov %v1962_v7  ;;  %vm620_vm12 = vcmp.eq.s32.totalorder %v618_v7, %v615_v6  ;;  %s2020_s17 = smov [#allocation22]  ;;  %s2026_s18 = smov [#allocation14] }
 0x121   : >>> { %v536_v0 = vadd.f32 %v535_v60, %v534_v58  ;;  %vm635_vm13 = vcmp.eq.s32.totalorder %v633_v7, %v630_v6  ;;  %s865_s19 = smov [#allocation31]  ;;  %s2032_s14 = smov [#allocation18]  ;;  %v651_v55 = vld [vmem:[%s2020_s17] sm:$0xf]  ;;  %v728_v6 = vmov %v1960_v6  ;;  %v731_v7 = vmov %v1962_v7 }
 0x122   : >>> { %v517_v1 = vrot.slane %v516_v62, 2  ;;  %v556_v2 = vadd.f32 %v555_v63, %v554_v61  ;;  %v874_v58 = vld [vmem:[%s2026_s18] sm:$0xf]  ;;  %s643_s9 = smov [#allocation32]  ;;  %s867_s10 = smov [#allocation32]  ;;  %v742_v6 = vmov %v1960_v6  ;;  %v745_v7 = vmov %v1962_v7 }
 0x123   : >>> { %v537_v3 = vrot.slane %v536_v0, 2  ;;  %v876_v61 = vld [vmem:[%s2032_s14] sm:$0xf]  ;;  %vm735_vm0 = vcmp.eq.s32.totalorder %v731_v7, %v728_v6  ;;  %v701_v6 = vmov %v1960_v6  ;;  %v704_v7 = vmov %v1962_v7  ;;  %s501_s16 = sadd.s32 1, %s1821_s16  }
 0x124   : >>> { %v518_v4 = vadd.f32 %v517_v1, %v516_v62  ;;  %v557_v5 = vrot.slane %v556_v2, 2  ;;  %v715_v6 = vmov %v1960_v6  ;;  %v718_v7 = vmov %v1962_v7  ;;  %p498_p11 = scmp.ge.s32.totalorder %s501_s16, 7  }
 0x125   : >>> { %v538_v8 = vadd.f32 %v537_v3, %v536_v0  ;;  %vm750_vm1 = vcmp.eq.s32.totalorder %v745_v7, %v742_v6  ;;  %vm709_vm3 = vcmp.eq.s32.totalorder %v704_v7, %v701_v6  ;;  %vm722_vm4 = vcmp.eq.s32.totalorder %v718_v7, %v715_v6 }
 0x126   : >>> { %v519_v9 = vrot.slane %v518_v4, 1  ;;  %v558_v10 = vadd.f32 %v557_v5, %v556_v2  ;;  %vm764_vm5 = vcmp.eq.s32.totalorder %v1960_v6, 0  ;;  %vm768_vm6 = vcmp.eq.s32.totalorder %v1960_v6, 1 }
 0x127   : >>> { %v539_v11 = vrot.slane %v538_v8, 1  ;;  %vm781_vm7 = vcmp.eq.s32.totalorder %v1960_v6, 3  ;;  %v402_v6 = vmov (%p498_p11), %v1960_v6  ;;  %v405_v7 = vmov (%p498_p11), %v1962_v7 }
 0x128   : >>> { %v520_v12 = vadd.f32 %v519_v9, %v518_v4  ;;  %v559_v13 = vrot.slane %v558_v10, 1  ;;  %v455_v6 = vmov (%p498_p11), %v1960_v6 }
 0x129   : >>> { %v540_v14 = vadd.f32 %v539_v11, %v538_v8 }
 0x12a   : >>> { %521 = vst [vmem:[%s503_s23] sm:$0x1] %v520_v12  ;;  %v560_v15 = vadd.f32 %v559_v13, %v558_v10  ;;  %s605_s23 = smov [#allocation28] }
 0x12b   : >>> { %541 = vst [vmem:[%s523_s24] sm:$0x1] %v540_v14  ;;  %s562_s24 = smov [#allocation29] }
 0x12c   : >>> { %561 = vst [vmem:[%s543_s25] sm:$0x1] %v560_v15  ;;  %s563_s25 = smov [#allocation30]  ;;  %s607_s24 = smov %s562_s24 }
 0x12d   : >>> { %s609_s25 = smov %s563_s25 }
 0x131   : >>> { %v565_v18 = vld [vmem:[%s564_s30] sm:$0xff]  ;;  %s626_s30 = smov [#allocation30] }
 0x132   : >>> { %v567_v16 = vld [vmem:[%s566_s27] sm:$0xff]  ;;  %v588_v33 = vand.u32 2147483647, %v565_v18  ;;  %s611_s27 = smov [#allocation29] }
 0x133   : >>> { %v571_v17 = vmul.f32 2.0, %v567_v16  ;;  %v569_v19 = vld [vmem:[%s568_s20] sm:$0xff]  ;;  %v589_v36 = vand.u32 2147483647, %v567_v16  ;;  %s624_s20 = smov [#allocation31] }
 0x134   : >>> { %v570_v20 = vsub.f32 %v569_v19, %v565_v18  ;;  %v590_v34 = vand.u32 2147483647, %v569_v19 }
 0x135   : >>> { %1743 = vrcp.f32 %v571_v17 }
 0x136   : >>> { %v591_v35 = vmin.f32 %v588_v33, %v590_v34 }
 0x138   : >>> { %v592_v37 = vmul.f32 1.1920929e-08, %v591_v35 }
 0x13a   : >>> { %vm593_vm11 = vcmp.le.f32.partialorder %v589_v36, %v592_v37 }
 0x142   : >>> { %v1744_v21 = vpop.eup %1743 }
 0x143   : >>> { %v573_v22 = vmul.f32 %v1744_v21, %v570_v20 }
 0x145   : >>> { %v575_v23 = vmul.f32 %v573_v22, %v573_v22  ;;  %vm574_vm10 = vcmp.ge.f32.partialorder %v573_v22, 0.0 }
 0x147   : >>> { %v576_v24 = vadd.f32 1.0, %v575_v23 }
 0x149   : >>> { %1745 = vrsqrt.f32 %v576_v24  ;;  %vm579_vm8 = vcmp.eq.f32.partialorder %v576_v24, inf  ;;  %v582_v26 = vand.u32 2147483648, %v576_v24  ;;  %vm581_vm9 = vcmp.eq.f32.partialorder %v576_v24, 0.0 }
 0x156   : >>> { %v1746_v25 = vpop.eup %1745 }
 0x157   : >>> { %v578_v27 = vmul.f32 %v1746_v25, %v576_v24 }
 0x159   : >>> { %v580_v28 = vsel %vm579_vm8, %v576_v24, %v578_v27  ;;  %vm417_vm8 = vcmp.eq.s32.totalorder (%p498_p11), %v405_v7, %v402_v6  ;;  %v458_v7 = vmov (%p498_p11), %v1962_v7  ;;  %v421_v6 = vmov (%p498_p11), %v1960_v6 }
 0x15a   : >>> { %v583_v29 = vsel %vm581_vm9, %v582_v26, %v580_v28  ;;  %v424_v7 = vmov (%p498_p11), %v1962_v7  ;;  %v438_v6 = vmov (%p498_p11), %v1960_v6  ;;  %vm470_vm9 = vcmp.eq.s32.totalorder (%p498_p11), %v458_v7, %v455_v6 }
 0x15b   : >>> { %v584_v30 = vxor.u32 2147483648, %v583_v29  ;;  %v441_v7 = vmov (%p498_p11), %v1962_v7 }
 0x15d   : >>> { %v585_v31 = vsel %vm574_vm10, %v583_v29, %v584_v30 }
 0x15e   : >>> { %v586_v32 = vadd.f32 %v585_v31, %v573_v22 }
 0x160   : >>> { %1747 = vrcp.f32 %v586_v32 }
 0x16d   : >>> { %v1748_v38 = vpop.eup %1747 }
 0x16e   : >>> { %v594_v39 = vsel %vm593_vm11, 0.0, %v1748_v38 }
 0x16f   : >>> { %v595_v40 = vmul.f32 %v594_v39, %v594_v39  ;;  %v599_v41 = vmul.f32 %v594_v39, %v567_v16 }
 0x171   : >>> { %v596_v42 = vadd.f32 1.0, %v595_v40  ;;  %v600_v43 = vsub.f32 %v565_v18, %v599_v41  ;;  %v602_v44 = vadd.f32 %v599_v41, %v569_v19 }
 0x173   : >>> { %1749 = vrsqrt.f32 %v596_v42  ;;  %604 = vst [vmem:[%s603_s21] sm:$0xff] %v600_v43  ;;  %606 = vst [vmem:[%s605_s23] sm:$0xff] %v602_v44  ;;  %s641_s21 = smov [#allocation31]  ;;  %s2016_s23 = smov [#allocation20] }
 0x174   : >>> { %v649_v53 = vld [vmem:[%s2016_s23] sm:$0xf] }
 0x180   : >>> { %v1750_v45 = vpop.eup %1749 }
 0x181   : >>> { %608 = vst [vmem:[%s607_s24] sm:$0xff] %v1750_v45  ;;  %v598_v46 = vmul.f32 %v1750_v45, %v594_v39  ;;  %s639_s24 = smov [#allocation32] }
 0x183   : >>> { %610 = vst [vmem:[%s609_s25] sm:$0xff] %v598_v46  ;;  %s2018_s25 = smov [#allocation21] }
 0x184   : >>> { %v650_v54 = vld [vmem:[%s2018_s25] sm:$0xf] }
 0x188   : >>> { %v612_v47 = vld [vmem:[%s611_s27] ss:$0 sm:$0xff]  ;;  %s2022_s27 = smov [#allocation23] }
 0x189   : >>> { %v621_v48 = vsel %vm620_vm12, %v612_v47, 0.0  ;;  %v652_v56 = vld [vmem:[%s2022_s27] sm:$0xf] }
 0x18a   : >>> { %622 = vadd.xlane.f32.xlu0 %v621_v48  ;;  %v627_v49 = vld [vmem:[%s626_s30] ss:$0 sm:$0xff]  ;;  %s2024_s30 = smov [#allocation12] }
 0x18b   : >>> { %v636_v50 = vsel %vm635_vm13, %v627_v49, 0.0  ;;  %v873_v57 = vld [vmem:[%s2024_s30] sm:$0xf] }
 0x18e   : >>> { %637 = vadd.xlane.f32.xlu0 %v636_v50 }
 0x213   : >>> { %v623_v51 = vpop.xlane.xlu0 %622 }
 0x214   : >>> { %625 = vst [vmem:[%s624_s20] sm:$0xff] %v623_v51  ;;  %s2028_s20 = smov [#allocation16] }
 0x215   : >>> { %v875_v59 = vld [vmem:[%s2028_s20] sm:$0xf] }
 0x217   : >>> { %v638_v52 = vpop.xlane.xlu0 %637 }
 0x218   : >>> { %640 = vst [vmem:[%s639_s24] sm:$0xff] %v638_v52  ;;  %s2052_s24 = smov [#allocation23] }
 0x21b   : >>> { %v642_v60 = vld [vmem:[%s641_s21] sm:$0xff]  ;;  %s2050_s21 = smov [#allocation22] }
 0x21c   : >>> { %v866_v62 = vld [vmem:[%s865_s19] sm:$0xff]  ;;  %v653_v63 = vmul.f32 %v649_v53, %v642_v60  ;;  %v656_v0 = vmul.f32 %v650_v54, %v642_v60  ;;  %v660_v1 = vmul.f32 %v651_v55, %v642_v60  ;;  %v663_v2 = vmul.f32 %v652_v56, %v642_v60  ;;  %s2048_s19 = smov [#allocation12] }
 0x21d   : >>> { %v877_v3 = vmul.f32 %v873_v57, %v866_v62  ;;  %v880_v4 = vmul.f32 %v874_v58, %v866_v62  ;;  %v884_v5 = vmul.f32 %v875_v59, %v866_v62  ;;  %v887_v8 = vmul.f32 %v876_v61, %v866_v62 }
 0x21f   : >>> { %v644_v9 = vld [vmem:[%s643_s9] sm:$0xff]  ;;  %s671_s9 = smov [#allocation30] }
 0x220   : >>> { %v868_v10 = vld [vmem:[%s867_s10] sm:$0xff]  ;;  %v654_v11 = vmul.f32 %v651_v55, %v644_v9  ;;  %v657_v12 = vmul.f32 %v652_v56, %v644_v9  ;;  %v659_v13 = vmul.f32 %v649_v53, %v644_v9  ;;  %v662_v14 = vmul.f32 %v650_v54, %v644_v9  ;;  %s669_s10 = smov [#allocation29] }
 0x221   : >>> { %v878_v15 = vmul.f32 %v875_v59, %v868_v10  ;;  %v881_v16 = vmul.f32 %v876_v61, %v868_v10  ;;  %v883_v17 = vmul.f32 %v873_v57, %v868_v10  ;;  %v886_v18 = vmul.f32 %v874_v58, %v868_v10  ;;  %v670_v27 = vld [vmem:[%s669_s10] ss:$0 sm:$0xff]  ;;  %s698_s10 = smov [#allocation27] }
 0x222   : >>> { %v655_v19 = vsub.f32 %v653_v63, %v654_v11  ;;  %v658_v20 = vsub.f32 %v656_v0, %v657_v12  ;;  %v661_v21 = vadd.f32 %v660_v1, %v659_v13  ;;  %v664_v22 = vadd.f32 %v663_v2, %v662_v14  ;;  %v672_v28 = vld [vmem:[%s671_s9] ss:$0 sm:$0xff]  ;;  %s697_s9 = smov [#allocation20] }
 0x223   : >>> { %v879_v23 = vsub.f32 %v877_v3, %v878_v15  ;;  %v882_v24 = vsub.f32 %v880_v4, %v881_v16  ;;  %v885_v25 = vadd.f32 %v884_v5, %v883_v17  ;;  %v888_v26 = vadd.f32 %v887_v8, %v886_v18  ;;  %v705_v63 = vld [vmem:[%s698_s10] ss:$0 sm:$0xff]  ;;  %s941_s10 = sadd.s32 (%p498_p11), 1, %s1817_s28  }
 0x224   : >>> { %666 = vst [vmem:[%s2018_s25] sm:$0xf] %v658_v20  ;;  %668 = vst [vmem:[%s2022_s27] sm:$0xf] %v664_v22  ;;  %s2054_s25 = smov [#allocation20]  ;;  %s739_s27 = smov [#allocation28] }
 0x225   : >>> { %665 = vst [vmem:[%s2016_s23] sm:$0xf] %v655_v19  ;;  %667 = vst [vmem:[%s2020_s17] sm:$0xf] %v661_v21  ;;  %s2056_s17 = smov [#allocation16]  ;;  %s2064_s23 = smov [#allocation21]  ;;  %v746_v59 = vld [vmem:[%s739_s27] ss:$0 sm:$0xff] }
 0x226   : >>> { %889 = vst [vmem:[%s2024_s30] sm:$0xf] %v879_v23  ;;  %890 = vst [vmem:[%s2026_s18] sm:$0xf] %v882_v24  ;;  %s2058_s18 = smov [#allocation14]  ;;  %s725_s30 = smov [#allocation22] }
 0x227   : >>> { %891 = vst [vmem:[%s2028_s20] sm:$0xf] %v885_v25  ;;  %892 = vst [vmem:[%s2032_s14] sm:$0xf] %v888_v26  ;;  %s2062_s14 = smov [#allocation18]  ;;  %s738_s20 = smov [#allocation23] }
 0x228   : >>> { %s841_s27 = smov [#allocation21]  ;;  %p494_p12 = scmp.ge.s32.totalorder (%p498_p11), %s941_s10, 15 }
 0x229   : >> { %s2267_s28 = smov (%p498_p11), %s941_s10 }
 0x22b   : >>> { %v680_v30 = vld [vmem:[%s2052_s24] sm:$0xf] }
 0x22c   : >>> { %v679_v29 = vld [vmem:[%s2050_s21] sm:$0xf]  ;;  %v688_v36 = vmul.f32 %v680_v30, %v672_v28  ;;  %v691_v42 = vmul.f32 %v680_v30, %v670_v27 }
 0x22d   : >>> { %v677_v31 = vld [vmem:[%s2054_s25] sm:$0xf]  ;;  %v687_v35 = vmul.f32 %v679_v29, %v670_v27  ;;  %v690_v37 = vmul.f32 %v679_v29, %v672_v28 }
 0x22e   : >>> { %v895_v32 = vld [vmem:[%s2048_s19] ss:$0 sm:$0xff]  ;;  %v1635_v34 = vld [vmem:[%s2048_s19 + $0x3] ss:$0 sm:$0xff]  ;;  %v681_v48 = vmul.f32 %v677_v31, %v670_v27  ;;  %v684_v49 = vmul.f32 %v677_v31, %v672_v28 }
 0x22f   : >>> { %v1634_v33 = vld [vmem:[%s2048_s19 - $0x1] sm:$0xe]  ;;  %v1639_v45 = vld [vmem:[%s2058_s18 + $0x3] ss:$0 sm:$0xff]  ;;  %v689_v47 = vsub.f32 %v687_v35, %v688_v36  ;;  %v692_v53 = vadd.f32 %v691_v42, %v690_v37 }
 0x230   : >>> { %v902_v38 = vsel %vm825_vm14, %v895_v32, %v1634_v33  ;;  %v906_v39 = vld [vmem:[%s2056_s17] ss:$0 sm:$0xff]  ;;  %v1637_v40 = vld [vmem:[%s2056_s17 + $0x1] sm:$0x7] }
 0x231   : >>> { %v919_v41 = vld [vmem:[%s2058_s18] ss:$0 sm:$0xff]  ;;  %905 = vst [vmem:[%s2048_s19] sm:$0xf] %v902_v38  ;;  %v914_v43 = vsel %vm837_vm15, %v1635_v34, %v1637_v40  ;;  %v1641_v51 = vld [vmem:[%s2062_s14 + $0x1] sm:$0x7]  ;;  %695 = vst [vmem:[%s2050_s21] sm:$0xf] %v689_v47 }
 0x232   : >>> { %v1638_v44 = vld [vmem:[%s2058_s18 - $0x1] sm:$0xe]  ;;  %1636 = vst [vmem:[%s2048_s19 + $0x1] sm:$0x1] %v906_v39  ;;  %916 = vst [vmem:[%s2056_s17] sm:$0xf] %v914_v43  ;;  %v938_v54 = vsel %vm837_vm15, %v1639_v45, %v1641_v51  ;;  %s712_s19 = smov [#allocation21] }
 0x233   : >>> { %v930_v46 = vld [vmem:[%s2062_s14] ss:$0 sm:$0xff]  ;;  %v926_v50 = vsel %vm825_vm14, %v919_v41, %v1638_v44  ;;  %696 = vst [vmem:[%s2052_s24] sm:$0xf] %v692_v53  ;;  %s2106_s21 = smov [#allocation22]  ;;  %s1824_s24 = smov 1  }
 0x234   : >>> { %v678_v52 = vld [vmem:[%s2064_s23] sm:$0xf]  ;;  %929 = vst [vmem:[%s2058_s18] sm:$0xf] %v926_v50  ;;  %940 = vst [vmem:[%s2062_s14] sm:$0xf] %v938_v54  ;;  %s754_s17 = smov [#allocation21]  ;;  %s2109_s14 = smov [#allocation23] }
 0x235   : >>> { %v682_v55 = vmul.f32 %v678_v52, %v672_v28  ;;  %v685_v56 = vmul.f32 %v678_v52, %v670_v27  ;;  %1640 = vst [vmem:[%s2058_s18 + $0x1] sm:$0x1] %v930_v46  ;;  %s1825_s18 = smov 127  }
 0x237   : >>> { %v683_v57 = vsub.f32 %v681_v48, %v682_v55  ;;  %v686_v58 = vadd.f32 %v685_v56, %v684_v49 }
 0x238   : >>> { %v732_v60 = vld [vmem:[%s725_s30] sm:$0xf] }
 0x239   : >>> { %693 = vst [vmem:[%s2054_s25] sm:$0xf] %v683_v57  ;;  %694 = vst [vmem:[%s2064_s23] sm:$0xf] %v686_v58  ;;  %v736_v61 = vsel %vm735_vm0, 0.0, %v732_v60  ;;  %s753_s25 = smov [#allocation20]  ;;  %s817_s23 = smov [#allocation20] }
 0x23a   : >>> { %v747_v62 = vld [vmem:[%s738_s20] sm:$0xf]  ;;  %737 = vst [vmem:[%s725_s30] sm:$0xf] %v736_v61  ;;  %s818_s30 = smov [#allocation22] }
 0x23b   : >>> { %v751_v0 = vsel %vm750_vm1, %v746_v59, %v747_v62 }
 0x23c   : >>> { %752 = vst [vmem:[%s738_s20] sm:$0xf] %v751_v0  ;;  %s842_s20 = smov [#allocation23] }
 0x240   : >>> { %v706_v1 = vld [vmem:[%s697_s9] sm:$0xf] }
 0x241   : >>> { %v719_v2 = vld [vmem:[%s712_s19] sm:$0xf]  ;;  %v710_v3 = vsel %vm709_vm3, %v705_v63, %v706_v1 }
 0x242   : >>> { %v723_v4 = vsel %vm722_vm4, 0.0, %v719_v2  ;;  %711 = vst [vmem:[%s697_s9] sm:$0xf] %v710_v3  ;;  %v791_v5 = vld [vmem:[%s2106_s21] sm:$0xf]  ;;  %s406_s9 = smov (%p498_p11), [#allocation20] }
 0x243   : >>> { %724 = vst [vmem:[%s712_s19] sm:$0xf] %v723_v4  ;;  %792 = vrot.lane.b32.xlu0 %v791_v5, %s1824_s24  ;;  %v787_v11 = vld [vmem:[%s2109_s14] sm:$0xf]  ;;  %s425_s19 = smov (%p498_p11), [#allocation21] }
 0x244   : >>> { %v808_v12 = vld [vmem:[%s2109_s14] sm:$0xf] }
 0x245   : >>> { %v790_v30 = vld [vmem:[%s2106_s21] sm:$0xf] }
 0x249   : >>> { %v759_v8 = vld [vmem:[%s753_s25] sm:$0xf] }
 0x24a   : >>> { %760 = vrot.lane.b32.xlu1 %v759_v8, %s1824_s24  ;;  %v755_v9 = vld [vmem:[%s754_s17] sm:$0xf] }
 0x24b   : >>> { %v776_v10 = vld [vmem:[%s754_s17] sm:$0xf] }
 0x24c   : >>> { %v758_v18 = vld [vmem:[%s753_s25] sm:$0xf] }
 0x24e   : >>> { %756 = vrot.lane.b32.xlu1 %v755_v9, %s1824_s24 }
 0x252   : >>> { %777 = vrot.lane.b32.xlu1 %v776_v10, %s1825_s18 }
 0x256   : >>> { %788 = vrot.lane.b32.xlu1 %v787_v11, %s1824_s24  ;;  %s459_s24 = smov (%p498_p11), [#allocation23] }
 0x25a   : >>> { %809 = vrot.lane.b32.xlu1 %v808_v12, %s1825_s18 }
 0x2b5   : >>> { %v793_v20 = vpop.permute.xlu0 %792 }
 0x2b6   : >>> { %v797_v22 = vsel %vm764_vm5, %v791_v5, %v793_v20 }
 0x2bc   : >>> { %v761_v13 = vpop.permute.xlu1 %760 }
 0x2bd   : >>> { %v765_v14 = vsel %vm764_vm5, %v759_v8, %v761_v13 }
 0x2c0   : >>> { %v757_v15 = vpop.permute.xlu1 %756 }
 0x2c1   : >>> { %v769_v16 = vsel %vm768_vm6, %v757_v15, %v765_v14 }
 0x2c2   : >>> { %v775_v17 = vsel %vm1479_vm2, %v769_v16, 0.0 }
 0x2c3   : >>> { %783 = vst [vmem:[%s753_s25] sm:$0xf] %v775_v17 }
 0x2c4   : >>> { %v778_v19 = vpop.permute.xlu1 %777 }
 0x2c5   : >>> { %v782_v21 = vsel %vm781_vm7, %v758_v18, %v778_v19 }
 0x2c6   : >>> { %784 = vst [vmem:[%s754_s17] sm:$0xf] %v782_v21 }
 0x2c8   : >>> { %v789_v23 = vpop.permute.xlu1 %788 }
 0x2c9   : >>> { %v801_v24 = vsel %vm768_vm6, %v789_v23, %v797_v22 }
 0x2ca   : >>> { %v819_v25 = vld [vmem:[%s817_s23] ss:$0 sm:$0xff]  ;;  %v1627_v27 = vld [vmem:[%s817_s23 + $0x3] ss:$0 sm:$0xff]  ;;  %v807_v29 = vsel %vm1479_vm2, %v801_v24, 0.0 }
 0x2cb   : >>> { %v1626_v26 = vld [vmem:[%s817_s23 - $0x1] sm:$0xe]  ;;  %815 = vst [vmem:[%s2106_s21] sm:$0xf] %v807_v29  ;;  %s442_s21 = smov (%p498_p11), [#allocation22] }
 0x2cc   : >>> { %v826_v28 = vsel %vm825_vm14, %v819_v25, %v1626_v26  ;;  %v810_v31 = vpop.permute.xlu1 %809 }
 0x2cd   : >>> { %829 = vst [vmem:[%s817_s23] sm:$0xf] %v826_v28  ;;  %v843_v32 = vld [vmem:[%s841_s27] ss:$0 sm:$0xff]  ;;  %v1631_v34 = vld [vmem:[%s841_s27 + $0x3] ss:$0 sm:$0xff]  ;;  %v814_v35 = vsel %vm781_vm7, %v790_v30, %v810_v31 }
 0x2ce   : >>> { %v1630_v33 = vld [vmem:[%s841_s27 - $0x1] sm:$0xe]  ;;  %816 = vst [vmem:[%s2109_s14] sm:$0xf] %v814_v35 }
 0x2cf   : >>> { %v850_v36 = vsel %vm825_vm14, %v843_v32, %v1630_v33 }
 0x2d0   : >>> { %853 = vst [vmem:[%s841_s27] sm:$0xf] %v850_v36 }
 0x2d2   : >>> { %v830_v37 = vld [vmem:[%s818_s30] ss:$0 sm:$0xff]  ;;  %v1629_v38 = vld [vmem:[%s818_s30 + $0x1] sm:$0x7] }
 0x2d3   : >>> { %1628 = vst [vmem:[%s817_s23 + $0x1] sm:$0x1] %v830_v37  ;;  %v838_v39 = vsel %vm837_vm15, %v1627_v27, %v1629_v38 }
 0x2d4   : >>> { %840 = vst [vmem:[%s818_s30] sm:$0xf] %v838_v39 }
 0x2d5   : >>> { %v854_v40 = vld [vmem:[%s842_s20] ss:$0 sm:$0xff]  ;;  %v1633_v41 = vld [vmem:[%s842_s20 + $0x1] sm:$0x7] }
 0x2d6   : >>> { %1632 = vst [vmem:[%s841_s27 + $0x1] sm:$0x1] %v854_v40  ;;  %v862_v42 = vsel %vm837_vm15, %v1631_v34, %v1633_v41 }
 0x2d7   : >>> { %864 = vst [vmem:[%s842_s20] sm:$0xf] %v862_v42  ;;  %500 = sbr.rel (!%p498_p11) target bundleno = 283 (0x11b), region = 462 }
 0x2da   : >> { %v412_v43 = vld [vmem:[%s406_s9] sm:$0xf] (%p498_p11) }
 0x2db   : >> { %v413_v45 = vsel (%p498_p11), %vm1479_vm2, %v412_v43, 0.0  ;;  %v448_v47 = vld [vmem:[%s442_s21] sm:$0xf] (%p498_p11) }
 0x2dc   : >> { %v414_v49 = vmul.f32 %v413_v45, %v413_v45  ;;  %v449_v51 = vsel %vm1479_vm2, %v448_v47, 0.0 }
 0x2dd   : >> { %v431_v44 = vld [vmem:[%s425_s19] sm:$0xf]  ;;  %v450_v53 = vmul.f32 %v449_v51, %v449_v51 }
 0x2de   : >> { %v432_v46 = vsel %vm1479_vm2, %v431_v44, 0.0  ;;  %v465_v48 = vld [vmem:[%s459_s24] sm:$0xf]  ;;  %v418_v56 = vsel %vm417_vm8, 0.0, %v414_v49 }
 0x2df   : >> { %v433_v50 = vmul.f32 %v432_v46, %v432_v46  ;;  %v466_v52 = vsel %vm1479_vm2, %v465_v48, 0.0 }
 0x2e0   : >> { %v467_v55 = vmul.f32 %v466_v52, %v466_v52 }
 0x2e1   : >> { %v435_v54 = vadd.f32 %v433_v50, %v414_v49  ;;  %v434_v57 = vadd.f32 %v433_v50, %v418_v56 }
 0x2e2   : >> { %v471_v60 = vsel %vm470_vm9, 0.0, %v467_v55 }
 0x2e3   : >> { %v452_v58 = vadd.f32 %v450_v53, %v435_v54  ;;  %v451_v59 = vadd.f32 %v450_v53, %v434_v57 }
 0x2e5   : >> { %v473_v61 = vadd.f32 %v467_v55, %v452_v58  ;;  %v472_v62 = vadd.f32 %v471_v60, %v451_v59 }
 0x2e7   : >> { %474 = vadd.xlane.f32.xlu0 %v473_v61 }
 0x2eb   : >> { %482 = vadd.xlane.f32.xlu0 %v472_v62 }
 0x370   : >> { %v475_v63 = vpop.xlane.xlu0 %474 }
 0x371   : >> { %v476_v0 = vrot.slane %v475_v63, 4 }
 0x373   : >> { %v477_v1 = vadd.f32 %v476_v0, %v475_v63 }
 0x374   : >> { %v483_v2 = vpop.xlane.xlu0 %482 }
 0x375   : >> { %v478_v3 = vrot.slane %v477_v1, 2  ;;  %v484_v4 = vrot.slane %v483_v2, 4 }
 0x377   : >> { %v485_v5 = vadd.f32 %v484_v4, %v483_v2  ;;  %v479_v8 = vadd.f32 %v478_v3, %v477_v1 }
 0x379   : >> { %v486_v9 = vrot.slane %v485_v5, 2  ;;  %v480_v11 = vrot.slane %v479_v8, 1 }
 0x37b   : >> { %v487_v10 = vadd.f32 %v486_v9, %v485_v5  ;;  %v481_v14 = vadd.f32 %v480_v11, %v479_v8 }
 0x37d   : >> { %v488_v12 = vrot.slane %v487_v10, 1 }
 0x37f   : >> { %v489_v13 = vadd.f32 %v488_v12, %v487_v10 }
 0x381   : >> { %1664 = vpush %v489_v13 }
 0x382   : >> { %1666 = vpush %v481_v14 }
 0x3b2   : >> { %s1665_s16 = spop %1664 }
 0x3b3   : >> { %s1667_s25 = spop %1666 }
 0x3b4   : >> { %s492_s17 = smul.f32 1e-10, %s1667_s25 }
 0x3b6   : >> { %p493_p13 = scmp.le.f32.partialorder %s1665_s16, %s492_s17 }
 0x3b8   : >> { %p495_p0 = por %p494_p12, %p493_p13 }
 0x3ba   : > { %943 = sbr.rel (!%p495_p0) target bundleno = 282 (0x11a), region = 473 }
 0x3bf PF: > { %s948_s18 = smov [#allocation20]  ;;  %v952_v6 = vmov %v1960_v6  ;;  %v955_v7 = vmov %v1962_v7  ;;  %v1008_v15 = vld [vmem:[#allocation12] sm:$0xf]  ;;  %v1016_v16 = vld [vmem:[#allocation14] sm:$0xf]  ;;  %s2268_s28 = scalar_lea.vmem [#allocation13], %s1956_s26 }
 0x3c0   : > { %v972_v6 = vmov %v1960_v6  ;;  %v975_v7 = vmov %v1962_v7  ;;  %v956_v17 = vld [vmem:[%s948_s18] sm:$0xf]  ;;  %vm959_vm10 = vcmp.eq.s32.totalorder %v955_v7, %v952_v6  ;;  %1011 = vst [vmem:[%s2268_s28] sm:$0xf] %v1008_v15  ;;  %s2269_s14 = scalar_lea.vmem [#allocation15], %s1956_s26  ;;  %v1024_v18 = vld [vmem:[#allocation16] sm:$0xf] }
 0x3c1   : > { %vm979_vm11 = vcmp.eq.s32.totalorder %v975_v7, %v972_v6  ;;  %1019 = vst [vmem:[%s2269_s14] sm:$0xf] %v1016_v16  ;;  %v960_v19 = vsel %vm959_vm10, %v956_v17, 0.0  ;;  %s968_s23 = smov [#allocation23]  ;;  %s2270_s27 = scalar_lea.vmem [#allocation17], %s1956_s26  ;;  %v1032_v20 = vld [vmem:[#allocation18] sm:$0xf] }
 0x3c2   : > { %1027 = vst [vmem:[%s2270_s27] sm:$0xf] %v1024_v18  ;;  %v961_v21 = vrot.slane %v960_v19, 4  ;;  %v976_v22 = vld [vmem:[%s968_s23] sm:$0xf]  ;;  %s2271_s30 = scalar_lea.vmem [#allocation19], %s1956_s26  ;;  %s944_s20 = sand.u32 7, %s1797_s11  }
 0x3c3   : > { %1035 = vst [vmem:[%s2271_s30] sm:$0xf] %v1032_v20  ;;  %v980_v23 = vsel %vm979_vm11, %v976_v22, 0.0  ;;  %s945_s10 = scalar_lea.vmem [#allocation8], %s944_s20  ;;  %s947_s9 = scalar_lea.vmem [#allocation10], %s944_s20 }
 0x3c4   : > { %v962_v24 = vadd.f32 %v961_v21, %v960_v19  ;;  %v981_v25 = vrot.slane %v980_v23, 4  ;;  %s949_s10 = smov %s945_s10  ;;  %s969_s9 = smov %s947_s9 }
 0x3c5   : > { %s2272_s19 = scalar_lea.vmem [#allocation9], %s1958_s29  ;;  %s2273_s21 = scalar_lea.vmem [#allocation11], %s1958_s29 }
 0x3c6   : > { %v963_v26 = vrot.slane %v962_v24, 2  ;;  %v982_v6 = vadd.f32 %v981_v25, %v980_v23  ;;  %s1063_s24 = sshrl.u32 (%p1925_p4), %s1797_s11, 3  ;;  %s2274_s25 = scalar_lea.vmem (%p1925_p4), [#allocation9], %s1958_s29 }
 0x3c7   : > { %s1064_s16 = sadd.s32 (%p1925_p4), %s1801_s12, %s1063_s24 }
 0x3c8   : > { %v964_v7 = vadd.f32 %v963_v26, %v962_v24  ;;  %v983_v27 = vrot.slane %v982_v6, 2  ;;  %s1648_s17 = sshll.u32 (%p1925_p4), %s1064_s16, 1 }
 0x3c9   : > { %s1066_s14 = scalar_lea.vmem (%p1925_p4), %s2248_s4, %s1648_s17 }
 0x3ca   : > { %v965_v28 = vrot.slane %v964_v7, 1  ;;  %v984_v29 = vadd.f32 %v983_v27, %v982_v6 }
 0x3cc   : > { %v966_v30 = vadd.f32 %v965_v28, %v964_v7  ;;  %v985_v31 = vrot.slane %v984_v29, 1 }
 0x3ce   : > { %967 = vst [vmem:[%s949_s10] sm:$0x1] %v966_v30  ;;  %v986_v32 = vadd.f32 %v985_v31, %v984_v29 }
 0x3d0   : > { %987 = vst [vmem:[%s969_s9] sm:$0x1] %v986_v32 }
 0x3d4   : > { %1062 = sbr.rel (!%p1925_p4) target bundleno = 991 (0x3df), region = 158 }
 0x3d5   : > { %v992_v33 = vld [vmem:[#allocation8] sm:$0x3] }
 0x3d6   : > { %995 = vst [vmem:[%s2272_s19] sm:$0x3] %v992_v33 }
 0x3d7   : > { %v1000_v34 = vld [vmem:[#allocation10] sm:$0x3] }
 0x3d8   : > { %1003 = vst [vmem:[%s2273_s21] sm:$0x3] %v1000_v34 }
 0x3dd   : > { %v1083_v35 = vld [vmem:[%s2274_s25] sm:$0x3] }
 0x3de   : > { %1084 = vst [vmem:[%s1066_s14] sm:$0x3] %v1083_v35 }
 0x3df PF: > { %1102 = sbr.rel (!%p1925_p4) target bundleno = 999 (0x3e7), region = 192  ;;  %s1103_s23 = sshrl.u32 (%p1925_p4), %s1797_s11, 3 }
 0x3e0   : > { %s1104_s27 = sadd.s32 (%p1925_p4), %s1801_s12, %s1103_s23  ;;  %s2275_s30 = scalar_lea.vmem (%p1925_p4), [#allocation11], %s1958_s29 }
 0x3e1   : > { %s1649_s20 = sshll.u32 (%p1925_p4), %s1104_s27, 1 }
 0x3e2   : > { %s1106_s19 = scalar_lea.vmem (%p1925_p4), %s2249_s5, %s1649_s20 }
 0x3e5   : > { %v1123_v36 = vld [vmem:[%s2275_s30] sm:$0x3] }
 0x3e6   : > { %1124 = vst [vmem:[%s1106_s19] sm:$0x3] %v1123_v36 }
 0x3e7 PF: > { %s1650_s22 = sshll.u32 %s1801_s12, 1  ;;  %s2276_s24 = scalar_lea.vmem [#allocation13], %s1956_s26 }
 0x3e8   : > { %s1141_s21 = sadd.s32 %s1797_s11, %s1650_s22  ;;  %v1160_v37 = vld [vmem:[%s2276_s24] sm:$0xf]  ;;  %s2277_s16 = scalar_lea.vmem [#allocation15], %s1956_s26 }
 0x3e9   : > { %v1197_v38 = vld [vmem:[%s2277_s16] sm:$0xf]  ;;  %s1651_s29 = sshll.u32 %s1141_s21, 2  ;;  %s2278_s25 = scalar_lea.vmem [#allocation17], %s1956_s26 }
 0x3ea   : > { %v1234_v39 = vld [vmem:[%s2278_s25] sm:$0xf]  ;;  %s2279_s17 = scalar_lea.vmem [#allocation19], %s1956_s26  ;;  %s1143_s14 = scalar_lea.vmem %s2250_s6, %s1651_s29 }
 0x3eb   : > { %v1271_v40 = vld [vmem:[%s2279_s17] sm:$0xf]  ;;  %s1180_s30 = scalar_lea.vmem %s2251_s7, %s1651_s29  ;;  %1161 = vst [vmem:[%s1143_s14] sm:$0xf] %v1160_v37  ;;  %s1217_s20 = scalar_lea.vmem %s2252_s8, %s1651_s29 }
 0x3ec   : > { %1198 = vst [vmem:[%s1180_s30] sm:$0xf] %v1197_v38  ;;  %s2280_s19 = sld [smem:[#allocation38_spill]]  ;;  %1235 = vst [vmem:[%s1217_s20] sm:$0xf] %v1234_v39 }
 0x3f2   : > { %s1254_s22 = scalar_lea.vmem %s2280_s19, %s1651_s29 }
 0x3f3   : > { %1272 = vst [vmem:[%s1254_s22] sm:$0xf] %v1271_v40 }
 0x3f4 PF: > { %s16_s15 = sadd.s32 1, %s1813_s15   ;;  %s2281_s30 = sld [smem:[#allocation33_spill]] }
 0x3f5   : > { %p13_p1 = scmp.ge.s32.totalorder %s16_s15, 6   ;;  %s2282_s10 = sld [smem:[#allocation37_spill]] }
 0x3f6   : > { %s2283_s12 = sld [smem:[#allocation34_spill]]  ;;  %s2286_s11 = smov %s1805_s13 }
 0x3f7   : > { %s2284_s26 = sld [smem:[#allocation35_spill]] }
 0x3f8   : > { %s2285_s14 = sld [smem:[#allocation36_spill]] }
 0x3f9   :  { %15 = sbr.rel (!%p13_p1) target bundleno = 6 (0x6), region = 484 }
 0x3fd   : > { %s2287_s13 = smov %s2284_s26 }

// kernel: reverse
= control target key start
LH: loop header
LB: loop body
LE: loop exit
PB: predicated region body
PF: predicated region fallthrough
CT: control target
= control target key end

     0   :  { %v2_v0 = vlaneseq  ;;  %s139_s0 = inlined_call_operand.vmem [shape: f32[2,2,8], index: 0, kind: input, shape index: {}]   ;;  %s140_s1 = inlined_call_operand.vmem [shape: f32[2,2,8], index: 1, kind: output, shape index: {}]  }
   0x2   :  { %v3_v1 = vsub.s32 7, %v2_v0 }
   0x4   :  { %4 = vset.pattern.permute.xlu0 %v3_v1 }
   0x5   :  { %v21_v2 = vld [vmem:[%s139_s0] sm:$0xf]  }
   0x6   :  { %22 = vst [vmem:[#allocation1] sm:$0xf] %v21_v2  }
   0xd   :  { %v49_v3 = vld [vmem:[#allocation1] sm:$0x3]  ;;  %v46_v4 = vld [vmem:[#allocation1 + $0x2] sm:$0x3] }
   0xe   :  { %50 = vst [vmem:[#allocation0] sm:$0x3] %v49_v3  ;;  %48 = vst [vmem:[#allocation0 + $0x8] sm:$0x3] %v46_v4 }
  0x15   :  { %v51_v5 = vld [vmem:[#allocation0] sm:$0xff]  ;;  %v57_v6 = vld [vmem:[#allocation0 + $0x8] sm:$0xff] }
  0x16   :  { %52 = vperm.xlu0 %4, %v51_v5  }
  0x1a   :  { %58 = vperm.xlu0 %4, %v57_v6  }
  0x91   :  { %v53_v7 = vpop.permute.xlu0 %52 }
  0x92   :  { %54 = vst [vmem:[#allocation2 + $0x8] sm:$0xff] %v53_v7 }
  0x95   :  { %v59_v8 = vpop.permute.xlu0 %58 }
  0x96   :  { %60 = vst [vmem:[#allocation2] sm:$0xff] %v59_v8 }
  0x99   :  { %v65_v9 = vld [vmem:[#allocation2 + $0x8] sm:$0x3] }
  0x9a   :  { %68 = vst [vmem:[#allocation3] sm:$0x3] %v65_v9 }
  0x9d   :  { %v70_v10 = vld [vmem:[#allocation2] sm:$0x3] }
  0x9e   :  { %74 = vst [vmem:[#allocation3 + $0x2] sm:$0x3] %v70_v10 }
  0xa1   :  { %v91_v11 = vld [vmem:[#allocation3] sm:$0x3] }
  0xa2   :  { %92 = vst [vmem:[%s140_s1] sm:$0x3] %v91_v11 }
  0xa5   :  { %v93_v12 = vld [vmem:[#allocation3 + $0x2] sm:$0x3] }
  0xa6   :  { %94 = vst [vmem:[%s140_s1 + $0x2] sm:$0x3] %v93_v12 }

// kernel: custom-call.16
= control target key start
LH: loop header
LB: loop body
LE: loop exit
PB: predicated region body
PF: predicated region fallthrough
CT: control target
= control target key end

     0   :  { %s710_s9 = smov 0   ;;  %s712_s10 = smov 0   ;;  %s882_s0 = inlined_call_operand.vmem [shape: f32[2,2,8,8], index: 0, kind: input, shape index: {}]   ;;  %s883_s1 = inlined_call_operand.vmem [shape: f32[2,2,8,8], index: 1, kind: output, shape index: {0}]   ;;  %s884_s2 = inlined_call_operand.vmem [shape: f32[2,2,8], index: 2, kind: output, shape index: {1}]  }
   0x1   :  { %s714_s11 = smov 0   ;;  %s716_s12 = smov 0  }
   0x2   :  { %s718_s13 = smov 0   ;;  %s720_s14 = smov 0  }
   0x3   :  { %s722_s15 = smov 0  }
   0x4 LB: > { %s31_s16 = sadd.s32 1, %s679_s13  ;;  %s35_s17 = sadd.s32 1, %s683_s14  ;;  %s687_s15 = sphi %s722_s15, %s9_s15   ;;  %s683_s14 = sphi %s720_s14, %s893_s14   ;;  %s679_s13 = sphi %s718_s13, %s892_s13   ;;  %s675_s12 = sphi %s716_s12, %s891_s12   ;;  %s671_s11 = sphi %s714_s11, %s890_s11   ;;  %s667_s10 = sphi %s712_s10, %s889_s10   ;;  %s663_s9 = sphi %s710_s9, %s888_s9  }
   0x5   : > { %p33_p0 = scmp.ge.s32.totalorder %s31_s16, 2  ;;  %s40_s18 = ssub.s32 0, %s679_s13 }
   0x6   : > { %s533_s19 = smin.u32 %s679_s13, %s40_s18  ;;  %s531_s22 = sadd.s32 4294967295, %s687_s15  }
   0x7   : > { %s895_s16 = smov (%p33_p0, %s31_s16), 0  ;;  %s897_s17 = smov (!%p33_p0, %s35_s17), %s683_s14 }
   0x8   : > { %p37_p1 = scmp.ge.s32.totalorder %s897_s17, 2  ;;  %s42_s20 = sshrl.u32 %s533_s19, 3 }
   0x9   : > { %s46_s21 = ssub.s32 0, %s895_s16  ;;  %p66_p2 = scmp.ne.s32.totalorder %s667_s10, %s663_s9 }
   0xa   : > { %s899_s17 = smov (%p37_p1, %s897_s17), 0  ;;  %s534_s23 = smin.u32 %s46_s21, %s895_s16 }
   0xb   : > { %s48_s24 = sshrl.u32 %s534_s23, 3  ;;  %s51_s25 = ssub.s32 %s683_s14, %s899_s17 }
   0xc   : > { %p67_p3 = scmp.eq.s32.totalorder %s531_s22, 3  ;;  %s52_s26 = ssub.s32 %s42_s20, %s48_s24 }
   0xd   : > { %s56_s27 = sadd.s32 1, %s667_s10  ;;  %s53_s28 = sor.u32 %s52_s26, %s51_s25 }
   0xe   : > { %p762_p4 = por %p67_p3, %p66_p2  ;;  %p54_p5 = scmp.eq.s32.totalorder %s53_s28, 0 }
   0xf   : > { %p536_p6 = scmp.ge.s32.totalorder %s687_s15, 4 }
  0x10   : > { %s767_s30 = scalar_select %p54_p5, %s667_s10, %s56_s27  }
  0x11   : > { %89 = sbr.rel (%p536_p6) target bundleno = 24 (0x18), region = 16  ;;  %s91_s3 = sand.u32 (!%p536_p6), 1, %s687_s15  }
  0x12   : > { %s538_s4 = sshll.u32 (!%p536_p6), %s683_s14, 1  ;;  %s537_s5 = sshll.u32 (!%p536_p6), %s91_s3, 3 }
  0x13   : > { %s97_s6 = sadd.s32 (!%p536_p6), %s679_s13, %s538_s4  ;;  %s93_s20 = scalar_lea.vmem (!%p536_p6), [#allocation0], %s537_s5 }
  0x14   : > { %s539_s7 = sshll.u32 (!%p536_p6), %s97_s6, 3 }
  0x15   : > { %s99_s19 = scalar_lea.vmem (!%p536_p6), %s882_s0, %s539_s7 }
  0x16   : > { %v128_v0 = vld [vmem:[%s99_s19] sm:$0xff] }
  0x17   : > { %129 = vst [vmem:[%s93_s20] sm:$0xff] %v128_v0 }
  0x18 PF: > { %p540_p7 = scmp.ge.s32.totalorder %s687_s15, 1  ;;  %p134_p8 = scmp.lt.s32.totalorder %s687_s15, 5 }
  0x1a   : > { %p135_p9 = pnand %p540_p7, %p134_p8 }
  0x1c   : > { %138 = sbr.rel (%p135_p9) target bundleno = 342 (0x156), region = 54 }
  0x21   : > { %s141_s21 = sand.u32 1, %s531_s22   ;;  %s155_s23 = sand.u32 1, %s663_s9   ;;  %v693_v2 = vmov 0.0  }
  0x22   : > { %s541_s24 = sshll.u32 %s141_s21, 3  ;;  %s779_s25 = sshll.u32 %s155_s23, 1 }
  0x23   : > { %s164_s26 = sand.u32 7, %s671_s11   ;;  %s143_s27 = scalar_lea.vmem [#allocation0], %s541_s24 }
  0x24   : > { %v166_v1 = vld [vmem:[%s143_s27] sm:$0xff]  ;;  %s782_s28 = scalar_lea.vmem [#allocation1], %s541_s24  ;;  %s785_s3 = scalar_lea.vmem [#allocation2], %s164_s26 }
  0x25   : > { %167 = vst [vmem:[%s782_s28] sm:$0xff] %v166_v1  ;;  %168 = vst [vmem:[%s785_s3] sm:$0x1] %v693_v2  ;;  %s157_s22 = scalar_lea.vmem [#allocation3], %s779_s25  ;;  %s789_s4 = smov 0  }
  0x26 LB: >> { %v176_v3 = vlaneseq  ;;  %v798_v6 = vstv %s691_s4  ;;  %s203_s9 = scalar_lea.vmem %s782_s28, %s691_s4 [#allocation1]  ;;  %s261_s5 = scalar_lea.vmem [#allocation4], %s691_s4  ;;  %v694_v59 = vmov 1.0   ;;  %s691_s4 = sphi %s789_s4, %s174_s4  }
  0x27   : >> { %s278_s6 = smov [#allocation4] }
  0x28   : >> { %v795_v5 = vshrl.u32 %v176_v3, 7  ;;  %v255_v48 = vand.u32 127, %v176_v3 }
  0x2a   : >> { %vm180_vm0 = vcmp.gt.s32.totalorder %v795_v5, %v798_v6  ;;  %v242_v5 = vmov %v795_v5  ;;  %vm813_vm10 = vcmp.eq.s32.totalorder %v255_v48, %v798_v6  ;;  %vm307_vm13 = vcmp.gt.s32.totalorder %v255_v48, %v798_v6 }
  0x2b   : >> { %vm246_vm7 = vcmp.gt.s32.totalorder %v242_v5, %v798_v6  ;;  %vm247_vm8 = vcmp.lt.s32.totalorder %v242_v5, 8  ;;  %v281_v5 = vmov %v795_v5 }
  0x2c   : >> { %v175_v4 = vld [vmem:[%s782_s28] sm:$0xff]  ;;  %v204_v15 = vld [vmem:[%s203_s9] ss:$0 sm:$0xff]  ;;  %s239_s28 = smov %s782_s28  ;;  %vm248_vm9 = vmand %vm246_vm7, %vm247_vm8  ;;  %vm286_vm11 = vcmp.lt.s32.totalorder %v281_v5, 8  ;;  %v298_v5 = vmov %v795_v5 }
  0x2d   : >> { %v183_v7 = vsel %vm180_vm0, %v175_v4, 0.0  ;;  %v205_v16 = vand.u32 2147483647, %v204_v15  ;;  %vm230_vm6 = vcmp.lt.f32.partialorder %v204_v15, 0.0  ;;  %v243_v45 = vld [vmem:[%s239_s28] sm:$0xff]  ;;  %s277_s28 = smov %s782_s28  ;;  %vm315_vm12 = vcmp.ge.s32.totalorder %v298_v5, %v798_v6 }
  0x2e   : >> { %v184_v8 = vmul.f32 %v183_v7, %v183_v7  ;;  %v249_v49 = vsel %vm248_vm9, %v243_v45, 0.0  ;;  %v274_v60 = vld [vmem:[%s785_s3] ss:$0 sm:$0xff]  ;;  %vm316_vm14 = vmand %vm813_vm10, %vm315_vm12 }
  0x2f   : >> { %v206_v21 = vmax.f32 %v205_v16, 0.0  ;;  %v284_v63 = vld [vmem:[%s277_s28] sm:$0xff]  ;;  %s294_s28 = smov %s277_s28 }
  0x30   : >> { %v185_v9 = vrot.slane %v184_v8, 4  ;;  %s319_s7 = scalar_lea.vmem %s294_s28, %s691_s4  ;;  %s174_s4 = sadd.s32 1, %s691_s4  }
  0x31   : >> { %p171_p10 = scmp.ge.s32.totalorder %s174_s4, 8  }
  0x32   : >> { %v186_v10 = vadd.f32 %v185_v9, %v184_v8  ;;  %s547_s8 = sshll.u32 (%p171_p10), %s675_s12, 1 }
  0x33   : > { %s346_s18 = sadd.s32 (%p171_p10), %s671_s11, %s547_s8 }
  0x34   : >> { %v187_v11 = vrot.slane %v186_v10, 2  ;;  %s548_s19 = sshll.u32 (%p171_p10), %s346_s18, 3 }
  0x35   : > { %s348_s23 = scalar_lea.vmem (%p171_p10), %s883_s1, %s548_s19 }
  0x36   : >> { %v188_v12 = vadd.f32 %v187_v11, %v186_v10 }
  0x38   : >> { %v189_v13 = vrot.slane %v188_v12, 1 }
  0x3a   : >> { %v190_v14 = vadd.f32 %v189_v13, %v188_v12  ;;  %v305_v13 = vld [vmem:[%s294_s28] sm:$0xff] }
  0x3c   : >> { %619 = vrsqrt.f32 %v190_v14  ;;  %vm193_vm1 = vcmp.eq.f32.partialorder %v190_v14, inf  ;;  %v196_v18 = vand.u32 2147483648, %v190_v14  ;;  %vm195_vm2 = vcmp.eq.f32.partialorder %v190_v14, 0.0 }
  0x49   : >> { %v620_v17 = vpop.eup %619 }
  0x4a   : >> { %v192_v19 = vmul.f32 %v620_v17, %v190_v14 }
  0x4c   : >> { %v194_v20 = vsel %vm193_vm1, %v190_v14, %v192_v19 }
  0x4d   : >> { %v197_v22 = vsel %vm195_vm2, %v196_v18, %v194_v20 }
  0x4e   : >> { %v207_v23 = vand.u32 2147483647, %v197_v22 }
  0x50   : >> { %v208_v24 = vmax.f32 %v206_v21, %v207_v23 }
  0x52   : >> { %621 = vrcp.f32 %v208_v24  ;;  %vm220_vm5 = vcmp.eq.f32.partialorder %v208_v24, 0.0 }
  0x5f   : >> { %v622_v25 = vpop.eup %621 }
  0x60   : >> { %v210_v26 = vmul.f32 %v622_v25, %v205_v16  ;;  %v213_v27 = vmul.f32 0.0, %v622_v25  ;;  %v217_v28 = vmul.f32 %v622_v25, %v207_v23 }
  0x62   : >> { %v211_v29 = vmul.f32 %v210_v26, %v210_v26  ;;  %v214_v30 = vmul.f32 %v213_v27, %v213_v27  ;;  %v218_v31 = vmul.f32 %v217_v28, %v217_v28 }
  0x64   : >> { %v215_v32 = vadd.f32 %v214_v30, %v211_v29 }
  0x66   : >> { %v219_v33 = vadd.f32 %v218_v31, %v215_v32 }
  0x68   : >> { %623 = vrsqrt.f32 %v219_v33  ;;  %vm223_vm3 = vcmp.eq.f32.partialorder %v219_v33, inf  ;;  %v226_v35 = vand.u32 2147483648, %v219_v33  ;;  %vm225_vm4 = vcmp.eq.f32.partialorder %v219_v33, 0.0 }
  0x75   : >> { %v624_v34 = vpop.eup %623 }
  0x76   : >> { %v222_v36 = vmul.f32 %v624_v34, %v219_v33 }
  0x78   : >> { %v224_v37 = vsel %vm223_vm3, %v219_v33, %v222_v36 }
  0x79   : >> { %v227_v38 = vsel %vm225_vm4, %v226_v35, %v224_v37 }
  0x7a   : >> { %v228_v39 = vmul.f32 %v227_v38, %v208_v24 }
  0x7c   : >> { %v229_v40 = vsel %vm220_vm5, 0.0, %v228_v39 }
  0x7d   : >> { %v231_v41 = vxor.u32 2147483648, %v229_v40 }
  0x7f   : >> { %v232_v42 = vsel %vm230_vm6, %v229_v40, %v231_v41 }
  0x80   : >> { %v806_v43 = vsel %vm195_vm2, %v204_v15, %v232_v42  ;;  %625 = vrcp.f32 %v232_v42  ;;  %v233_v46 = vsub.f32 %v232_v42, %v204_v15 }
  0x81   : >> { %v238_v44 = vsub.f32 %v204_v15, %v806_v43 }
  0x83   : >> { %627 = vrcp.f32 %v238_v44 }
  0x8d   : >> { %v626_v47 = vpop.eup %625 }
  0x8e   : >> { %v235_v50 = vmul.f32 %v626_v47, %v233_v46 }
  0x90   : >> { %v628_v51 = vpop.eup %627  ;;  %v237_v55 = vsel %vm195_vm2, 0.0, %v235_v50 }
  0x91   : >> { %v251_v52 = vmul.f32 %v628_v51, %v249_v49  ;;  %v267_v57 = vsel %vm813_vm10, %v237_v55, 0.0 }
  0x93   : >> { %v252_v54 = vsel %vm195_vm2, 0.0, %v251_v52 }
  0x94   : >> { %v257_v56 = vsel %vm813_vm10, %v252_v54, 0.0 }
  0x95   : >> { %258 = vadd.xlane.f32.xlu0 %v257_v56 }
  0x99   : >> { %268 = vadd.xlane.f32.xlu0 %v267_v57 }
 0x11e   : >> { %v259_v58 = vpop.xlane.xlu0 %258 }
 0x11f   : >> { %260 = vst [vmem:[#allocation4] sm:$0xff] %v259_v58 }
 0x120   : >> { %262 = vst [vmem:[%s261_s5] sm:$0x1] %v694_v59 }
 0x122   : >> { %v269_v61 = vpop.xlane.xlu0 %268 }
 0x123   : >> { %v275_v62 = vsel %vm813_vm10, %v269_v61, %v274_v60 }
 0x124   : >> { %276 = vst [vmem:[%s785_s3] sm:$0x1] %v275_v62 }
 0x127   : >> { %v283_v0 = vld [vmem:[%s278_s6] sm:$0xff]  ;;  %s295_s6 = smov %s278_s6 }
 0x128   : >> { %v285_v1 = vmul.f32 %v284_v63, %v283_v0  ;;  %v303_v12 = vld [vmem:[%s295_s6] sm:$0xff] }
 0x12a   : >> { %v287_v2 = vsel %vm286_vm11, %v285_v1, 0.0 }
 0x12b   : >> { %v288_v3 = vrot.slane %v287_v2, 4  ;;  %v331_v5 = vld [vmem:[#allocation2] sm:$0x3] (%p171_p10) }
 0x12c   : > { %334 = vst [vmem:[%s157_s22] sm:$0x3] (%p171_p10), %v331_v5 }
 0x12d   : >> { %v289_v4 = vadd.f32 %v288_v3, %v287_v2 }
 0x12f   : >> { %v290_v7 = vrot.slane %v289_v4, 2 }
 0x131   : >> { %v291_v8 = vadd.f32 %v290_v7, %v289_v4 }
 0x133   : >> { %v292_v9 = vrot.slane %v291_v8, 1 }
 0x135   : >> { %v293_v10 = vadd.f32 %v292_v9, %v291_v8 }
 0x137   : >> { %v299_v11 = vmul.f32 %v293_v10, %v269_v61 }
 0x139   : >> { %v304_v14 = vmul.f32 %v303_v12, %v299_v11 }
 0x13b   : >> { %v308_v15 = vsub.f32 %v305_v13, %v304_v14 }
 0x13d   : >> { %v309_v16 = vsel %vm307_vm13, %v308_v15, %v305_v13 }
 0x13e   : >> { %v317_v17 = vsel %vm316_vm14, %v303_v12, %v309_v16 }
 0x13f   : >> { %318 = vst [vmem:[%s294_s28] sm:$0xff] %v317_v17 }
 0x144   : > { %173 = sbr.rel (!%p171_p10) target bundleno = 38 (0x26), region = 175 }
 0x146   : >> { %v320_v18 = vld [vmem:[%s319_s7] ss:$0 sm:$0xff] }
 0x147   : >> { %v325_v19 = vsel %vm813_vm10, %v806_v43, %v320_v18 }
 0x148   : >> { %326 = vst [vmem:[%s319_s7] sm:$0x1] %v325_v19 }
 0x149   : > { %p385_p11 = scmp.lt.s32.totalorder (%p762_p4), %s671_s11, 0  ;;  %s386_s24 = ssub.s32 (%p762_p4), 0, %s671_s11  ;;  %v410_v20 = vld [vmem:[%s157_s22] sm:$0x3] (%p762_p4) }
 0x14a   : > { %s549_s26 = smin.u32 (%p762_p4), %s671_s11, %s386_s24 }
 0x14b   : > { %s388_s27 = sshrl.u32 (%p762_p4), %s549_s26, 3 }
 0x14c   : > { %384 = sbr.rel (!%p762_p4) target bundleno = 342 (0x156), region = 99  ;;  %s389_s3 = ssub.s32 (%p762_p4), 0, %s388_s27 }
 0x14f   : > { %v377_v6 = vld [vmem:[%s782_s28] sm:$0xff] }
 0x150   : > { %378 = vst [vmem:[%s348_s23] sm:$0xff] %v377_v6 }
 0x151   : > { %s901_s3 = smov (!%p385_p11, %s389_s3), %s388_s27 }
 0x152   : > { %s391_s28 = sadd.s32 %s675_s12, %s901_s3 }
 0x153   : > { %s550_s4 = sshll.u32 %s391_s28, 1 }
 0x154   : > { %s393_s29 = scalar_lea.vmem %s884_s2, %s550_s4 }
 0x155   : > { %411 = vst [vmem:[%s393_s29] sm:$0x3] %v410_v20 }
 0x156 PF: > { %s9_s15 = sadd.s32 1, %s687_s15   ;;  %s888_s9 = smov %s667_s10 }
 0x157   : > { %p6_p12 = scmp.ge.s32.totalorder %s9_s15, 6   ;;  %s889_s10 = smov %s767_s30 }
 0x158   : > { %s890_s11 = smov %s679_s13  ;;  %s891_s12 = smov %s683_s14 }
 0x159   : > { %s892_s13 = smov %s895_s16  ;;  %s893_s14 = smov %s899_s17 }
 0x15a   :  { %8 = sbr.rel (!%p6_p12) target bundleno = 4 (0x4), region = 186 }

// kernel: sdfem_forward.4
= control target key start
LH: loop header
LB: loop body
LE: loop exit
PB: predicated region body
PF: predicated region fallthrough
CT: control target
= control target key end

     0   :  { %s353_s9 = smov 0   ;;  %s355_s10 = smov 0   ;;  %s389_s0 = inlined_call_operand.vmem [shape: bf16[2,8,128], index: 0, kind: input, shape index: {}]   ;;  %s390_s1 = inlined_call_operand.vmem [shape: f32[8,8], index: 1, kind: input, shape index: {}]   ;;  %s391_s2 = inlined_call_operand.vmem [shape: f32[2,1,8,1], index: 2, kind: output, shape index: {}]  }
   0x1   :  { %s357_s11 = smov 0  }
   0x2 LB: > { %s24_s12 = sadd.s32 1, %s329_s10  ;;  %p276_p0 = scmp.ge.s32.totalorder %s333_s11, 1  ;;  %s333_s11 = sphi %s357_s11, %s12_s11   ;;  %s329_s10 = sphi %s355_s10, %s393_s10   ;;  %s325_s9 = sphi %s353_s9, %s392_s9  }
   0x3   : > { %p26_p1 = scmp.ge.s32.totalorder %s24_s12, 2  ;;  %p130_p2 = scmp.lt.s32.totalorder %s333_s11, 3 }
   0x5   : > { %s395_s12 = smov (%p26_p1, %s24_s12), 0  ;;  %p131_p3 = pnand %p276_p0, %p130_p2 }
   0x6   : > { %p156_p4 = scmp.lt.s32.totalorder (!%p131_p3), %s325_s9, 1 }
   0x7   : > { %134 = sbr.rel (%p131_p3) target bundleno = 288 (0x120), region = 28 }
   0xc   : > { %v172_v0 = vld [vmem:[%s390_s1] sm:$0xff]  ;;  %v335_v1 = vmov 0   ;;  %v336_v2 = vmov 1   ;;  %s397_s9 = smov (!%p156_p4, %s325_s9), 1  ;;  %v185_v3 = vlaneseq  ;;  %v337_v11 = vmov 0.0  }
   0xd   : > { %309 = vset.pattern.permute.xlu0 %v335_v1  ;;  %s277_s15 = sshll.u32 %s397_s9, 2  ;;  %s278_s19 = sshll.u32 %s397_s9, 3  ;;  %vm196_vm1 = vcmask 7168  }
   0xe   : > { %175 = vperm.xlu0 %309, %v172_v0   ;;  %s162_s18 = scalar_lea.vmem %s389_s0, %s277_s15  ;;  %v186_v7 = vand.u32 127, %v185_v3  ;;  %s169_s22 = scalar_lea.vmem %s391_s2, %s278_s19 }
   0xf   : > { %v170_v4 = vld [vmem:[%s162_s18] sm:$0xf] }
  0x10   : > { %v171_v6 = vunpack.c.l.bf16 %v170_v4  ;;  %vm190_vm0 = vcmp.lt.s32.totalorder %v186_v7, 64 }
  0x11   : > { %v279_v12 = vsel %vm190_vm0, 1.0, %v337_v11 }
  0x12   : > { %310 = vset.pattern.permute.xlu0 %v336_v2 }
  0x13   : > { %180 = vperm.xlu0 %310, %v172_v0  }
  0x89   : > { %v176_v5 = vpop.permute.xlu0 %175 }
  0x8a   : > { %v178_v8 = vmul.f32 %v176_v5, %v171_v6 }
  0x8e   : > { %v181_v9 = vpop.permute.xlu0 %180 }
  0x8f   : > { %v183_v10 = vadd.f32 %v181_v9, %v178_v8 }
  0x91   : > { %v184_v13 = vmax.f32 %v183_v10, 0.0 }
  0x93   : > { %v193_v14 = vmul.f32 %v279_v12, %v184_v13 }
  0x95   : > { %194 = vadd.xlane.f32.xlu1 %v193_v14 }
 0x11e   : > { %v195_v15 = vpop.xlane.xlu1 %194 }
 0x11f   : > { %197 = vst.msk [vmem:[%s169_s22] sm:$0xff] %vm196_vm1, %v195_v15 }
 0x120 PF: > { %s12_s11 = sadd.s32 1, %s333_s11   ;;  %s392_s9 = smov %s329_s10 }
 0x121   : > { %p9_p5 = scmp.ge.s32.totalorder %s12_s11, 4   ;;  %s393_s10 = smov %s395_s12 }
 0x123   :  { %11 = sbr.rel (!%p9_p5) target bundleno = 2 (0x2), region = 58 }

// kernel: sdfem_forward.3
= control target key start
LH: loop header
LB: loop body
LE: loop exit
PB: predicated region body
PF: predicated region fallthrough
CT: control target
= control target key end

     0   :  { %s982_s15 = smov 0   ;;  %s984_s16 = smov 0   ;;  %s1095_s0 = inlined_call_operand.vmem [shape: bf16[2,48,256], index: 0, kind: input, shape index: {}, may-alias: {0,1}]   ;;  %s1096_s1 = inlined_call_operand.vmem [shape: bf16[2,48,256], index: 1, kind: input, shape index: {}, may-alias: {0,1}]   ;;  %s1097_s2 = inlined_call_operand.vmem [shape: bf16[3,8,48], index: 2, kind: input, shape index: {}]   ;;  %s1098_s3 = inlined_call_operand.vmem [shape: bf16[2,8,128], index: 3, kind: output, shape index: {0}]   ;;  %s1099_s4 = inlined_call_operand.vmem [shape: f32[2,1,8,8], index: 4, kind: output, shape index: {1}]  }
   0x1   :  { %s986_s17 = smov 0   ;;  %s988_s18 = smov 0  }
   0x2   :  { %s990_s19 = smov 0  }
   0x3 LB: > { %s27_s20 = sadd.s32 1, %s947_s18  ;;  %p43_p1 = scmp.ne.s32.totalorder %s939_s16, %s935_s15  ;;  %s951_s19 = sphi %s990_s19, %s15_s19   ;;  %s947_s18 = sphi %s988_s18, %s1104_s18   ;;  %s943_s17 = sphi %s986_s17, %s1103_s17   ;;  %s939_s16 = sphi %s984_s16, %s1102_s16   ;;  %s935_s15 = sphi %s982_s15, %s1101_s15  }
   0x4   : > { %p29_p0 = scmp.ge.s32.totalorder %s27_s20, 2  ;;  %p44_p2 = scmp.eq.s32.totalorder %s951_s19, 0 }
   0x5   : > { %s36_s23 = sadd.s32 1, %s939_s16  ;;  %p791_p5 = scmp.ge.s32.totalorder %s951_s19, 2 }
   0x6   : > { %s1106_s20 = smov (%p29_p0, %s27_s20), 0  ;;  %p1013_p3 = por %p44_p2, %p43_p1 }
   0x7   : > { %s31_s22 = ssub.s32 %s947_s18, %s1106_s20  ;;  %179 = sbr.rel (%p791_p5) target bundleno = 30 (0x1e), region = 20 }
   0x8   : > { %p34_p4 = scmp.eq.s32.totalorder %s31_s22, 0 }
   0xa   : > { %s1021_s24 = scalar_select %p34_p4, %s939_s16, %s36_s23  }
   0xc   : > { %182 = sbr.rel (!%p1013_p3) target bundleno = 21 (0x15), region = 24  ;;  %s184_s25 = sand.u32 (%p1013_p3), 1, %s939_s16  }
   0xd   : > { %s860_s26 = smul.u32 (%p1013_p3), 48, %s947_s18 }
   0xe   : > { %s859_s27 = smul.u32 (%p1013_p3), 24, %s184_s25 }
   0xf   : > { %s190_s30 = scalar_lea.vmem (%p1013_p3), %s1095_s0, %s860_s26 }
  0x10   : > { %v207_v0 = vld [vmem:[%s190_s30] sm:$0xf] (%p1013_p3)  ;;  %v209_v1 = vld [vmem:[%s190_s30 + $0x8] sm:$0xf] (%p1013_p3)  ;;  %s186_s5 = scalar_lea.vmem (%p1013_p3), [#allocation2], %s859_s27 }
  0x11   : > { %208 = vst [vmem:[%s186_s5] sm:$0xf] %v207_v0  ;;  %210 = vst [vmem:[%s186_s5 + $0x4] sm:$0xf] %v209_v1  ;;  %v211_v2 = vld [vmem:[%s190_s30 + $0x10] sm:$0xf] }
  0x12   : > { %v213_v3 = vld [vmem:[%s190_s30 + $0x18] sm:$0xf]  ;;  %v215_v4 = vld [vmem:[%s190_s30 + $0x20] sm:$0xf]  ;;  %212 = vst [vmem:[%s186_s5 + $0x8] sm:$0xf] %v211_v2 }
  0x13   : > { %214 = vst [vmem:[%s186_s5 + $0xc] sm:$0xf] %v213_v3  ;;  %216 = vst [vmem:[%s186_s5 + $0x10] sm:$0xf] %v215_v4  ;;  %v217_v5 = vld [vmem:[%s190_s30 + $0x28] sm:$0xf] }
  0x14   : > { %218 = vst [vmem:[%s186_s5 + $0x14] sm:$0xf] %v217_v5 }
  0x15 PF: > { %254 = sbr.rel (!%p1013_p3) target bundleno = 30 (0x1e), region = 65  ;;  %s256_s6 = sand.u32 (%p1013_p3), 1, %s939_s16  }
  0x16   : > { %s793_s7 = smul.u32 (%p1013_p3), 48, %s947_s18 }
  0x17   : > { %s861_s8 = smul.u32 (%p1013_p3), 24, %s256_s6 }
  0x18   : > { %s703_s11 = scalar_lea.vmem (%p1013_p3), %s1096_s1, %s793_s7 }
  0x19   : > { %v794_v6 = vld [vmem:[%s703_s11 + $0x4] sm:$0xf] (%p1013_p3)  ;;  %v795_v7 = vld [vmem:[%s703_s11 + $0xc] sm:$0xf] (%p1013_p3)  ;;  %s258_s12 = scalar_lea.vmem (%p1013_p3), [#allocation3], %s861_s8 }
  0x1a   : > { %281 = vst [vmem:[%s258_s12] sm:$0xf] %v794_v6  ;;  %283 = vst [vmem:[%s258_s12 + $0x4] sm:$0xf] %v795_v7  ;;  %v796_v8 = vld [vmem:[%s703_s11 + $0x14] sm:$0xf] }
  0x1b   : > { %v797_v9 = vld [vmem:[%s703_s11 + $0x1c] sm:$0xf]  ;;  %v798_v10 = vld [vmem:[%s703_s11 + $0x24] sm:$0xf]  ;;  %285 = vst [vmem:[%s258_s12 + $0x8] sm:$0xf] %v796_v8 }
  0x1c   : > { %287 = vst [vmem:[%s258_s12 + $0xc] sm:$0xf] %v797_v9  ;;  %289 = vst [vmem:[%s258_s12 + $0x10] sm:$0xf] %v798_v10  ;;  %v799_v11 = vld [vmem:[%s703_s11 + $0x2c] sm:$0xf] }
  0x1d   : > { %291 = vst [vmem:[%s258_s12 + $0x14] sm:$0xf] %v799_v11 }
  0x1e PF: > { %p800_p6 = scmp.ge.s32.totalorder %s951_s19, 1  ;;  %p326_p7 = scmp.lt.s32.totalorder %s951_s19, 3 }
  0x20   : > { %p327_p8 = pnand %p800_p6, %p326_p7 }
  0x21   : > { %s333_s13 = sand.u32 (!%p327_p8), 1, %s935_s15   ;;  %s954_s22 = smov (!%p327_p8), 120  }
  0x22   : > { %330 = sbr.rel (%p327_p8) target bundleno = 524 (0x20c), region = 106  ;;  %s956_s26 = smov (!%p327_p8), 112  }
  0x23   : > { %s862_s14 = smul.u32 (!%p327_p8), 24, %s333_s13  ;;  %p379_p9 = scmp.lt.s32.totalorder (!%p327_p8), %s943_s17, 1 }
  0x25   : > { %s335_s21 = scalar_lea.vmem (!%p327_p8), [#allocation2], %s862_s14  ;;  %s342_s23 = scalar_lea.vmem (!%p327_p8), [#allocation3], %s862_s14 }
  0x27   : > { %v953_v12 = vmov 0.0   ;;  %v907_v13 = vld [vmem:[%s335_s21 + $0x10] sm:$0xff]   ;;  %v908_v14 = vld [vmem:[%s335_s21 + $0x8] sm:$0xff]   ;;  %v909_v15 = vld [vmem:[%s342_s23 + $0x10] sm:$0xff]   ;;  %vm955_vm0 = vmmov 0   ;;  %vm464_vm1 = vcmask 392192   ;;  %v625_v45 = vlaneseq }
  0x28   : > { %829 = vmatprep.subr.bf16.mxu0 %v953_v12  ;;  %839 = vmatprep.subr.bf16.mxu1 %v953_v12  ;;  %v910_v16 = vld [vmem:[%s342_s23 + $0x8] sm:$0xff]   ;;  %v912_v17 = vld [vmem:[%s335_s21] sm:$0xff]   ;;  %v911_v18 = vld [vmem:[%s342_s23] sm:$0xff]   ;;  %vm451_vm2 = vcmask 982016   ;;  %vm568_vm3 = vcmask 916480   ;;  %s1108_s17 = smov (!%p379_p9, %s943_s17), 1 }
  0x29   : > { %428 = vrot.lane.b32.xlu0 %v907_v13, %s954_s22  ;;  %840 = vmatpush3.bf16.msra.mxu1 %v907_v13  ;;  %v406_v19 = vld [vmem:[%s1097_s2] sm:$0xf]  ;;  %v803_v31 = vld [vmem:[%s1097_s2 + $0x4] sm:$0xf]  ;;  %v812_v39 = vld [vmem:[%s1097_s2 + $0x8] sm:$0xf] }
  0x2a   : > { %426 = vrot.lane.b32.xlu1 %v908_v14, %s954_s22  ;;  %841 = vmatprep.subr.bf16.mxu1 %v953_v12  ;;  %v626_v48 = vand.u32 127, %v625_v45  ;;  %s801_s5 = sshll.u32 %s1108_s17, 2  ;;  %s802_s9 = sshll.u32 %s1108_s17, 3  ;;  %vm639_vm5 = vcmask 7168   ;;  %vm641_vm6 = vcmask 15360   ;;  %vm643_vm7 = vcmask 64512  }
  0x2b   : > { %835 = vmatprep.mubr.msk.bf16.mxu0 %vm955_vm0, %v953_v12  ;;  %845 = vmatprep.mubr.msk.bf16.mxu1 %vm955_vm0, %v953_v12  ;;  %s385_s8 = scalar_lea.vmem %s1098_s3, %s801_s5  ;;  %s392_s12 = scalar_lea.vmem %s1099_s4, %s802_s9 }
  0x2c   : > { %vm630_vm4 = vcmp.lt.s32.totalorder %v626_v48, 64 }
  0x2d   : > { %449 = vrot.lane.b32.xlu0 %v909_v15, %s954_s22  ;;  %842 = vmatpush3.bf16.msra.mxu1 %v908_v14  ;;  %v814_v52 = vsel %vm630_vm4, 1.0, %v953_v12 }
  0x2e   : > { %447 = vrot.lane.b32.xlu1 %v910_v16, %s954_s22  ;;  %843 = vmatprep.subr.bf16.mxu1 %v953_v12 }
  0x31   : > { %424 = vrot.lane.b32.xlu0 %v912_v17, %s954_s22  ;;  %844 = vmatpush3.bf16.msra.mxu1 %v912_v17 }
  0x32   : > { %445 = vrot.lane.b32.xlu1 %v911_v18, %s954_s22 }
  0x34   : > { %846 = vmatmul.mubr.msk.bf16.vlgmr.msra.gmra.mxu1 %vm464_vm1, %v406_v19 }
  0x35   : > { %560 = vrot.lane.b32.xlu0 %v907_v13, %s956_s26 }
  0x36   : > { %566 = vrot.lane.b32.xlu1 %v909_v15, %s956_s26 }
  0x39   : > { %558 = vrot.lane.b32.xlu0 %v908_v14, %s956_s26 }
  0x3a   : > { %564 = vrot.lane.b32.xlu1 %v910_v16, %s956_s26 }
  0x3d   : > { %556 = vrot.lane.b32.xlu0 %v912_v17, %s956_s26 }
  0x3e   : > { %562 = vrot.lane.b32.xlu1 %v911_v18, %s956_s26 }
  0x9b   : > { %v429_v20 = vpop.permute.xlu0 %428 }
  0x9c   : > { %v427_v21 = vpop.permute.xlu1 %426 }
  0x9f   : > { %v450_v22 = vpop.permute.xlu0 %449 }
  0xa0   : > { %v448_v23 = vpop.permute.xlu1 %447  ;;  %v462_v24 = vsel %vm451_vm2, %v429_v20, %v450_v22 }
  0xa1   : > { %830 = vmatpush3.bf16.msra.mxu0 %v462_v24  ;;  %v458_v26 = vsel %vm451_vm2, %v427_v21, %v448_v23 }
  0xa2   : > { %831 = vmatprep.subr.bf16.mxu0 %v953_v12 }
  0xa3   : > { %v425_v25 = vpop.permute.xlu0 %424 }
  0xa4   : > { %v446_v27 = vpop.permute.xlu1 %445 }
  0xa5   : > { %832 = vmatpush3.bf16.msra.mxu0 %v458_v26  ;;  %v454_v28 = vsel %vm451_vm2, %v425_v25, %v446_v27 }
  0xa6   : > { %833 = vmatprep.subr.bf16.mxu0 %v953_v12 }
  0xa7   : > { %v561_v29 = vpop.permute.xlu0 %560 }
  0xa8   : > { %v567_v30 = vpop.permute.xlu1 %566 }
  0xa9   : > { %834 = vmatpush3.bf16.msra.mxu0 %v454_v28  ;;  %v579_v32 = vsel %vm568_vm3, %v561_v29, %v567_v30 }
  0xaa   : > { %849 = vmatprep.subr.bf16.mxu0 %v953_v12 }
  0xab   : > { %v559_v33 = vpop.permute.xlu0 %558 }
  0xac   : > { %836 = vmatmul.mubr.msk.bf16.vlgmr.msra.gmra.mxu0 %vm464_vm1, %v803_v31  ;;  %v565_v34 = vpop.permute.xlu1 %564 }
  0xad   : > { %850 = vmatpush3.bf16.msra.mxu0 %v579_v32  ;;  %855 = vmatprep.mubr.msk.bf16.mxu0 %vm955_vm0, %v953_v12  ;;  %v575_v35 = vsel %vm568_vm3, %v559_v33, %v565_v34 }
  0xae   : > { %851 = vmatprep.subr.bf16.mxu0 %v953_v12 }
  0xaf   : > { %v557_v36 = vpop.permute.xlu0 %556 }
  0xb0   : > { %v563_v37 = vpop.permute.xlu1 %562 }
  0xb1   : > { %852 = vmatpush3.bf16.msra.mxu0 %v575_v35  ;;  %v571_v38 = vsel %vm568_vm3, %v557_v36, %v563_v37 }
  0xb2   : > { %853 = vmatprep.subr.bf16.mxu0 %v953_v12 }
  0xb5   : > { %854 = vmatpush3.bf16.msra.mxu0 %v571_v38 }
  0xb8   : > { %856 = vmatmul.mubr.msk.bf16.vlgmr.msra.gmra.mxu0 %vm464_vm1, %v812_v39 }
  0xf4   : > { %v548_v40 = vpop.f32.mrf.mxu1 }
  0xf6   : > { %v847_v41 = vpop.f32.mrf.mxu1 }
  0xf8   : > { %v551_v42 = vpop.f32.mrf.mxu1 }
  0xfa   : > { %v848_v43 = vpop.f32.mrf.mxu1 }
 0x16c   : > { %v502_v44 = vpop.f32.mrf.mxu0 }
 0x16d   : > { %v549_v50 = vadd.f32 %v548_v40, %v502_v44 }
 0x16e   : > { %v837_v46 = vpop.f32.mrf.mxu0 }
 0x170   : > { %v505_v47 = vpop.f32.mrf.mxu0 }
 0x172   : > { %v838_v49 = vpop.f32.mrf.mxu0 }
 0x178   : > { %v618_v51 = vpop.f32.mrf.mxu0 }
 0x179   : > { %v624_v53 = vadd.f32 %v618_v51, %v549_v50 }
 0x17a   : > { %v857_v54 = vpop.f32.mrf.mxu0 }
 0x17b   : > { %v645_v55 = vpack.c.bf16 %v624_v53, %v624_v53  ;;  %v633_v56 = vmul.f32 %v814_v52, %v624_v53 }
 0x17c   : > { %v621_v57 = vpop.f32.mrf.mxu0 }
 0x17d   : > { %646 = vst [vmem:[%s385_s8] sm:$0xf] %v645_v55  ;;  %634 = vadd.xlane.f32.xlu0 %v633_v56  ;;  %v636_v58 = vmul.f32 %v633_v56, %v624_v53 }
 0x17e   : > { %v858_v59 = vpop.f32.mrf.mxu0 }
 0x17f   : > { %637 = vadd.xlane.f32.xlu1 %v636_v58 }
 0x206   : > { %v635_v60 = vpop.xlane.xlu0 %634 }
 0x208   : > { %v638_v61 = vpop.xlane.xlu1 %637 }
 0x209   : > { %v640_v62 = vsel %vm639_vm5, %v635_v60, %v638_v61 }
 0x20a   : > { %v642_v63 = vsel %vm641_vm6, %v640_v62, 0.0 }
 0x20b   : > { %644 = vst.msk [vmem:[%s392_s12] sm:$0xff] %vm643_vm7, %v642_v63 }
 0x20c PF: > { %s15_s19 = sadd.s32 1, %s951_s19   ;;  %s1101_s15 = smov %s939_s16 }
 0x20d   : > { %p12_p10 = scmp.ge.s32.totalorder %s15_s19, 4   ;;  %s1102_s16 = smov %s1021_s24 }
 0x20e   : > { %s1103_s17 = smov %s947_s18  ;;  %s1104_s18 = smov %s1106_s20 }
 0x20f   :  { %14 = sbr.rel (!%p12_p10) target bundleno = 3 (0x3), region = 171 }

// kernel: sdfem_forward.5
= control target key start
LH: loop header
LB: loop body
LE: loop exit
PB: predicated region body
PF: predicated region fallthrough
CT: control target
= control target key end

     0   :  { %s377_s9 = smov 0   ;;  %s379_s10 = smov 0   ;;  %s413_s0 = inlined_call_operand.vmem [shape: bf16[2,8,128], index: 0, kind: input, shape index: {}]   ;;  %s414_s1 = inlined_call_operand.vmem [shape: f32[2,8,8], index: 1, kind: input, shape index: {}]   ;;  %s415_s2 = inlined_call_operand.vmem [shape: f32[2,8,128], index: 2, kind: output, shape index: {}]  }
   0x1   :  { %s381_s11 = smov 0  }
   0x2 LB: > { %s24_s12 = sadd.s32 1, %s353_s10  ;;  %p298_p0 = scmp.ge.s32.totalorder %s357_s11, 1  ;;  %s357_s11 = sphi %s381_s11, %s12_s11   ;;  %s353_s10 = sphi %s379_s10, %s417_s10   ;;  %s349_s9 = sphi %s377_s9, %s416_s9  }
   0x3   : > { %p26_p1 = scmp.ge.s32.totalorder %s24_s12, 2  ;;  %p139_p2 = scmp.lt.s32.totalorder %s357_s11, 3 }
   0x5   : > { %s419_s12 = smov (%p26_p1, %s24_s12), 0  ;;  %p140_p3 = pnand %p298_p0, %p139_p2 }
   0x6   : > { %p169_p4 = scmp.lt.s32.totalorder (!%p140_p3), %s349_s9, 1 }
   0x7   : > { %143 = sbr.rel (%p140_p3) target bundleno = 152 (0x98), region = 28 }
   0xc   : > { %v359_v0 = vmov 0   ;;  %v360_v1 = vmov 2   ;;  %s421_s9 = smov (!%p169_p4, %s349_s9), 1  ;;  %v361_v3 = vmov 1  }
   0xd   : > { %331 = vset.pattern.permute.xlu0 %v359_v0  ;;  %333 = vset.pattern.permute.xlu1 %v360_v1  ;;  %s300_s13 = sshll.u32 %s421_s9, 3  ;;  %s299_s17 = sshll.u32 %s421_s9, 2 }
   0xe   : > { %s179_s16 = scalar_lea.vmem %s414_s1, %s300_s13  ;;  %s175_s20 = scalar_lea.vmem %s413_s0, %s299_s17 }
   0xf   : > { %v189_v2 = vld [vmem:[%s179_s16] sm:$0xff]  ;;  %s186_s23 = scalar_lea.vmem %s415_s2, %s300_s13 }
  0x10   : > { %192 = vperm.xlu0 %331, %v189_v2   ;;  %203 = vperm.xlu1 %333, %v189_v2   ;;  %v187_v4 = vld [vmem:[%s175_s20] sm:$0xf] }
  0x11   : > { %v188_v6 = vunpack.c.l.bf16 %v187_v4 }
  0x14   : > { %332 = vset.pattern.permute.xlu0 %v361_v3 }
  0x15   : > { %197 = vperm.xlu0 %332, %v189_v2  }
  0x19   : > { %334 = vset.pattern.permute.xlu0 %v360_v1 }
  0x8b   : > { %v193_v5 = vpop.permute.xlu0 %192  ;;  %v204_v10 = vpop.permute.xlu1 %203 }
  0x8c   : > { %v195_v7 = vmul.f32 %v193_v5, %v188_v6 }
  0x90   : > { %v198_v8 = vpop.permute.xlu0 %197 }
  0x91   : > { %v200_v9 = vadd.f32 %v198_v8, %v195_v7 }
  0x93   : > { %v201_v11 = vmax.f32 %v200_v9, 0.0 }
  0x95   : > { %v206_v12 = vmul.f32 %v204_v10, %v201_v11 }
  0x97   : > { %207 = vst [vmem:[%s186_s23] sm:$0xff] %v206_v12 }
  0x98 PF: > { %s12_s11 = sadd.s32 1, %s357_s11   ;;  %s416_s9 = smov %s353_s10 }
  0x99   : > { %p9_p5 = scmp.ge.s32.totalorder %s12_s11, 4   ;;  %s417_s10 = smov %s419_s12 }
  0x9b   :  { %11 = sbr.rel (!%p9_p5) target bundleno = 2 (0x2), region = 61 }

</bundles_post_ra>
